<compile_context>
chip_gen: v7x
topology: tpu7x:2x2x1
jax: 0.10.0
libtpu: 0.0.40
codegen_flags: <defaults>
</compile_context>

<pallas_src>
import jax
import jax.numpy as jnp
from jax.experimental import pallas as pl
from jax.experimental.pallas import tpu as pltpu

_SUBLANE = 8


def _bi_interaction_kernel(x_ref, o_ref):
    # x_ref: (TB, F, D) tile in VMEM; o_ref: (TB, D) tile in VMEM.
    # Upcast in-kernel (f32 accumulation even for bf16 streamed inputs).
    x = x_ref[...].astype(jnp.float32)
    s = jnp.sum(x, axis=1)                   # (TB, D)  sum over fields (XLU)
    square_of_sum = s * s                    # (TB, D)  (VPU)
    sum_of_square = jnp.sum(x * x, axis=1)   # (TB, D)
    cross_term = 0.5 * (square_of_sum - sum_of_square)
    o_ref[...] = cross_term.astype(o_ref.dtype)


def _choose_block_b(B, F, D, itemsize):
    """Batch tile: multiple of 8, ~4 MiB of input per tile, capped at B."""
    target_tile_bytes = 4 << 20
    row_bytes = max(1, F * D * itemsize)
    tb = (target_tile_bytes // row_bytes // _SUBLANE) * _SUBLANE
    tb = max(_SUBLANE, int(tb))
    if tb >= B:
        return B  # single block covering the full batch dim is always legal
    return tb     # multiple of 8; a partial last block is masked by Pallas


def bi_interaction_pooling(x, block_b=None):
    """x: (B, F, D) -> (B, D). Matches BiInteractionPooling.forward."""
    B, F, D = x.shape
    itemsize = jnp.dtype(x.dtype).itemsize
    tb = int(block_b) if block_b is not None else _choose_block_b(B, F, D, itemsize)
    tb = min(tb, B)
    grid = (pl.cdiv(B, tb),)

    # Scoped VMEM: double-buffered input + double-buffered output + headroom,
    # clamped to [16 MiB, 48 MiB] so it is safe on v5e/v6e (128 MiB physical)
    # and v7x (64 MiB physical).
    in_tile_bytes = tb * F * D * itemsize
    out_tile_bytes = tb * D * itemsize
    vmem_limit = min(max(2 * in_tile_bytes + 2 * out_tile_bytes + (4 << 20),
                         16 << 20), 48 << 20)

    return pl.pallas_call(
        _bi_interaction_kernel,
        out_shape=jax.ShapeDtypeStruct((B, D), x.dtype),
        grid=grid,
        in_specs=[pl.BlockSpec((tb, F, D), lambda i: (i, 0, 0))],
        out_specs=pl.BlockSpec((tb, D), lambda i: (i, 0)),
        compiler_params=pltpu.CompilerParams(
            dimension_semantics=("parallel",),   # lets v7x shard batch over 2 TCs
            vmem_limit_bytes=int(vmem_limit),
        ),
    )(x)


def _reference(x):
    xf = x.astype(jnp.float32)
    square_of_sum = jnp.sum(xf, axis=1) ** 2
    sum_of_square = jnp.sum(xf ** 2, axis=1)
    return 0.5 * (square_of_sum - sum_of_square)


if __name__ == "__main__":
    key = jax.random.PRNGKey(0)

    # Case 1: lane-dense D (multiple of 128), multi-step batch grid (grid=(4,)).
    B, F, D = 512, 8, 128
    x = jax.random.normal(key, (B, F, D), dtype=jnp.float32)
    out = jax.block_until_ready(bi_interaction_pooling(x, block_b=128))
    ref = _reference(x)
    assert out.shape == (B, D), out.shape
    assert jnp.allclose(out, ref, atol=1e-4, rtol=1e-4), "mismatch (f32, D=128)"

    # Case 2: small, non-lane-dense D (works correctly, just less efficient).
    k2 = jax.random.fold_in(key, 1)
    x2 = jax.random.normal(k2, (64, 4, 32), dtype=jnp.float32)
    out2 = jax.block_until_ready(bi_interaction_pooling(x2))
    ref2 = _reference(x2)
    assert out2.shape == (64, 32)
    assert jnp.allclose(out2, ref2, atol=1e-4, rtol=1e-4), "mismatch (f32, D=32)"

    # Case 3: bf16 streaming input (halves HBM read bytes), f32 accumulation.
    k3 = jax.random.fold_in(key, 2)
    x3 = jax.random.normal(k3, (128, 8, 128), dtype=jnp.bfloat16)
    out3 = jax.block_until_ready(bi_interaction_pooling(x3))
    ref3 = _reference(x3).astype(jnp.bfloat16)
    assert out3.dtype == jnp.bfloat16
    assert jnp.allclose(out3.astype(jnp.float32), ref3.astype(jnp.float32),
                        atol=5e-2, rtol=5e-2), "mismatch (bf16)"

    print("KERNEL_OK")
</pallas_src>

<mosaic_0001>
module attributes {stable_mosaic.version = 11 : i64} {
  func.func @_bi_interaction_kernel(%arg0: i32, %arg1: memref<128x8x128xf32, #tpu.memory_space<vmem>>, %arg2: memref<128x128xf32, #tpu.memory_space<vmem>>) attributes {dimension_semantics = [#tpu.dimension_semantics<parallel>], iteration_bounds = array<i64: 4>, scalar_prefetch = 0 : i64, scratch_operands = 0 : i64, tpu.core_type = #tpu.core_type<tc>, window_params = [{transform_indices = @transform_0, window_bounds = array<i64: 128, 8, 128>}, {transform_indices = @transform_1, window_bounds = array<i64: 128, 128>}]} {
    %c0 = arith.constant 0 : index
    %c0_0 = arith.constant 0 : index
    %c0_1 = arith.constant 0 : index
    %0 = vector.load %arg1[%c0, %c0_0, %c0_1] : memref<128x8x128xf32, #tpu.memory_space<vmem>>, vector<128x8x128xf32>
    %cst = arith.constant dense<0.000000e+00> : vector<128x128xf32>
    %1 = vector.multi_reduction <add>, %0, %cst [1] : vector<128x8x128xf32> to vector<128x128xf32>
    %2 = arith.mulf %1, %1 : vector<128x128xf32>
    %3 = arith.mulf %0, %0 : vector<128x8x128xf32>
    %cst_2 = arith.constant dense<0.000000e+00> : vector<128x128xf32>
    %4 = vector.multi_reduction <add>, %3, %cst_2 [1] : vector<128x8x128xf32> to vector<128x128xf32>
    %5 = arith.subf %2, %4 : vector<128x128xf32>
    %cst_3 = arith.constant 5.000000e-01 : f32
    %6 = vector.broadcast %cst_3 : f32 to vector<128x128xf32>
    %7 = arith.mulf %6, %5 : vector<128x128xf32>
    %c0_4 = arith.constant 0 : index
    %c0_5 = arith.constant 0 : index
    %8 = vector.load %arg2[%c0_4, %c0_5] : memref<128x128xf32, #tpu.memory_space<vmem>>, vector<128x128xf32>
    tpu.vector_store %arg2[%c0_4, %c0_5], %7 {strides = array<i32>} : memref<128x128xf32, #tpu.memory_space<vmem>>, vector<128x128xf32>,
    return
  }
  func.func @transform_0(%arg0: i32) -> (i32, i32, i32) {
    %c0_i32 = arith.constant 0 : i32
    %c0_i32_0 = arith.constant 0 : i32
    %c0_i32_1 = arith.constant 0 : i32
    return %arg0, %c0_i32, %c0_i32_0 : i32, i32, i32
  }
  func.func @transform_1(%arg0: i32) -> (i32, i32) {
    %c0_i32 = arith.constant 0 : i32
    %c0_i32_0 = arith.constant 0 : i32
    return %arg0, %c0_i32 : i32, i32
  }
}

</mosaic_0001>

<bundles_post_ra>
// kernel: tpu_custom_call.1
= control target key start
LH: loop header
LB: loop body
LE: loop exit
PB: predicated region body
PF: predicated region fallthrough
CT: control target
= control target key end

     0   :  { %6 = vsyncpa [#allocation3], 0  ;;  %s6257_s0 = inlined_call_operand.hbm [shape: f32[512,8,128], index: 0, kind: input, shape index: {}]   ;;  %s6258_s1 = inlined_call_operand.hbm [shape: f32[512,128], index: 1, kind: output, shape index: {}]  }
   0x1   :  { %8 = vsyncpa [#allocation3 + $0x1], 0 }
   0x2   :  { %9 = vsyncpa [#allocation4], 0 }
   0x3   :  { %11 = vsyncpa [#allocation4 + $0x1], 0  ;;  %s2947_s6 = smov 0   ;;  %s2949_s7 = smov 0  }
   0x4   :  { %s2951_s8 = smov 0   ;;  %s2953_s9 = smov 0  }
   0x5 LB: > { %s2968_s10 = sadd.s32 4294967295, %s2929_s9   ;;  %s2679_s11 = sadd.s32 4294967294, %s2929_s9   ;;  %s2929_s9 = sphi %s2953_s9, %s8022_s9   ;;  %s2925_s8 = sphi %s2951_s8, %s8021_s8   ;;  %s2921_s7 = sphi %s2949_s7, %s8020_s7   ;;  %s2917_s6 = sphi %s2947_s6, %s8019_s6  }
   0x6   : > { %s2972_s12 = sadd.s32 1, %s2929_s9   ;;  %s24_s13 = sadd.s32 1, %s2925_s8 }
   0x7   : > { %s21_s14 = ssub.s32 %s2929_s9, %s2972_s12  ;;  %p31_p0 = scmp.ne.s32.totalorder %s2925_s8, %s2921_s7 }
   0x8   : > { %p22_p1 = scmp.eq.s32.totalorder %s21_s14, 0  ;;  %p32_p2 = scmp.eq.s32.totalorder %s2929_s9, 0 }
   0x9   : > { %p37_p3 = scmp.ne.s32.totalorder %s2921_s7, %s2917_s6  ;;  %p38_p4 = scmp.eq.s32.totalorder %s2968_s10, 0 }
   0xa   : > { %s2984_s15 = scalar_select %p22_p1, %s2925_s8, %s24_s13  }
   0xb   : > { %p2986_p5 = por %p32_p2, %p31_p0  ;;  %p2990_p6 = por %p38_p4, %p37_p3 }
   0xc   : > { %p61_p7 = scmp.eq.s32.totalorder %s2968_s10, 3  ;;  %p67_p8 = scmp.eq.s32.totalorder %s2679_s11, 3 }
   0xd   : > { %p2707_p9 = scmp.lt.s32.totalorder %s2929_s9, 4  ;;  %s87_s20 = sand.u32 1, %s2925_s8  }
   0xe   : > { %p2996_p10 = por %p61_p7, %p31_p0  ;;  %p3000_p11 = por %p67_p8, %p37_p3 }
   0xf   : > { %s2693_s21 = sshll.u32 %s2929_s9, 14  ;;  %s2682_s22 = sshll.u32 %s87_s20, 10 }
  0x10   : > { %s6630_s18 = scalar_select %p2996_p10, 1, 0 }
  0x11   : > { %s6631_s19 = scalar_select %p3000_p11, 1, 0 }
  0x12   : > { %s3009_s25 = scalar_lea.hbm %s6257_s0, %s2693_s21  ;;  %s91_s26 = scalar_lea.vmem [#allocation2], %s2682_s22 }
  0x13   : > { %s98_s27 = sshll.u32 %s91_s26, 4  ;;  %p3013_p12 = pnand %p2707_p9, %p2986_p5  ;;  %s3017_s27 = int_to_ptr.vmem [resolvable:$true] %s98_s27 }
  0x14   : > { %s3019_s29 = scalar_lea.sflag [#allocation3], %s87_s20  ;;  %s2833_s30 = scalar_lea.hbm %s3009_s25, 16384 }
  0x15   : > { %p2834_p13 = scmp.ne.s32.totalorder %s3009_s25, %s2833_s30  ;;  %p2835_p0 = pneg %p3013_p12 }
  0x16   : > { %s2838_s4 = scalar_lea.hbm %s6257_s0, 65536  ;;  %p2839_p3 = scmp.lt.u32.totalorder %s3009_s25, %s6257_s0 }
  0x17   : > { %p2836_p1 = pnand %p2835_p0, %p2834_p13  ;;  %p2840_p4 = scmp.lt.u32.totalorder %s2838_s4, %s2833_s30 }
  0x18   : > { %p2842_p7 = scmp.lt.u32.totalorder %s2833_s30, %s3009_s25 }
  0x19   : > { %p2837_p2 = pneg %p2836_p1  ;;  %p2841_p5 = por %p2840_p4, %p2839_p3 }
  0x1b   : > { %p2843_p8 = por %p2842_p7, %p2841_p5 }
  0x1d   : > { %p2844_p9 = pnand %p2843_p8, %p2837_p2 }
  0x1f   : > { %2847 = shalt.err (!%p2844_p9)
}
  0x20   : > { %s2848_s13 = scalar_lea.vmem %s3017_s27, 16384  ;;  %s2931_s14 = smov [#allocation2]  }
  0x21   : > { %p2849_p13 = scmp.ne.s32.totalorder %s3017_s27, %s2848_s13  ;;  %s2853_s16 = sshll.u32 %s2931_s14, 4  ;;  %s2854_s16 = int_to_ptr.vmem [resolvable:$false] %s2853_s16 }
  0x22   : > { %s2855_s20 = scalar_lea.vmem %s2854_s16, 32768  ;;  %p2856_p10 = scmp.lt.s32.totalorder %s3017_s27, %s2854_s16 }
  0x23   : > { %p2851_p1 = pnand %p2849_p13, %p2835_p0  ;;  %p2857_p3 = scmp.lt.s32.totalorder %s2855_s20, %s2848_s13 }
  0x25   : > { %p2852_p11 = pneg %p2851_p1  ;;  %p2858_p4 = por %p2857_p3, %p2856_p10 }
  0x27   : > { %p2859_p5 = pnand %p2858_p4, %p2852_p11 }
  0x29   : > { %2862 = shalt.err (!%p2859_p5)
}
  0x2a   : > { %s2932_s21 = smov 128   ;;  %s2933_s22 = smov 8  }
  0x2b   : > { %2702 = dma.hbm_to_vmem [thread:$0]  (!%p3013_p12), %s3009_s25, 16384, %s3017_s27, %s3019_s29, %s2932_s21, %s2932_s21, %s2933_s22  }
  0x2c   : > { %p2685_p0 = scmp.ge.s32.totalorder %s2929_s9, 1  ;;  %p106_p2 = scmp.lt.s32.totalorder %s2929_s9, 5 }
  0x2e   : > { %p107_p7 = pnand %p2685_p0, %p106_p2 }
  0x30   : > { %110 = sbr.rel (%p107_p7) target bundleno = 718 (0x2ce), region = 24 }
  0x37   : > { %s3050_s23 = sand.u32 1, %s2921_s7  }
  0x38   : > { %s2686_s24 = sshll.u32 %s3050_s23, 10  ;;  %s113_s26 = scalar_lea.sflag [#allocation3], %s3050_s23 }
  0x39   : > { %s3054_s30 = scalar_lea.vmem [#allocation2], %s2686_s24 }
  0x3a   : > { %2908 = dma.done.wait (%p2990_p6), %s113_s26, 16384  }
  0x3b   : > { %2910 = vsyncadd (%p2990_p6), %s113_s26, 4294950912  ;;  %v137_v0 = vld [vmem:[%s3054_s30] sm:$0xff]  ;;  %v138_v1 = vld [vmem:[%s3054_s30 + $0x8] sm:$0xff]  ;;  %vm2441_vm0 = vcmask 1041409   ;;  %vm2443_vm1 = vcmask 1042434   ;;  %vm2445_vm2 = vcmask 1043459  }
  0x3c   : > { %v139_v2 = vld [vmem:[%s3054_s30 + $0x10] sm:$0xff]  ;;  %v140_v3 = vld [vmem:[%s3054_s30 + $0x18] sm:$0xff]  ;;  %v141_v4 = vld [vmem:[%s3054_s30 + $0x20] sm:$0xff]  ;;  %v265_v6 = vrot.slane %v137_v0, 4  ;;  %v271_v7 = vrot.slane %v138_v1, 4  ;;  %vm2447_vm3 = vcmask 1044484  }
  0x3d   : > { %v142_v5 = vld [vmem:[%s3054_s30 + $0x28] sm:$0xff]  ;;  %v277_v8 = vrot.slane %v139_v2, 4  ;;  %v143_v9 = vld [vmem:[%s3054_s30 + $0x30] sm:$0xff]  ;;  %v144_v10 = vld [vmem:[%s3054_s30 + $0x38] sm:$0xff]  ;;  %v283_v11 = vrot.slane %v140_v3, 4  ;;  %v289_v12 = vrot.slane %v141_v4, 4 }
  0x3e   : > { %v295_v13 = vrot.slane %v142_v5, 4  ;;  %v266_v14 = vadd.f32 %v265_v6, %v137_v0  ;;  %v272_v15 = vadd.f32 %v271_v7, %v138_v1  ;;  %v301_v17 = vrot.slane %v143_v9, 4  ;;  %v145_v42 = vld [vmem:[%s3054_s30 + $0x40] sm:$0xff]  ;;  %v146_v43 = vld [vmem:[%s3054_s30 + $0x48] sm:$0xff]  ;;  %v147_v44 = vld [vmem:[%s3054_s30 + $0x50] sm:$0xff]  ;;  %s2687_s17 = sshll.u32 %s3050_s23, 7 }
  0x3f   : > { %v278_v16 = vadd.f32 %v277_v8, %v139_v2  ;;  %v284_v18 = vadd.f32 %v283_v11, %v140_v3  ;;  %v290_v19 = vadd.f32 %v289_v12, %v141_v4  ;;  %v307_v21 = vrot.slane %v144_v10, 4  ;;  %v148_v49 = vld [vmem:[%s3054_s30 + $0x58] sm:$0xff]  ;;  %v149_v50 = vld [vmem:[%s3054_s30 + $0x60] sm:$0xff]  ;;  %v150_v51 = vld [vmem:[%s3054_s30 + $0x68] sm:$0xff]  ;;  %s6008_s25 = scalar_lea.vmem [#allocation5], %s2687_s17  ;;  %s2694_s27 = sshll.u32 %s2968_s10, 11 }
  0x40   : > { %v296_v20 = vadd.f32 %v295_v13, %v142_v5  ;;  %v267_v22 = vrot.slane %v266_v14, 2  ;;  %v273_v23 = vrot.slane %v272_v15, 2  ;;  %v302_v25 = vadd.f32 %v301_v17, %v143_v9  ;;  %v151_v56 = vld [vmem:[%s3054_s30 + $0x70] sm:$0xff]  ;;  %v152_v61 = vld [vmem:[%s3054_s30 + $0x78] sm:$0xff]  ;;  %s2606_s28 = sshll.u32 %s6008_s25, 4  ;;  %s6198_s2 = scalar_lea.hbm %s6258_s1, %s2694_s27  ;;  %s6200_s28 = int_to_ptr.vmem [resolvable:$true] %s2606_s28 }
  0x41   : > { %v279_v24 = vrot.slane %v278_v16, 2  ;;  %v285_v26 = vrot.slane %v284_v18, 2  ;;  %v291_v27 = vrot.slane %v290_v19, 2  ;;  %v308_v29 = vadd.f32 %v307_v21, %v144_v10  ;;  %s2593_s3 = scalar_lea.sflag [#allocation4], %s3050_s23  ;;  %s2863_s4 = scalar_lea.vmem %s6200_s28, 2048 }
  0x42   : > { %v297_v28 = vrot.slane %v296_v20, 2  ;;  %v268_v30 = vadd.f32 %v267_v22, %v266_v14  ;;  %v274_v31 = vadd.f32 %v273_v23, %v272_v15  ;;  %v303_v33 = vrot.slane %v302_v25, 2  ;;  %p2864_p6 = scmp.ne.s32.totalorder %s6200_s28, %s2863_s4  ;;  %p8017_p10 = scmp.ne.s32.totalorder %s6630_s18, 0 }
  0x43   : > { %v280_v32 = vadd.f32 %v279_v24, %v278_v16  ;;  %v286_v34 = vadd.f32 %v285_v26, %v284_v18  ;;  %v292_v35 = vadd.f32 %v291_v27, %v290_v19  ;;  %v309_v37 = vrot.slane %v308_v29, 2  ;;  %s2934_s5 = smov [#allocation5]  }
  0x44   : > { %v298_v36 = vadd.f32 %v297_v28, %v296_v20  ;;  %v269_v38 = vrot.slane %v268_v30, 1  ;;  %v275_v39 = vrot.slane %v274_v31, 1  ;;  %v304_v41 = vadd.f32 %v303_v33, %v302_v25  ;;  %p2865_p11 = pnand %p2864_p6, %p8017_p10  ;;  %s2867_s11 = sshll.u32 %s2934_s5, 4  ;;  %s2868_s11 = int_to_ptr.vmem [resolvable:$false] %s2867_s11 }
  0x45   : > { %v281_v40 = vrot.slane %v280_v32, 1  ;;  %v287_v45 = vrot.slane %v286_v34, 1  ;;  %v293_v46 = vrot.slane %v292_v35, 1  ;;  %v310_v48 = vadd.f32 %v309_v37, %v308_v29  ;;  %s2869_s13 = scalar_lea.vmem %s2868_s11, 4096  ;;  %p2870_p8 = scmp.lt.s32.totalorder %s6200_s28, %s2868_s11 }
  0x46   : > { %v299_v47 = vrot.slane %v298_v36, 1  ;;  %v3074_v52 = vadd.f32 %v269_v38, %v268_v30  ;;  %v3076_v53 = vadd.f32 %v275_v39, %v274_v31  ;;  %v305_v55 = vrot.slane %v304_v41, 1  ;;  %p2866_p12 = pneg %p2865_p11  ;;  %p2871_p9 = scmp.lt.s32.totalorder %s2869_s13, %s2863_s4 }
  0x47   : > { %v3078_v54 = vadd.f32 %v281_v40, %v280_v32  ;;  %v3081_v57 = vadd.f32 %v287_v45, %v286_v34  ;;  %v3083_v58 = vadd.f32 %v293_v46, %v292_v35  ;;  %v311_v60 = vrot.slane %v310_v48, 1  ;;  %v153_v34 = vld [vmem:[%s3054_s30 + $0x80] sm:$0xff]  ;;  %v154_v35 = vld [vmem:[%s3054_s30 + $0x88] sm:$0xff] }
  0x48   : > { %v3085_v59 = vadd.f32 %v299_v47, %v298_v36  ;;  %v3088_v62 = vadd.f32 %v305_v55, %v304_v41  ;;  %v313_v63 = vrot.slane %v145_v42, 4  ;;  %v319_v0 = vrot.slane %v146_v43, 4  ;;  %v155_v36 = vld [vmem:[%s3054_s30 + $0x90] sm:$0xff]  ;;  %v156_v41 = vld [vmem:[%s3054_s30 + $0x98] sm:$0xff]  ;;  %p2872_p13 = por %p2871_p9, %p2870_p8 }
  0x49   : > { %v325_v1 = vrot.slane %v147_v44, 4  ;;  %v3090_v2 = vadd.f32 %v311_v60, %v310_v48  ;;  %v331_v3 = vrot.slane %v148_v49, 4  ;;  %v337_v4 = vrot.slane %v149_v50, 4  ;;  %v159_v48 = vld [vmem:[%s3054_s30 + $0xb0] sm:$0xff] }
  0x4a   : > { %v343_v5 = vrot.slane %v150_v51, 4  ;;  %v314_v6 = vadd.f32 %v313_v63, %v145_v42  ;;  %v320_v7 = vadd.f32 %v319_v0, %v146_v43  ;;  %v349_v9 = vrot.slane %v151_v56, 4  ;;  %v157_v42 = vld [vmem:[%s3054_s30 + $0xa0] sm:$0xff]  ;;  %v158_v43 = vld [vmem:[%s3054_s30 + $0xa8] sm:$0xff]  ;;  %p2873_p1 = pnand %p2872_p13, %p2866_p12 }
  0x4b   : > { %v326_v8 = vadd.f32 %v325_v1, %v147_v44  ;;  %v332_v10 = vadd.f32 %v331_v3, %v148_v49  ;;  %v338_v11 = vadd.f32 %v337_v4, %v149_v50  ;;  %v355_v13 = vrot.slane %v152_v61, 4 }
  0x4c   : > { %v344_v12 = vadd.f32 %v343_v5, %v150_v51  ;;  %v315_v14 = vrot.slane %v314_v6, 2  ;;  %v321_v15 = vrot.slane %v320_v7, 2  ;;  %v350_v17 = vadd.f32 %v349_v9, %v151_v56  ;;  %v160_v56 = vld [vmem:[%s3054_s30 + $0xb8] sm:$0xff] }
  0x4d   : > { %v327_v16 = vrot.slane %v326_v8, 2  ;;  %v333_v18 = vrot.slane %v332_v10, 2  ;;  %v339_v19 = vrot.slane %v338_v11, 2  ;;  %v356_v21 = vadd.f32 %v355_v13, %v152_v61 }
  0x4e   : > { %v345_v20 = vrot.slane %v344_v12, 2  ;;  %v316_v22 = vadd.f32 %v315_v14, %v314_v6  ;;  %v322_v23 = vadd.f32 %v321_v15, %v320_v7  ;;  %v351_v25 = vrot.slane %v350_v17, 2 }
  0x4f   : > { %v328_v24 = vadd.f32 %v327_v16, %v326_v8  ;;  %v334_v26 = vadd.f32 %v333_v18, %v332_v10  ;;  %v340_v27 = vadd.f32 %v339_v19, %v338_v11  ;;  %v357_v29 = vrot.slane %v356_v21, 2 }
  0x50   : > { %v346_v28 = vadd.f32 %v345_v20, %v344_v12  ;;  %v317_v30 = vrot.slane %v316_v22, 1  ;;  %v323_v31 = vrot.slane %v322_v23, 1  ;;  %v352_v33 = vadd.f32 %v351_v25, %v350_v17 }
  0x51   : > { %v329_v32 = vrot.slane %v328_v24, 1  ;;  %v335_v37 = vrot.slane %v334_v26, 1  ;;  %v341_v38 = vrot.slane %v340_v27, 1  ;;  %v358_v40 = vadd.f32 %v357_v29, %v356_v21 }
  0x52   : > { %v347_v39 = vrot.slane %v346_v28, 1  ;;  %v3098_v44 = vadd.f32 %v317_v30, %v316_v22  ;;  %v3100_v45 = vadd.f32 %v323_v31, %v322_v23  ;;  %v353_v47 = vrot.slane %v352_v33, 1 }
  0x53   : > { %v3102_v46 = vadd.f32 %v329_v32, %v328_v24  ;;  %v3105_v49 = vadd.f32 %v335_v37, %v334_v26  ;;  %v3107_v50 = vadd.f32 %v341_v38, %v340_v27  ;;  %v359_v55 = vrot.slane %v358_v40, 1 }
  0x54   : > { %v3109_v51 = vadd.f32 %v347_v39, %v346_v28  ;;  %v3112_v60 = vadd.f32 %v353_v47, %v352_v33  ;;  %v361_v61 = vrot.slane %v153_v34, 4  ;;  %v367_v63 = vrot.slane %v154_v35, 4 }
  0x55   : > { %v373_v0 = vrot.slane %v155_v36, 4  ;;  %v3114_v1 = vadd.f32 %v359_v55, %v358_v40  ;;  %v379_v3 = vrot.slane %v156_v41, 4  ;;  %v385_v4 = vrot.slane %v157_v42, 4 }
  0x56   : > { %v391_v5 = vrot.slane %v158_v43, 4  ;;  %v362_v6 = vadd.f32 %v361_v61, %v153_v34  ;;  %v368_v7 = vadd.f32 %v367_v63, %v154_v35  ;;  %v397_v9 = vrot.slane %v159_v48, 4  ;;  %v161_v34 = vld [vmem:[%s3054_s30 + $0xc0] sm:$0xff]  ;;  %v162_v35 = vld [vmem:[%s3054_s30 + $0xc8] sm:$0xff]  ;;  %v167_v61 = vld [vmem:[%s3054_s30 + $0xf0] sm:$0xff] }
  0x57   : > { %v374_v8 = vadd.f32 %v373_v0, %v155_v36  ;;  %v380_v10 = vadd.f32 %v379_v3, %v156_v41  ;;  %v386_v11 = vadd.f32 %v385_v4, %v157_v42  ;;  %v403_v13 = vrot.slane %v160_v56, 4  ;;  %v163_v36 = vld [vmem:[%s3054_s30 + $0xd0] sm:$0xff]  ;;  %v164_v41 = vld [vmem:[%s3054_s30 + $0xd8] sm:$0xff]  ;;  %v165_v42 = vld [vmem:[%s3054_s30 + $0xe0] sm:$0xff] }
  0x58   : > { %v392_v12 = vadd.f32 %v391_v5, %v158_v43  ;;  %v363_v14 = vrot.slane %v362_v6, 2  ;;  %v369_v15 = vrot.slane %v368_v7, 2  ;;  %v398_v17 = vadd.f32 %v397_v9, %v159_v48  ;;  %v166_v43 = vld [vmem:[%s3054_s30 + $0xe8] sm:$0xff]  ;;  %v168_v5 = vld [vmem:[%s3054_s30 + $0xf8] sm:$0xff] }
  0x59   : > { %v375_v16 = vrot.slane %v374_v8, 2  ;;  %v381_v18 = vrot.slane %v380_v10, 2  ;;  %v387_v19 = vrot.slane %v386_v11, 2  ;;  %v404_v21 = vadd.f32 %v403_v13, %v160_v56 }
  0x5a   : > { %v393_v20 = vrot.slane %v392_v12, 2  ;;  %v364_v22 = vadd.f32 %v363_v14, %v362_v6  ;;  %v370_v23 = vadd.f32 %v369_v15, %v368_v7  ;;  %v399_v25 = vrot.slane %v398_v17, 2 }
  0x5b   : > { %v376_v24 = vadd.f32 %v375_v16, %v374_v8  ;;  %v382_v26 = vadd.f32 %v381_v18, %v380_v10  ;;  %v388_v27 = vadd.f32 %v387_v19, %v386_v11  ;;  %v405_v29 = vrot.slane %v404_v21, 2 }
  0x5c   : > { %v394_v28 = vadd.f32 %v393_v20, %v392_v12  ;;  %v365_v30 = vrot.slane %v364_v22, 1  ;;  %v371_v31 = vrot.slane %v370_v23, 1  ;;  %v400_v33 = vadd.f32 %v399_v25, %v398_v17 }
  0x5d   : > { %v377_v32 = vrot.slane %v376_v24, 1  ;;  %v383_v37 = vrot.slane %v382_v26, 1  ;;  %v389_v38 = vrot.slane %v388_v27, 1  ;;  %v406_v40 = vadd.f32 %v405_v29, %v404_v21 }
  0x5e   : > { %v395_v39 = vrot.slane %v394_v28, 1  ;;  %v3122_v47 = vadd.f32 %v365_v30, %v364_v22  ;;  %v3124_v48 = vadd.f32 %v371_v31, %v370_v23  ;;  %v401_v56 = vrot.slane %v400_v33, 1 }
  0x5f   : > { %v3126_v55 = vadd.f32 %v377_v32, %v376_v24  ;;  %v3129_v63 = vadd.f32 %v383_v37, %v382_v26  ;;  %v3131_v0 = vadd.f32 %v389_v38, %v388_v27  ;;  %v407_v4 = vrot.slane %v406_v40, 1 }
  0x60   : > { %v3133_v3 = vadd.f32 %v395_v39, %v394_v28  ;;  %v3136_v6 = vadd.f32 %v401_v56, %v400_v33  ;;  %v409_v7 = vrot.slane %v161_v34, 4  ;;  %v415_v8 = vrot.slane %v162_v35, 4  ;;  %v171_v56 = vld [vmem:[%s3054_s30 + $0x110] sm:$0xff] }
  0x61   : > { %v421_v9 = vrot.slane %v163_v36, 4  ;;  %v3138_v10 = vadd.f32 %v407_v4, %v406_v40  ;;  %v427_v11 = vrot.slane %v164_v41, 4  ;;  %v433_v12 = vrot.slane %v165_v42, 4 }
  0x62   : > { %v439_v13 = vrot.slane %v166_v43, 4  ;;  %v410_v14 = vadd.f32 %v409_v7, %v161_v34  ;;  %v416_v15 = vadd.f32 %v415_v8, %v162_v35  ;;  %v445_v17 = vrot.slane %v167_v61, 4  ;;  %v172_v8 = vld [vmem:[%s3054_s30 + $0x118] sm:$0xff] }
  0x63   : > { %v422_v16 = vadd.f32 %v421_v9, %v163_v36  ;;  %v428_v18 = vadd.f32 %v427_v11, %v164_v41  ;;  %v434_v19 = vadd.f32 %v433_v12, %v165_v42  ;;  %v451_v21 = vrot.slane %v168_v5, 4  ;;  %v169_v42 = vld [vmem:[%s3054_s30 + $0x100] sm:$0xff]  ;;  %v174_v11 = vld [vmem:[%s3054_s30 + $0x128] sm:$0xff] }
  0x64   : > { %v440_v20 = vadd.f32 %v439_v13, %v166_v43  ;;  %v411_v22 = vrot.slane %v410_v14, 2  ;;  %v417_v23 = vrot.slane %v416_v15, 2  ;;  %v446_v25 = vadd.f32 %v445_v17, %v167_v61  ;;  %v170_v43 = vld [vmem:[%s3054_s30 + $0x108] sm:$0xff]  ;;  %v173_v9 = vld [vmem:[%s3054_s30 + $0x120] sm:$0xff] }
  0x65   : > { %v423_v24 = vrot.slane %v422_v16, 2  ;;  %v429_v26 = vrot.slane %v428_v18, 2  ;;  %v435_v27 = vrot.slane %v434_v19, 2  ;;  %v452_v29 = vadd.f32 %v451_v21, %v168_v5  ;;  %v176_v21 = vld [vmem:[%s3054_s30 + $0x138] sm:$0xff] }
  0x66   : > { %v441_v28 = vrot.slane %v440_v20, 2  ;;  %v412_v30 = vadd.f32 %v411_v22, %v410_v14  ;;  %v418_v31 = vadd.f32 %v417_v23, %v416_v15  ;;  %v447_v33 = vrot.slane %v446_v25, 2 }
  0x67   : > { %v424_v32 = vadd.f32 %v423_v24, %v422_v16  ;;  %v430_v34 = vadd.f32 %v429_v26, %v428_v18  ;;  %v436_v35 = vadd.f32 %v435_v27, %v434_v19  ;;  %v453_v37 = vrot.slane %v452_v29, 2  ;;  %v175_v16 = vld [vmem:[%s3054_s30 + $0x130] sm:$0xff] }
  0x68   : > { %v442_v36 = vadd.f32 %v441_v28, %v440_v20  ;;  %v413_v38 = vrot.slane %v412_v30, 1  ;;  %v419_v39 = vrot.slane %v418_v31, 1  ;;  %v448_v41 = vadd.f32 %v447_v33, %v446_v25 }
  0x69   : > { %v425_v40 = vrot.slane %v424_v32, 1  ;;  %v431_v61 = vrot.slane %v430_v34, 1  ;;  %v437_v4 = vrot.slane %v436_v35, 1  ;;  %v454_v7 = vadd.f32 %v453_v37, %v452_v29 }
  0x6a   : > { %v443_v5 = vrot.slane %v442_v36, 1  ;;  %v3146_v12 = vadd.f32 %v413_v38, %v412_v30  ;;  %v3148_v13 = vadd.f32 %v419_v39, %v418_v31  ;;  %v449_v15 = vrot.slane %v448_v41, 1 }
  0x6b   : > { %v3150_v14 = vadd.f32 %v425_v40, %v424_v32  ;;  %v3153_v17 = vadd.f32 %v431_v61, %v430_v34  ;;  %v3155_v18 = vadd.f32 %v437_v4, %v436_v35  ;;  %v455_v20 = vrot.slane %v454_v7, 1 }
  0x6c   : > { %v3157_v19 = vadd.f32 %v443_v5, %v442_v36  ;;  %v3160_v22 = vadd.f32 %v449_v15, %v448_v41  ;;  %v457_v23 = vrot.slane %v169_v42, 4  ;;  %v463_v24 = vrot.slane %v170_v43, 4 }
  0x6d   : > { %v469_v25 = vrot.slane %v171_v56, 4  ;;  %v3162_v26 = vadd.f32 %v455_v20, %v454_v7  ;;  %v475_v27 = vrot.slane %v172_v8, 4  ;;  %v481_v28 = vrot.slane %v173_v9, 4 }
  0x6e   : > { %6633 = vst [vmem:[#allocation8_spill] sm:$0xff] %v3160_v22  ;;  %v487_v29 = vrot.slane %v174_v11, 4  ;;  %v458_v30 = vadd.f32 %v457_v23, %v169_v42  ;;  %v464_v31 = vadd.f32 %v463_v24, %v170_v43  ;;  %v493_v33 = vrot.slane %v175_v16, 4 }
  0x6f   : > { %6634 = vst [vmem:[#allocation9_spill] sm:$0xff] %v3162_v26  ;;  %v470_v32 = vadd.f32 %v469_v25, %v171_v56  ;;  %v476_v34 = vadd.f32 %v475_v27, %v172_v8  ;;  %v482_v35 = vadd.f32 %v481_v28, %v173_v9  ;;  %v499_v37 = vrot.slane %v176_v21, 4  ;;  %v177_v27 = vld [vmem:[%s3054_s30 + $0x140] sm:$0xff]  ;;  %v178_v28 = vld [vmem:[%s3054_s30 + $0x148] sm:$0xff] }
  0x70   : > { %v488_v36 = vadd.f32 %v487_v29, %v174_v11  ;;  %v459_v38 = vrot.slane %v458_v30, 2  ;;  %v465_v39 = vrot.slane %v464_v31, 2  ;;  %v494_v41 = vadd.f32 %v493_v33, %v175_v16  ;;  %v179_v29 = vld [vmem:[%s3054_s30 + $0x150] sm:$0xff]  ;;  %v180_v33 = vld [vmem:[%s3054_s30 + $0x158] sm:$0xff] }
  0x71   : > { %v471_v40 = vrot.slane %v470_v32, 2  ;;  %v477_v61 = vrot.slane %v476_v34, 2  ;;  %v483_v4 = vrot.slane %v482_v35, 2  ;;  %v500_v7 = vadd.f32 %v499_v37, %v176_v21  ;;  %v182_v37 = vld [vmem:[%s3054_s30 + $0x168] sm:$0xff] }
  0x72   : > { %v489_v5 = vrot.slane %v488_v36, 2  ;;  %v460_v15 = vadd.f32 %v459_v38, %v458_v30  ;;  %v466_v42 = vadd.f32 %v465_v39, %v464_v31  ;;  %v495_v56 = vrot.slane %v494_v41, 2 }
  0x73   : > { %v472_v43 = vadd.f32 %v471_v40, %v470_v32  ;;  %v478_v8 = vadd.f32 %v477_v61, %v476_v34  ;;  %v484_v9 = vadd.f32 %v483_v4, %v482_v35  ;;  %v501_v20 = vrot.slane %v500_v7, 2  ;;  %v181_v34 = vld [vmem:[%s3054_s30 + $0x160] sm:$0xff]  ;;  %v183_v40 = vld [vmem:[%s3054_s30 + $0x170] sm:$0xff] }
  0x74   : > { %v490_v11 = vadd.f32 %v489_v5, %v488_v36  ;;  %v461_v23 = vrot.slane %v460_v15, 1  ;;  %v467_v16 = vrot.slane %v466_v42, 1  ;;  %v496_v25 = vadd.f32 %v495_v56, %v494_v41  ;;  %v184_v56 = vld [vmem:[%s3054_s30 + $0x178] sm:$0xff] }
  0x75   : > { %v473_v24 = vrot.slane %v472_v43, 1  ;;  %v479_v21 = vrot.slane %v478_v8, 1  ;;  %v485_v30 = vrot.slane %v484_v9, 1  ;;  %v502_v32 = vadd.f32 %v501_v20, %v500_v7 }
  0x76   : > { %v491_v31 = vrot.slane %v490_v11, 1  ;;  %v3170_v35 = vadd.f32 %v461_v23, %v460_v15  ;;  %v3172_v36 = vadd.f32 %v467_v16, %v466_v42  ;;  %v497_v39 = vrot.slane %v496_v25, 1 }
  0x77   : > { %v3174_v38 = vadd.f32 %v473_v24, %v472_v43  ;;  %v3177_v41 = vadd.f32 %v479_v21, %v478_v8  ;;  %v3179_v61 = vadd.f32 %v485_v30, %v484_v9  ;;  %v503_v5 = vrot.slane %v502_v32, 1 }
  0x78   : > { %6635 = vst [vmem:[#allocation10_spill] sm:$0xff] %v3170_v35  ;;  %6636 = vst [vmem:[#allocation11_spill] sm:$0xff] %v3172_v36  ;;  %v3181_v4 = vadd.f32 %v491_v31, %v490_v11  ;;  %v3184_v7 = vadd.f32 %v497_v39, %v496_v25  ;;  %v505_v20 = vrot.slane %v177_v27, 4  ;;  %v511_v26 = vrot.slane %v178_v28, 4  ;;  %v192_v36 = vld [vmem:[%s3054_s30 + $0x1b8] sm:$0xff] }
  0x79   : > { %6637 = vst [vmem:[#allocation12_spill] sm:$0xff] %v3174_v38  ;;  %6638 = vst [vmem:[#allocation13_spill] sm:$0xff] %v3177_v41  ;;  %v517_v15 = vrot.slane %v179_v29, 4  ;;  %v3186_v23 = vadd.f32 %v503_v5, %v502_v32  ;;  %v523_v42 = vrot.slane %v180_v33, 4  ;;  %v529_v43 = vrot.slane %v181_v34, 4 }
  0x7a   : > { %6639 = vst [vmem:[#allocation14_spill] sm:$0xff] %v3179_v61  ;;  %6640 = vst [vmem:[#allocation15_spill] sm:$0xff] %v3181_v4  ;;  %v535_v16 = vrot.slane %v182_v37, 4  ;;  %v506_v24 = vadd.f32 %v505_v20, %v177_v27  ;;  %v512_v38 = vadd.f32 %v511_v26, %v178_v28  ;;  %v541_v21 = vrot.slane %v183_v40, 4 }
  0x7b   : > { %6641 = vst [vmem:[#allocation16_spill] sm:$0xff] %v3184_v7  ;;  %6642 = vst [vmem:[#allocation17_spill] sm:$0xff] %v3186_v23  ;;  %v518_v8 = vadd.f32 %v517_v15, %v179_v29  ;;  %v524_v9 = vadd.f32 %v523_v42, %v180_v33  ;;  %v530_v30 = vadd.f32 %v529_v43, %v181_v34  ;;  %v547_v31 = vrot.slane %v184_v56, 4  ;;  %v185_v43 = vld [vmem:[%s3054_s30 + $0x180] sm:$0xff] }
  0x7c   : > { %v536_v11 = vadd.f32 %v535_v16, %v182_v37  ;;  %v507_v4 = vrot.slane %v506_v24, 2  ;;  %v513_v61 = vrot.slane %v512_v38, 2  ;;  %v542_v39 = vadd.f32 %v541_v21, %v183_v40  ;;  %v186_v16 = vld [vmem:[%s3054_s30 + $0x188] sm:$0xff]  ;;  %v187_v21 = vld [vmem:[%s3054_s30 + $0x190] sm:$0xff] }
  0x7d   : > { %v519_v25 = vrot.slane %v518_v8, 2  ;;  %v525_v7 = vrot.slane %v524_v9, 2  ;;  %v531_v41 = vrot.slane %v530_v30, 2  ;;  %v548_v5 = vadd.f32 %v547_v31, %v184_v56  ;;  %v191_v31 = vld [vmem:[%s3054_s30 + $0x1b0] sm:$0xff] }
  0x7e   : > { %v537_v32 = vrot.slane %v536_v11, 2  ;;  %v508_v23 = vadd.f32 %v507_v4, %v506_v24  ;;  %v514_v27 = vadd.f32 %v513_v61, %v512_v38  ;;  %v543_v28 = vrot.slane %v542_v39, 2  ;;  %v188_v24 = vld [vmem:[%s3054_s30 + $0x198] sm:$0xff] }
  0x7f   : > { %v520_v26 = vadd.f32 %v519_v25, %v518_v8  ;;  %v526_v29 = vadd.f32 %v525_v7, %v524_v9  ;;  %v532_v33 = vadd.f32 %v531_v41, %v530_v30  ;;  %v549_v37 = vrot.slane %v548_v5, 2  ;;  %v189_v7 = vld [vmem:[%s3054_s30 + $0x1a0] sm:$0xff]  ;;  %v190_v8 = vld [vmem:[%s3054_s30 + $0x1a8] sm:$0xff] }
  0x80   : > { %v538_v34 = vadd.f32 %v537_v32, %v536_v11  ;;  %v509_v20 = vrot.slane %v508_v23, 1  ;;  %v515_v40 = vrot.slane %v514_v27, 1  ;;  %v544_v42 = vadd.f32 %v543_v28, %v542_v39 }
  0x81   : > { %v521_v15 = vrot.slane %v520_v26, 1  ;;  %v527_v56 = vrot.slane %v526_v29, 1  ;;  %v533_v38 = vrot.slane %v532_v33, 1  ;;  %v550_v4 = vadd.f32 %v549_v37, %v548_v5 }
  0x82   : > { %v539_v61 = vrot.slane %v538_v34, 1  ;;  %v3194_v41 = vadd.f32 %v509_v20, %v508_v23  ;;  %v3196_v9 = vadd.f32 %v515_v40, %v514_v27  ;;  %v545_v11 = vrot.slane %v544_v42, 1 }
  0x83   : > { %v3198_v30 = vadd.f32 %v521_v15, %v520_v26  ;;  %v3201_v25 = vadd.f32 %v527_v56, %v526_v29  ;;  %v3203_v39 = vadd.f32 %v533_v38, %v532_v33  ;;  %v551_v28 = vrot.slane %v550_v4, 1 }
  0x84   : > { %6643 = vst [vmem:[#allocation18_spill] sm:$0xff] %v3194_v41  ;;  %6644 = vst [vmem:[#allocation19_spill] sm:$0xff] %v3196_v9  ;;  %v3205_v32 = vadd.f32 %v539_v61, %v538_v34  ;;  %v3208_v5 = vadd.f32 %v545_v11, %v544_v42  ;;  %v553_v37 = vrot.slane %v185_v43, 4  ;;  %v559_v35 = vrot.slane %v186_v16, 4  ;;  %v200_v9 = vld [vmem:[%s3054_s30 + $0x1f8] sm:$0xff] }
  0x85   : > { %6645 = vst [vmem:[#allocation20_spill] sm:$0xff] %v3198_v30  ;;  %6646 = vst [vmem:[#allocation21_spill] sm:$0xff] %v3201_v25  ;;  %v565_v23 = vrot.slane %v187_v21, 4  ;;  %v3210_v20 = vadd.f32 %v551_v28, %v550_v4  ;;  %v571_v27 = vrot.slane %v188_v24, 4  ;;  %v577_v26 = vrot.slane %v189_v7, 4 }
  0x86   : > { %6647 = vst [vmem:[#allocation22_spill] sm:$0xff] %v3203_v39  ;;  %6648 = vst [vmem:[#allocation23_spill] sm:$0xff] %v3205_v32  ;;  %v583_v40 = vrot.slane %v190_v8, 4  ;;  %v554_v15 = vadd.f32 %v553_v37, %v185_v43  ;;  %v560_v30 = vadd.f32 %v559_v35, %v186_v16  ;;  %v589_v56 = vrot.slane %v191_v31, 4 }
  0x87   : > { %6649 = vst [vmem:[#allocation24_spill] sm:$0xff] %v3208_v5  ;;  %6650 = vst [vmem:[#allocation25_spill] sm:$0xff] %v3210_v20  ;;  %v566_v29 = vadd.f32 %v565_v23, %v187_v21  ;;  %v572_v33 = vadd.f32 %v571_v27, %v188_v24  ;;  %v578_v38 = vadd.f32 %v577_v26, %v189_v7  ;;  %v595_v61 = vrot.slane %v192_v36, 4  ;;  %v193_v26 = vld [vmem:[%s3054_s30 + $0x1c0] sm:$0xff] }
  0x88   : > { %v584_v34 = vadd.f32 %v583_v40, %v190_v8  ;;  %v555_v32 = vrot.slane %v554_v15, 2  ;;  %v561_v39 = vrot.slane %v560_v30, 2  ;;  %v590_v11 = vadd.f32 %v589_v56, %v191_v31  ;;  %v194_v40 = vld [vmem:[%s3054_s30 + $0x1c8] sm:$0xff]  ;;  %v195_v56 = vld [vmem:[%s3054_s30 + $0x1d0] sm:$0xff] }
  0x89   : > { %v567_v42 = vrot.slane %v566_v29, 2  ;;  %v573_v5 = vrot.slane %v572_v33, 2  ;;  %v579_v25 = vrot.slane %v578_v38, 2  ;;  %v596_v28 = vadd.f32 %v595_v61, %v192_v36  ;;  %v199_v61 = vld [vmem:[%s3054_s30 + $0x1f0] sm:$0xff] }
  0x8a   : > { %v585_v4 = vrot.slane %v584_v34, 2  ;;  %v556_v20 = vadd.f32 %v555_v32, %v554_v15  ;;  %v562_v43 = vadd.f32 %v561_v39, %v560_v30  ;;  %v591_v16 = vrot.slane %v590_v11, 2  ;;  %v196_v15 = vld [vmem:[%s3054_s30 + $0x1d8] sm:$0xff] }
  0x8b   : > { %v568_v35 = vadd.f32 %v567_v42, %v566_v29  ;;  %v574_v21 = vadd.f32 %v573_v5, %v572_v33  ;;  %v580_v24 = vadd.f32 %v579_v25, %v578_v38  ;;  %v597_v8 = vrot.slane %v596_v28, 2  ;;  %v197_v5 = vld [vmem:[%s3054_s30 + $0x1e0] sm:$0xff]  ;;  %v198_v29 = vld [vmem:[%s3054_s30 + $0x1e8] sm:$0xff] }
  0x8c   : > { %v586_v7 = vadd.f32 %v585_v4, %v584_v34  ;;  %v557_v37 = vrot.slane %v556_v20, 1  ;;  %v563_v31 = vrot.slane %v562_v43, 1  ;;  %v592_v27 = vadd.f32 %v591_v16, %v590_v11 }
  0x8d   : > { %v569_v23 = vrot.slane %v568_v35, 1  ;;  %v575_v36 = vrot.slane %v574_v21, 1  ;;  %v581_v30 = vrot.slane %v580_v24, 1  ;;  %v598_v32 = vadd.f32 %v597_v8, %v596_v28 }
  0x8e   : > { %v587_v39 = vrot.slane %v586_v7, 1  ;;  %v3218_v25 = vadd.f32 %v557_v37, %v556_v20  ;;  %v3220_v33 = vadd.f32 %v563_v31, %v562_v43  ;;  %v593_v34 = vrot.slane %v592_v27, 1 }
  0x8f   : > { %v3222_v38 = vadd.f32 %v569_v23, %v568_v35  ;;  %v3225_v42 = vadd.f32 %v575_v36, %v574_v21  ;;  %v3227_v11 = vadd.f32 %v581_v30, %v580_v24  ;;  %v599_v16 = vrot.slane %v598_v32, 1 }
  0x90   : > { %6651 = vst [vmem:[#allocation26_spill] sm:$0xff] %v3218_v25  ;;  %6652 = vst [vmem:[#allocation27_spill] sm:$0xff] %v3220_v33  ;;  %v3229_v4 = vadd.f32 %v587_v39, %v586_v7  ;;  %v3232_v28 = vadd.f32 %v593_v34, %v592_v27  ;;  %v601_v8 = vrot.slane %v193_v26, 4  ;;  %v607_v41 = vrot.slane %v194_v40, 4  ;;  %v208_v33 = vld [vmem:[%s3054_s30 + $0x238] sm:$0xff] }
  0x91   : > { %6653 = vst [vmem:[#allocation28_spill] sm:$0xff] %v3222_v38  ;;  %6654 = vst [vmem:[#allocation29_spill] sm:$0xff] %v3225_v42  ;;  %v613_v20 = vrot.slane %v195_v56, 4  ;;  %v3234_v37 = vadd.f32 %v599_v16, %v598_v32  ;;  %v619_v43 = vrot.slane %v196_v15, 4  ;;  %v625_v35 = vrot.slane %v197_v5, 4 }
  0x92   : > { %6655 = vst [vmem:[#allocation30_spill] sm:$0xff] %v3227_v11  ;;  %6656 = vst [vmem:[#allocation31_spill] sm:$0xff] %v3229_v4  ;;  %v631_v31 = vrot.slane %v198_v29, 4  ;;  %v602_v23 = vadd.f32 %v601_v8, %v193_v26  ;;  %v608_v38 = vadd.f32 %v607_v41, %v194_v40  ;;  %v637_v36 = vrot.slane %v199_v61, 4 }
  0x93   : > { %6657 = vst [vmem:[#allocation32_spill] sm:$0xff] %v3232_v28  ;;  %6658 = vst [vmem:[#allocation33_spill] sm:$0xff] %v3234_v37  ;;  %v614_v21 = vadd.f32 %v613_v20, %v195_v56  ;;  %v620_v24 = vadd.f32 %v619_v43, %v196_v15  ;;  %v626_v30 = vadd.f32 %v625_v35, %v197_v5  ;;  %v643_v39 = vrot.slane %v200_v9, 4  ;;  %v201_v35 = vld [vmem:[%s3054_s30 + $0x200] sm:$0xff] }
  0x94   : > { %v632_v7 = vadd.f32 %v631_v31, %v198_v29  ;;  %v603_v4 = vrot.slane %v602_v23, 2  ;;  %v609_v11 = vrot.slane %v608_v38, 2  ;;  %v638_v34 = vadd.f32 %v637_v36, %v199_v61  ;;  %v202_v31 = vld [vmem:[%s3054_s30 + $0x208] sm:$0xff]  ;;  %v203_v36 = vld [vmem:[%s3054_s30 + $0x210] sm:$0xff] }
  0x95   : > { %v615_v27 = vrot.slane %v614_v21, 2  ;;  %v621_v28 = vrot.slane %v620_v24, 2  ;;  %v627_v42 = vrot.slane %v626_v30, 2  ;;  %v644_v16 = vadd.f32 %v643_v39, %v200_v9  ;;  %v207_v39 = vld [vmem:[%s3054_s30 + $0x230] sm:$0xff] }
  0x96   : > { %v633_v32 = vrot.slane %v632_v7, 2  ;;  %v604_v37 = vadd.f32 %v603_v4, %v602_v23  ;;  %v610_v26 = vadd.f32 %v609_v11, %v608_v38  ;;  %v639_v40 = vrot.slane %v638_v34, 2  ;;  %v204_v23 = vld [vmem:[%s3054_s30 + $0x218] sm:$0xff] }
  0x97   : > { %v616_v41 = vadd.f32 %v615_v27, %v614_v21  ;;  %v622_v56 = vadd.f32 %v621_v28, %v620_v24  ;;  %v628_v15 = vadd.f32 %v627_v42, %v626_v30  ;;  %v645_v29 = vrot.slane %v644_v16, 2  ;;  %v205_v28 = vld [vmem:[%s3054_s30 + $0x220] sm:$0xff]  ;;  %v206_v21 = vld [vmem:[%s3054_s30 + $0x228] sm:$0xff] }
  0x98   : > { %v634_v5 = vadd.f32 %v633_v32, %v632_v7  ;;  %v605_v8 = vrot.slane %v604_v37, 1  ;;  %v611_v61 = vrot.slane %v610_v26, 1  ;;  %v640_v43 = vadd.f32 %v639_v40, %v638_v34 }
  0x99   : > { %v617_v20 = vrot.slane %v616_v41, 1  ;;  %v623_v9 = vrot.slane %v622_v56, 1  ;;  %v629_v38 = vrot.slane %v628_v15, 1  ;;  %v646_v4 = vadd.f32 %v645_v29, %v644_v16 }
  0x9a   : > { %v635_v11 = vrot.slane %v634_v5, 1  ;;  %v3242_v42 = vadd.f32 %v605_v8, %v604_v37  ;;  %v3244_v24 = vadd.f32 %v611_v61, %v610_v26  ;;  %v641_v7 = vrot.slane %v640_v43, 1 }
  0x9b   : > { %v3246_v30 = vadd.f32 %v617_v20, %v616_v41  ;;  %v3249_v27 = vadd.f32 %v623_v9, %v622_v56  ;;  %v3251_v34 = vadd.f32 %v629_v38, %v628_v15  ;;  %v647_v40 = vrot.slane %v646_v4, 1 }
  0x9c   : > { %6659 = vst [vmem:[#allocation34_spill] sm:$0xff] %v3242_v42  ;;  %6660 = vst [vmem:[#allocation35_spill] sm:$0xff] %v3244_v24  ;;  %v3253_v32 = vadd.f32 %v635_v11, %v634_v5  ;;  %v3256_v16 = vadd.f32 %v641_v7, %v640_v43  ;;  %v649_v29 = vrot.slane %v201_v35, 4  ;;  %v655_v25 = vrot.slane %v202_v31, 4  ;;  %v216_v24 = vld [vmem:[%s3054_s30 + $0x278] sm:$0xff] }
  0x9d   : > { %6661 = vst [vmem:[#allocation36_spill] sm:$0xff] %v3246_v30  ;;  %6662 = vst [vmem:[#allocation37_spill] sm:$0xff] %v3249_v27  ;;  %v661_v37 = vrot.slane %v203_v36, 4  ;;  %v3258_v8 = vadd.f32 %v647_v40, %v646_v4  ;;  %v667_v26 = vrot.slane %v204_v23, 4  ;;  %v673_v41 = vrot.slane %v205_v28, 4 }
  0x9e   : > { %6663 = vst [vmem:[#allocation38_spill] sm:$0xff] %v3251_v34  ;;  %6664 = vst [vmem:[#allocation39_spill] sm:$0xff] %v3253_v32  ;;  %v679_v61 = vrot.slane %v206_v21, 4  ;;  %v650_v20 = vadd.f32 %v649_v29, %v201_v35  ;;  %v656_v30 = vadd.f32 %v655_v25, %v202_v31  ;;  %v685_v9 = vrot.slane %v207_v39, 4 }
  0x9f   : > { %6665 = vst [vmem:[#allocation40_spill] sm:$0xff] %v3256_v16  ;;  %6666 = vst [vmem:[#allocation41_spill] sm:$0xff] %v3258_v8  ;;  %v662_v56 = vadd.f32 %v661_v37, %v203_v36  ;;  %v668_v15 = vadd.f32 %v667_v26, %v204_v23  ;;  %v674_v38 = vadd.f32 %v673_v41, %v205_v28  ;;  %v691_v11 = vrot.slane %v208_v33, 4  ;;  %v209_v41 = vld [vmem:[%s3054_s30 + $0x240] sm:$0xff] }
  0xa0   : > { %v680_v5 = vadd.f32 %v679_v61, %v206_v21  ;;  %v651_v32 = vrot.slane %v650_v20, 2  ;;  %v657_v34 = vrot.slane %v656_v30, 2  ;;  %v686_v7 = vadd.f32 %v685_v9, %v207_v39  ;;  %v210_v61 = vld [vmem:[%s3054_s30 + $0x248] sm:$0xff]  ;;  %v211_v9 = vld [vmem:[%s3054_s30 + $0x250] sm:$0xff] }
  0xa1   : > { %v663_v43 = vrot.slane %v662_v56, 2  ;;  %v669_v16 = vrot.slane %v668_v15, 2  ;;  %v675_v27 = vrot.slane %v674_v38, 2  ;;  %v692_v40 = vadd.f32 %v691_v11, %v208_v33  ;;  %v215_v11 = vld [vmem:[%s3054_s30 + $0x270] sm:$0xff] }
  0xa2   : > { %v681_v4 = vrot.slane %v680_v5, 2  ;;  %v652_v8 = vadd.f32 %v651_v32, %v650_v20  ;;  %v658_v35 = vadd.f32 %v657_v34, %v656_v30  ;;  %v687_v31 = vrot.slane %v686_v7, 2  ;;  %v212_v20 = vld [vmem:[%s3054_s30 + $0x258] sm:$0xff] }
  0xa3   : > { %v664_v25 = vadd.f32 %v663_v43, %v662_v56  ;;  %v670_v36 = vadd.f32 %v669_v16, %v668_v15  ;;  %v676_v23 = vadd.f32 %v675_v27, %v674_v38  ;;  %v693_v21 = vrot.slane %v692_v40, 2  ;;  %v213_v16 = vld [vmem:[%s3054_s30 + $0x260] sm:$0xff]  ;;  %v214_v56 = vld [vmem:[%s3054_s30 + $0x268] sm:$0xff] }
  0xa4   : > { %v682_v28 = vadd.f32 %v681_v4, %v680_v5  ;;  %v653_v29 = vrot.slane %v652_v8, 1  ;;  %v659_v39 = vrot.slane %v658_v35, 1  ;;  %v688_v26 = vadd.f32 %v687_v31, %v686_v7 }
  0xa5   : > { %v665_v37 = vrot.slane %v664_v25, 1  ;;  %v671_v33 = vrot.slane %v670_v36, 1  ;;  %v677_v30 = vrot.slane %v676_v23, 1  ;;  %v694_v32 = vadd.f32 %v693_v21, %v692_v40 }
  0xa6   : > { %v683_v34 = vrot.slane %v682_v28, 1  ;;  %v3266_v27 = vadd.f32 %v653_v29, %v652_v8  ;;  %v3268_v15 = vadd.f32 %v659_v39, %v658_v35  ;;  %v689_v5 = vrot.slane %v688_v26, 1 }
  0xa7   : > { %v3270_v38 = vadd.f32 %v665_v37, %v664_v25  ;;  %v3273_v43 = vadd.f32 %v671_v33, %v670_v36  ;;  %v3275_v7 = vadd.f32 %v677_v30, %v676_v23  ;;  %v695_v31 = vrot.slane %v694_v32, 1 }
  0xa8   : > { %6667 = vst [vmem:[#allocation42_spill] sm:$0xff] %v3266_v27  ;;  %6668 = vst [vmem:[#allocation43_spill] sm:$0xff] %v3268_v15  ;;  %v3277_v4 = vadd.f32 %v683_v34, %v682_v28  ;;  %v3280_v40 = vadd.f32 %v689_v5, %v688_v26  ;;  %v697_v21 = vrot.slane %v209_v41, 4  ;;  %v703_v42 = vrot.slane %v210_v61, 4  ;;  %v224_v15 = vld [vmem:[%s3054_s30 + $0x2b8] sm:$0xff] }
  0xa9   : > { %6669 = vst [vmem:[#allocation44_spill] sm:$0xff] %v3270_v38  ;;  %6670 = vst [vmem:[#allocation45_spill] sm:$0xff] %v3273_v43  ;;  %v709_v8 = vrot.slane %v211_v9, 4  ;;  %v3282_v29 = vadd.f32 %v695_v31, %v694_v32  ;;  %v715_v35 = vrot.slane %v212_v20, 4  ;;  %v721_v25 = vrot.slane %v213_v16, 4 }
  0xaa   : > { %6671 = vst [vmem:[#allocation46_spill] sm:$0xff] %v3275_v7  ;;  %6672 = vst [vmem:[#allocation47_spill] sm:$0xff] %v3277_v4  ;;  %v727_v39 = vrot.slane %v214_v56, 4  ;;  %v698_v37 = vadd.f32 %v697_v21, %v209_v41  ;;  %v704_v38 = vadd.f32 %v703_v42, %v210_v61  ;;  %v733_v33 = vrot.slane %v215_v11, 4 }
  0xab   : > { %6673 = vst [vmem:[#allocation48_spill] sm:$0xff] %v3280_v40  ;;  %6674 = vst [vmem:[#allocation49_spill] sm:$0xff] %v3282_v29  ;;  %v710_v36 = vadd.f32 %v709_v8, %v211_v9  ;;  %v716_v23 = vadd.f32 %v715_v35, %v212_v20  ;;  %v722_v30 = vadd.f32 %v721_v25, %v213_v16  ;;  %v739_v34 = vrot.slane %v216_v24, 4  ;;  %v217_v25 = vld [vmem:[%s3054_s30 + $0x280] sm:$0xff] }
  0xac   : > { %v728_v28 = vadd.f32 %v727_v39, %v214_v56  ;;  %v699_v4 = vrot.slane %v698_v37, 2  ;;  %v705_v7 = vrot.slane %v704_v38, 2  ;;  %v734_v5 = vadd.f32 %v733_v33, %v215_v11  ;;  %v218_v39 = vld [vmem:[%s3054_s30 + $0x288] sm:$0xff]  ;;  %v219_v33 = vld [vmem:[%s3054_s30 + $0x290] sm:$0xff] }
  0xad   : > { %v711_v26 = vrot.slane %v710_v36, 2  ;;  %v717_v40 = vrot.slane %v716_v23, 2  ;;  %v723_v43 = vrot.slane %v722_v30, 2  ;;  %v740_v31 = vadd.f32 %v739_v34, %v216_v24  ;;  %v223_v34 = vld [vmem:[%s3054_s30 + $0x2b0] sm:$0xff] }
  0xae   : > { %v729_v32 = vrot.slane %v728_v28, 2  ;;  %v700_v29 = vadd.f32 %v699_v4, %v698_v37  ;;  %v706_v41 = vadd.f32 %v705_v7, %v704_v38  ;;  %v735_v61 = vrot.slane %v734_v5, 2  ;;  %v220_v37 = vld [vmem:[%s3054_s30 + $0x298] sm:$0xff] }
  0xaf   : > { %v712_v42 = vadd.f32 %v711_v26, %v710_v36  ;;  %v718_v9 = vadd.f32 %v717_v40, %v716_v23  ;;  %v724_v20 = vadd.f32 %v723_v43, %v722_v30  ;;  %v741_v56 = vrot.slane %v740_v31, 2  ;;  %v221_v40 = vld [vmem:[%s3054_s30 + $0x2a0] sm:$0xff]  ;;  %v222_v36 = vld [vmem:[%s3054_s30 + $0x2a8] sm:$0xff] }
  0xb0   : > { %v730_v16 = vadd.f32 %v729_v32, %v728_v28  ;;  %v701_v21 = vrot.slane %v700_v29, 1  ;;  %v707_v11 = vrot.slane %v706_v41, 1  ;;  %v736_v35 = vadd.f32 %v735_v61, %v734_v5 }
  0xb1   : > { %v713_v8 = vrot.slane %v712_v42, 1  ;;  %v719_v24 = vrot.slane %v718_v9, 1  ;;  %v725_v38 = vrot.slane %v724_v20, 1  ;;  %v742_v4 = vadd.f32 %v741_v56, %v740_v31 }
  0xb2   : > { %v731_v7 = vrot.slane %v730_v16, 1  ;;  %v3290_v43 = vadd.f32 %v701_v21, %v700_v29  ;;  %v3292_v23 = vadd.f32 %v707_v11, %v706_v41  ;;  %v737_v28 = vrot.slane %v736_v35, 1 }
  0xb3   : > { %v3294_v30 = vadd.f32 %v713_v8, %v712_v42  ;;  %v3297_v26 = vadd.f32 %v719_v24, %v718_v9  ;;  %v3299_v5 = vadd.f32 %v725_v38, %v724_v20  ;;  %v743_v61 = vrot.slane %v742_v4, 1 }
  0xb4   : > { %6675 = vst [vmem:[#allocation50_spill] sm:$0xff] %v3290_v43  ;;  %6676 = vst [vmem:[#allocation51_spill] sm:$0xff] %v3292_v23  ;;  %v3301_v32 = vadd.f32 %v731_v7, %v730_v16  ;;  %v3304_v31 = vadd.f32 %v737_v28, %v736_v35  ;;  %v745_v56 = vrot.slane %v217_v25, 4  ;;  %v751_v27 = vrot.slane %v218_v39, 4 }
  0xb5   : > { %6677 = vst [vmem:[#allocation52_spill] sm:$0xff] %v3294_v30  ;;  %6678 = vst [vmem:[#allocation53_spill] sm:$0xff] %v3297_v26  ;;  %v757_v29 = vrot.slane %v219_v33, 4  ;;  %v3306_v21 = vadd.f32 %v743_v61, %v742_v4  ;;  %v763_v41 = vrot.slane %v220_v37, 4  ;;  %v769_v42 = vrot.slane %v221_v40, 4 }
  0xb6   : > { %6679 = vst [vmem:[#allocation54_spill] sm:$0xff] %v3299_v5  ;;  %6680 = vst [vmem:[#allocation55_spill] sm:$0xff] %v3301_v32  ;;  %v775_v11 = vrot.slane %v222_v36, 4  ;;  %v746_v8 = vadd.f32 %v745_v56, %v217_v25  ;;  %v752_v30 = vadd.f32 %v751_v27, %v218_v39  ;;  %v781_v24 = vrot.slane %v223_v34, 4 }
  0xb7   : > { %6681 = vst [vmem:[#allocation56_spill] sm:$0xff] %v3304_v31  ;;  %6682 = vst [vmem:[#allocation57_spill] sm:$0xff] %v3306_v21  ;;  %v758_v9 = vadd.f32 %v757_v29, %v219_v33  ;;  %v764_v20 = vadd.f32 %v763_v41, %v220_v37  ;;  %v770_v38 = vadd.f32 %v769_v42, %v221_v40  ;;  %v787_v7 = vrot.slane %v224_v15, 4  ;;  %v3309_v42 = vld [vmem:[%s3054_s30 + $0x2c0] sm:$0xff] }
  0xb8   : > { %v776_v16 = vadd.f32 %v775_v11, %v222_v36  ;;  %v747_v32 = vrot.slane %v746_v8, 2  ;;  %v753_v5 = vrot.slane %v752_v30, 2  ;;  %v782_v28 = vadd.f32 %v781_v24, %v223_v34  ;;  %6683 = vst [vmem:[#allocation58_spill] sm:$0xff] %v3309_v42  ;;  %v3312_v11 = vld [vmem:[%s3054_s30 + $0x2c8] sm:$0xff] }
  0xb9   : > { %v759_v35 = vrot.slane %v758_v9, 2  ;;  %v765_v31 = vrot.slane %v764_v20, 2  ;;  %v771_v26 = vrot.slane %v770_v38, 2  ;;  %v788_v61 = vadd.f32 %v787_v7, %v224_v15  ;;  %6684 = vst [vmem:[#allocation59_spill] sm:$0xff] %v3312_v11  ;;  %v3315_v15 = vld [vmem:[%s3054_s30 + $0x2d0] sm:$0xff] }
  0xba   : > { %v777_v4 = vrot.slane %v776_v16, 2  ;;  %v748_v21 = vadd.f32 %v747_v32, %v746_v8  ;;  %v754_v25 = vadd.f32 %v753_v5, %v752_v30  ;;  %v783_v39 = vrot.slane %v782_v28, 2  ;;  %6685 = vst [vmem:[#allocation60_spill] sm:$0xff] %v3315_v15  ;;  %v3321_v8 = vld [vmem:[%s3054_s30 + $0x2e0] sm:$0xff]  ;;  %v3333_v7 = vld [vmem:[%s3054_s30 + $0x2f0] sm:$0xff] }
  0xbb   : > { %v760_v27 = vadd.f32 %v759_v35, %v758_v9  ;;  %v766_v33 = vadd.f32 %v765_v31, %v764_v20  ;;  %v772_v37 = vadd.f32 %v771_v26, %v770_v38  ;;  %v789_v36 = vrot.slane %v788_v61, 2  ;;  %v3318_v26 = vld [vmem:[%s3054_s30 + $0x2d8] sm:$0xff]  ;;  %6687 = vst [vmem:[#allocation62_spill] sm:$0xff] %v3321_v8  ;;  %v3324_v9 = vld [vmem:[%s3054_s30 + $0x2e8] sm:$0xff]  ;;  %6692 = vst [vmem:[#allocation67_spill] sm:$0xff] %v3333_v7 }
  0xbc   : > { %v778_v40 = vadd.f32 %v777_v4, %v776_v16  ;;  %v749_v56 = vrot.slane %v748_v21, 1  ;;  %v755_v34 = vrot.slane %v754_v25, 1  ;;  %v784_v41 = vadd.f32 %v783_v39, %v782_v28  ;;  %6686 = vst [vmem:[#allocation61_spill] sm:$0xff] %v3318_v26  ;;  %6688 = vst [vmem:[#allocation63_spill] sm:$0xff] %v3324_v9  ;;  %v3342_v39 = vld [vmem:[%s3054_s30 + $0x2f8] sm:$0xff] }
  0xbd   : > { %v761_v29 = vrot.slane %v760_v27, 1  ;;  %v767_v30 = vrot.slane %v766_v33, 1  ;;  %v773_v5 = vrot.slane %v772_v37, 1  ;;  %v790_v31 = vadd.f32 %v789_v36, %v788_v61  ;;  %6696 = vst [vmem:[#allocation71_spill] sm:$0xff] %v3342_v39 }
  0xbe   : > { %v779_v32 = vrot.slane %v778_v40, 1  ;;  %v3326_v24 = vadd.f32 %v749_v56, %v748_v21  ;;  %v3328_v20 = vadd.f32 %v755_v34, %v754_v25  ;;  %v785_v16 = vrot.slane %v784_v41, 1 }
  0xbf   : > { %v3330_v38 = vadd.f32 %v761_v29, %v760_v27  ;;  %v3335_v35 = vadd.f32 %v767_v30, %v766_v33  ;;  %v3337_v28 = vadd.f32 %v773_v5, %v772_v37  ;;  %v791_v61 = vrot.slane %v790_v31, 1 }
  0xc0   : > { %6689 = vst [vmem:[#allocation64_spill] sm:$0xff] %v3326_v24  ;;  %6690 = vst [vmem:[#allocation65_spill] sm:$0xff] %v3328_v20  ;;  %v3339_v4 = vadd.f32 %v779_v32, %v778_v40  ;;  %v3344_v36 = vadd.f32 %v785_v16, %v784_v41  ;;  %v793_v21 = vrot.slane %v3309_v42, 4  ;;  %v799_v25 = vrot.slane %v3312_v11, 4  ;;  %v3368_v20 = vld [vmem:[%s3054_s30 + $0x308] sm:$0xff] }
  0xc1   : > { %6691 = vst [vmem:[#allocation66_spill] sm:$0xff] %v3330_v38  ;;  %6693 = vst [vmem:[#allocation68_spill] sm:$0xff] %v3335_v35  ;;  %v805_v27 = vrot.slane %v3315_v15, 4  ;;  %v3349_v56 = vadd.f32 %v791_v61, %v790_v31  ;;  %v811_v33 = vrot.slane %v3318_v26, 4  ;;  %v817_v37 = vrot.slane %v3321_v8, 4  ;;  %v3365_v38 = vld [vmem:[%s3054_s30 + $0x300] sm:$0xff] }
  0xc2   : > { %6694 = vst [vmem:[#allocation69_spill] sm:$0xff] %v3337_v28  ;;  %6695 = vst [vmem:[#allocation70_spill] sm:$0xff] %v3339_v4  ;;  %v823_v40 = vrot.slane %v3324_v9, 4  ;;  %v794_v34 = vadd.f32 %v793_v21, %v3309_v42  ;;  %v800_v29 = vadd.f32 %v799_v25, %v3312_v11  ;;  %v829_v30 = vrot.slane %v3333_v7, 4 }
  0xc3   : > { %6697 = vst [vmem:[#allocation72_spill] sm:$0xff] %v3344_v36  ;;  %6698 = vst [vmem:[#allocation73_spill] sm:$0xff] %v3349_v56  ;;  %v806_v41 = vadd.f32 %v805_v27, %v3315_v15  ;;  %v812_v5 = vadd.f32 %v811_v33, %v3318_v26  ;;  %v818_v32 = vadd.f32 %v817_v37, %v3321_v8  ;;  %v835_v16 = vrot.slane %v3342_v39, 4 }
  0xc4   : > { %v824_v31 = vadd.f32 %v823_v40, %v3324_v9  ;;  %v795_v61 = vrot.slane %v794_v34, 2  ;;  %v801_v56 = vrot.slane %v800_v29, 2  ;;  %v830_v4 = vadd.f32 %v829_v30, %v3333_v7  ;;  %6699 = vst [vmem:[#allocation74_spill] sm:$0xff] %v3365_v38  ;;  %6700 = vst [vmem:[#allocation75_spill] sm:$0xff] %v3368_v20 }
  0xc5   : > { %v807_v36 = vrot.slane %v806_v41, 2  ;;  %v813_v21 = vrot.slane %v812_v5, 2  ;;  %v819_v25 = vrot.slane %v818_v32, 2  ;;  %v836_v15 = vadd.f32 %v835_v16, %v3342_v39  ;;  %v3398_v39 = vld [vmem:[%s3054_s30 + $0x338] sm:$0xff] }
  0xc6   : > { %v825_v27 = vrot.slane %v824_v31, 2  ;;  %v796_v33 = vadd.f32 %v795_v61, %v794_v34  ;;  %v802_v26 = vadd.f32 %v801_v56, %v800_v29  ;;  %v831_v8 = vrot.slane %v830_v4, 2  ;;  %v3371_v34 = vld [vmem:[%s3054_s30 + $0x310] sm:$0xff]  ;;  %6712 = vst [vmem:[#allocation87_spill] sm:$0xff] %v3398_v39 }
  0xc7   : > { %v808_v37 = vadd.f32 %v807_v36, %v806_v41  ;;  %v814_v40 = vadd.f32 %v813_v21, %v812_v5  ;;  %v820_v9 = vadd.f32 %v819_v25, %v818_v32  ;;  %v837_v42 = vrot.slane %v836_v15, 2  ;;  %6701 = vst [vmem:[#allocation76_spill] sm:$0xff] %v3371_v34  ;;  %v3374_v5 = vld [vmem:[%s3054_s30 + $0x318] sm:$0xff]  ;;  %v3377_v32 = vld [vmem:[%s3054_s30 + $0x320] sm:$0xff]  ;;  %v3389_v21 = vld [vmem:[%s3054_s30 + $0x330] sm:$0xff] }
  0xc8   : > { %v826_v11 = vadd.f32 %v825_v27, %v824_v31  ;;  %v797_v30 = vrot.slane %v796_v33, 1  ;;  %v803_v7 = vrot.slane %v802_v26, 1  ;;  %v832_v35 = vadd.f32 %v831_v8, %v830_v4  ;;  %6702 = vst [vmem:[#allocation77_spill] sm:$0xff] %v3374_v5  ;;  %6703 = vst [vmem:[#allocation78_spill] sm:$0xff] %v3377_v32  ;;  %v3380_v31 = vld [vmem:[%s3054_s30 + $0x328] sm:$0xff] }
  0xc9   : > { %v809_v28 = vrot.slane %v808_v37, 1  ;;  %v815_v36 = vrot.slane %v814_v40, 1  ;;  %v821_v56 = vrot.slane %v820_v9, 1  ;;  %v838_v41 = vadd.f32 %v837_v42, %v836_v15  ;;  %6704 = vst [vmem:[#allocation79_spill] sm:$0xff] %v3380_v31  ;;  %6708 = vst [vmem:[#allocation83_spill] sm:$0xff] %v3389_v21 }
  0xca   : > { %v827_v29 = vrot.slane %v826_v11, 1  ;;  %v3382_v16 = vadd.f32 %v797_v30, %v796_v33  ;;  %v3384_v8 = vadd.f32 %v803_v7, %v802_v26  ;;  %v833_v61 = vrot.slane %v832_v35, 1 }
  0xcb   : > { %v3386_v4 = vadd.f32 %v809_v28, %v808_v37  ;;  %v3391_v25 = vadd.f32 %v815_v36, %v814_v40  ;;  %v3393_v27 = vadd.f32 %v821_v56, %v820_v9  ;;  %v839_v15 = vrot.slane %v838_v41, 1 }
  0xcc   : > { %6705 = vst [vmem:[#allocation80_spill] sm:$0xff] %v3382_v16  ;;  %6706 = vst [vmem:[#allocation81_spill] sm:$0xff] %v3384_v8  ;;  %v3395_v42 = vadd.f32 %v827_v29, %v826_v11  ;;  %v3400_v24 = vadd.f32 %v833_v61, %v832_v35  ;;  %v841_v33 = vrot.slane %v3365_v38, 4  ;;  %v847_v26 = vrot.slane %v3368_v20, 4  ;;  %v3424_v8 = vld [vmem:[%s3054_s30 + $0x348] sm:$0xff] }
  0xcd   : > { %6707 = vst [vmem:[#allocation82_spill] sm:$0xff] %v3386_v4  ;;  %6709 = vst [vmem:[#allocation84_spill] sm:$0xff] %v3391_v25  ;;  %v853_v7 = vrot.slane %v3371_v34, 4  ;;  %v3405_v28 = vadd.f32 %v839_v15, %v838_v41  ;;  %v859_v37 = vrot.slane %v3374_v5, 4  ;;  %v865_v9 = vrot.slane %v3377_v32, 4  ;;  %v3421_v4 = vld [vmem:[%s3054_s30 + $0x340] sm:$0xff] }
  0xce   : > { %6710 = vst [vmem:[#allocation85_spill] sm:$0xff] %v3393_v27  ;;  %6711 = vst [vmem:[#allocation86_spill] sm:$0xff] %v3395_v42  ;;  %v871_v11 = vrot.slane %v3380_v31, 4  ;;  %v842_v40 = vadd.f32 %v841_v33, %v3365_v38  ;;  %v848_v30 = vadd.f32 %v847_v26, %v3368_v20  ;;  %v877_v36 = vrot.slane %v3389_v21, 4 }
  0xcf   : > { %6713 = vst [vmem:[#allocation88_spill] sm:$0xff] %v3400_v24  ;;  %6714 = vst [vmem:[#allocation89_spill] sm:$0xff] %v3405_v28  ;;  %v854_v35 = vadd.f32 %v853_v7, %v3371_v34  ;;  %v860_v56 = vadd.f32 %v859_v37, %v3374_v5  ;;  %v866_v29 = vadd.f32 %v865_v9, %v3377_v32  ;;  %v883_v61 = vrot.slane %v3398_v39, 4 }
  0xd0   : > { %v872_v41 = vadd.f32 %v871_v11, %v3380_v31  ;;  %v843_v15 = vrot.slane %v842_v40, 2  ;;  %v849_v28 = vrot.slane %v848_v30, 2  ;;  %v878_v42 = vadd.f32 %v877_v36, %v3389_v21  ;;  %6715 = vst [vmem:[#allocation90_spill] sm:$0xff] %v3421_v4  ;;  %6716 = vst [vmem:[#allocation91_spill] sm:$0xff] %v3424_v8 }
  0xd1   : > { %v855_v24 = vrot.slane %v854_v35, 2  ;;  %v861_v33 = vrot.slane %v860_v56, 2  ;;  %v867_v26 = vrot.slane %v866_v29, 2  ;;  %v884_v34 = vadd.f32 %v883_v61, %v3398_v39  ;;  %v3454_v39 = vld [vmem:[%s3054_s30 + $0x378] sm:$0xff] }
  0xd2   : > { %v873_v7 = vrot.slane %v872_v41, 2  ;;  %v844_v37 = vadd.f32 %v843_v15, %v842_v40  ;;  %v850_v5 = vadd.f32 %v849_v28, %v848_v30  ;;  %v879_v32 = vrot.slane %v878_v42, 2  ;;  %v3427_v40 = vld [vmem:[%s3054_s30 + $0x350] sm:$0xff]  ;;  %6728 = vst [vmem:[#allocation103_spill] sm:$0xff] %v3454_v39 }
  0xd3   : > { %v856_v9 = vadd.f32 %v855_v24, %v854_v35  ;;  %v862_v11 = vadd.f32 %v861_v33, %v860_v56  ;;  %v868_v31 = vadd.f32 %v867_v26, %v866_v29  ;;  %v885_v38 = vrot.slane %v884_v34, 2  ;;  %6717 = vst [vmem:[#allocation92_spill] sm:$0xff] %v3427_v40  ;;  %v3430_v56 = vld [vmem:[%s3054_s30 + $0x358] sm:$0xff]  ;;  %v3433_v29 = vld [vmem:[%s3054_s30 + $0x360] sm:$0xff]  ;;  %v3445_v33 = vld [vmem:[%s3054_s30 + $0x370] sm:$0xff] }
  0xd4   : > { %v874_v20 = vadd.f32 %v873_v7, %v872_v41  ;;  %v845_v36 = vrot.slane %v844_v37, 1  ;;  %v851_v21 = vrot.slane %v850_v5, 1  ;;  %v880_v25 = vadd.f32 %v879_v32, %v878_v42  ;;  %6718 = vst [vmem:[#allocation93_spill] sm:$0xff] %v3430_v56  ;;  %6719 = vst [vmem:[#allocation94_spill] sm:$0xff] %v3433_v29  ;;  %v3436_v41 = vld [vmem:[%s3054_s30 + $0x368] sm:$0xff] }
  0xd5   : > { %v857_v27 = vrot.slane %v856_v9, 1  ;;  %v863_v24 = vrot.slane %v862_v11, 1  ;;  %v869_v28 = vrot.slane %v868_v31, 1  ;;  %v886_v35 = vadd.f32 %v885_v38, %v884_v34  ;;  %6720 = vst [vmem:[#allocation95_spill] sm:$0xff] %v3436_v41  ;;  %6724 = vst [vmem:[#allocation99_spill] sm:$0xff] %v3445_v33 }
  0xd6   : > { %v875_v30 = vrot.slane %v874_v20, 1  ;;  %v3438_v61 = vadd.f32 %v845_v36, %v844_v37  ;;  %v3440_v32 = vadd.f32 %v851_v21, %v850_v5  ;;  %v881_v15 = vrot.slane %v880_v25, 1 }
  0xd7   : > { %v3442_v42 = vadd.f32 %v857_v27, %v856_v9  ;;  %v3447_v26 = vadd.f32 %v863_v24, %v862_v11  ;;  %v3449_v7 = vadd.f32 %v869_v28, %v868_v31  ;;  %v887_v34 = vrot.slane %v886_v35, 1 }
  0xd8   : > { %6721 = vst [vmem:[#allocation96_spill] sm:$0xff] %v3438_v61  ;;  %6722 = vst [vmem:[#allocation97_spill] sm:$0xff] %v3440_v32  ;;  %v3451_v38 = vadd.f32 %v875_v30, %v874_v20  ;;  %v3456_v16 = vadd.f32 %v881_v15, %v880_v25  ;;  %v889_v37 = vrot.slane %v3421_v4, 4  ;;  %v895_v5 = vrot.slane %v3424_v8, 4  ;;  %v3480_v32 = vld [vmem:[%s3054_s30 + $0x388] sm:$0xff] }
  0xd9   : > { %6723 = vst [vmem:[#allocation98_spill] sm:$0xff] %v3442_v42  ;;  %6725 = vst [vmem:[#allocation100_spill] sm:$0xff] %v3447_v26  ;;  %v901_v21 = vrot.slane %v3427_v40, 4  ;;  %v3461_v27 = vadd.f32 %v887_v34, %v886_v35  ;;  %v907_v9 = vrot.slane %v3430_v56, 4  ;;  %v913_v31 = vrot.slane %v3433_v29, 4  ;;  %v3477_v42 = vld [vmem:[%s3054_s30 + $0x380] sm:$0xff] }
  0xda   : > { %6726 = vst [vmem:[#allocation101_spill] sm:$0xff] %v3449_v7  ;;  %6727 = vst [vmem:[#allocation102_spill] sm:$0xff] %v3451_v38  ;;  %v919_v20 = vrot.slane %v3436_v41, 4  ;;  %v890_v11 = vadd.f32 %v889_v37, %v3421_v4  ;;  %v896_v36 = vadd.f32 %v895_v5, %v3424_v8  ;;  %v925_v24 = vrot.slane %v3445_v33, 4 }
  0xdb   : > { %6729 = vst [vmem:[#allocation104_spill] sm:$0xff] %v3456_v16  ;;  %6730 = vst [vmem:[#allocation105_spill] sm:$0xff] %v3461_v27  ;;  %v902_v25 = vadd.f32 %v901_v21, %v3427_v40  ;;  %v908_v28 = vadd.f32 %v907_v9, %v3430_v56  ;;  %v914_v30 = vadd.f32 %v913_v31, %v3433_v29  ;;  %v931_v15 = vrot.slane %v3454_v39, 4 }
  0xdc   : > { %v920_v35 = vadd.f32 %v919_v20, %v3436_v41  ;;  %v891_v34 = vrot.slane %v890_v11, 2  ;;  %v897_v27 = vrot.slane %v896_v36, 2  ;;  %v926_v38 = vadd.f32 %v925_v24, %v3445_v33  ;;  %6731 = vst [vmem:[#allocation106_spill] sm:$0xff] %v3477_v42  ;;  %6732 = vst [vmem:[#allocation107_spill] sm:$0xff] %v3480_v32 }
  0xdd   : > { %v903_v16 = vrot.slane %v902_v25, 2  ;;  %v909_v37 = vrot.slane %v908_v28, 2  ;;  %v915_v5 = vrot.slane %v914_v30, 2  ;;  %v932_v40 = vadd.f32 %v931_v15, %v3454_v39  ;;  %v3510_v39 = vld [vmem:[%s3054_s30 + $0x3b8] sm:$0xff] }
  0xde   : > { %v921_v21 = vrot.slane %v920_v35, 2  ;;  %v892_v9 = vadd.f32 %v891_v34, %v890_v11  ;;  %v898_v56 = vadd.f32 %v897_v27, %v896_v36  ;;  %v927_v29 = vrot.slane %v926_v38, 2  ;;  %v3483_v11 = vld [vmem:[%s3054_s30 + $0x390] sm:$0xff]  ;;  %6744 = vst [vmem:[#allocation119_spill] sm:$0xff] %v3510_v39 }
  0xdf   : > { %v904_v31 = vadd.f32 %v903_v16, %v902_v25  ;;  %v910_v20 = vadd.f32 %v909_v37, %v908_v28  ;;  %v916_v41 = vadd.f32 %v915_v5, %v914_v30  ;;  %v933_v4 = vrot.slane %v932_v40, 2  ;;  %6733 = vst [vmem:[#allocation108_spill] sm:$0xff] %v3483_v11  ;;  %v3486_v28 = vld [vmem:[%s3054_s30 + $0x398] sm:$0xff]  ;;  %v3489_v30 = vld [vmem:[%s3054_s30 + $0x3a0] sm:$0xff]  ;;  %v3501_v37 = vld [vmem:[%s3054_s30 + $0x3b0] sm:$0xff] }
  0xe0   : > { %v922_v8 = vadd.f32 %v921_v21, %v920_v35  ;;  %v893_v24 = vrot.slane %v892_v9, 1  ;;  %v899_v33 = vrot.slane %v898_v56, 1  ;;  %v928_v26 = vadd.f32 %v927_v29, %v926_v38  ;;  %6734 = vst [vmem:[#allocation109_spill] sm:$0xff] %v3486_v28  ;;  %6735 = vst [vmem:[#allocation110_spill] sm:$0xff] %v3489_v30  ;;  %v3492_v35 = vld [vmem:[%s3054_s30 + $0x3a8] sm:$0xff] }
  0xe1   : > { %v905_v7 = vrot.slane %v904_v31, 1  ;;  %v911_v16 = vrot.slane %v910_v20, 1  ;;  %v917_v27 = vrot.slane %v916_v41, 1  ;;  %v934_v25 = vadd.f32 %v933_v4, %v932_v40  ;;  %6736 = vst [vmem:[#allocation111_spill] sm:$0xff] %v3492_v35  ;;  %6740 = vst [vmem:[#allocation115_spill] sm:$0xff] %v3501_v37 }
  0xe2   : > { %v923_v36 = vrot.slane %v922_v8, 1  ;;  %v3494_v15 = vadd.f32 %v893_v24, %v892_v9  ;;  %v3496_v29 = vadd.f32 %v899_v33, %v898_v56  ;;  %v929_v34 = vrot.slane %v928_v26, 1 }
  0xe3   : > { %v3498_v38 = vadd.f32 %v905_v7, %v904_v31  ;;  %v3503_v5 = vadd.f32 %v911_v16, %v910_v20  ;;  %v3505_v21 = vadd.f32 %v917_v27, %v916_v41  ;;  %v935_v40 = vrot.slane %v934_v25, 1 }
  0xe4   : > { %6737 = vst [vmem:[#allocation112_spill] sm:$0xff] %v3494_v15  ;;  %6738 = vst [vmem:[#allocation113_spill] sm:$0xff] %v3496_v29  ;;  %v3507_v4 = vadd.f32 %v923_v36, %v922_v8  ;;  %v3512_v61 = vadd.f32 %v929_v34, %v928_v26  ;;  %v937_v9 = vrot.slane %v3477_v42, 4  ;;  %v943_v56 = vrot.slane %v3480_v32, 4  ;;  %v3536_v29 = vld [vmem:[%s3054_s30 + $0x3c8] sm:$0xff] }
  0xe5   : > { %6739 = vst [vmem:[#allocation114_spill] sm:$0xff] %v3498_v38  ;;  %6741 = vst [vmem:[#allocation116_spill] sm:$0xff] %v3503_v5  ;;  %v949_v33 = vrot.slane %v3483_v11, 4  ;;  %v3517_v7 = vadd.f32 %v935_v40, %v934_v25  ;;  %v955_v31 = vrot.slane %v3486_v28, 4  ;;  %v961_v41 = vrot.slane %v3489_v30, 4  ;;  %v3533_v38 = vld [vmem:[%s3054_s30 + $0x3c0] sm:$0xff] }
  0xe6   : > { %6742 = vst [vmem:[#allocation117_spill] sm:$0xff] %v3505_v21  ;;  %6743 = vst [vmem:[#allocation118_spill] sm:$0xff] %v3507_v4  ;;  %v967_v8 = vrot.slane %v3492_v35, 4  ;;  %v938_v20 = vadd.f32 %v937_v9, %v3477_v42  ;;  %v944_v24 = vadd.f32 %v943_v56, %v3480_v32  ;;  %v973_v16 = vrot.slane %v3501_v37, 4 }
  0xe7   : > { %6745 = vst [vmem:[#allocation120_spill] sm:$0xff] %v3512_v61  ;;  %6746 = vst [vmem:[#allocation121_spill] sm:$0xff] %v3517_v7  ;;  %v950_v26 = vadd.f32 %v949_v33, %v3483_v11  ;;  %v956_v27 = vadd.f32 %v955_v31, %v3486_v28  ;;  %v962_v36 = vadd.f32 %v961_v41, %v3489_v30  ;;  %v979_v34 = vrot.slane %v3510_v39, 4 }
  0xe8   : > { %v968_v25 = vadd.f32 %v967_v8, %v3492_v35  ;;  %v939_v40 = vrot.slane %v938_v20, 2  ;;  %v945_v7 = vrot.slane %v944_v24, 2  ;;  %v974_v4 = vadd.f32 %v973_v16, %v3501_v37  ;;  %6747 = vst [vmem:[#allocation122_spill] sm:$0xff] %v3533_v38  ;;  %6748 = vst [vmem:[#allocation123_spill] sm:$0xff] %v3536_v29 }
  0xe9   : > { %v951_v61 = vrot.slane %v950_v26, 2  ;;  %v957_v9 = vrot.slane %v956_v27, 2  ;;  %v963_v56 = vrot.slane %v962_v36, 2  ;;  %v980_v11 = vadd.f32 %v979_v34, %v3510_v39  ;;  %v3566_v39 = vld [vmem:[%s3054_s30 + $0x3f8] sm:$0xff] }
  0xea   : > { %v969_v33 = vrot.slane %v968_v25, 2  ;;  %v940_v31 = vadd.f32 %v939_v40, %v938_v20  ;;  %v946_v28 = vadd.f32 %v945_v7, %v944_v24  ;;  %v975_v30 = vrot.slane %v974_v4, 2  ;;  %v3539_v20 = vld [vmem:[%s3054_s30 + $0x3d0] sm:$0xff] }
  0xeb   : > { %v952_v41 = vadd.f32 %v951_v61, %v950_v26  ;;  %v958_v8 = vadd.f32 %v957_v9, %v956_v27  ;;  %v964_v35 = vadd.f32 %v963_v56, %v962_v36  ;;  %v981_v42 = vrot.slane %v980_v11, 2  ;;  %6749 = vst [vmem:[#allocation124_spill] sm:$0xff] %v3539_v20  ;;  %v3542_v27 = vld [vmem:[%s3054_s30 + $0x3d8] sm:$0xff]  ;;  %v3545_v36 = vld [vmem:[%s3054_s30 + $0x3e0] sm:$0xff]  ;;  %v3557_v9 = vld [vmem:[%s3054_s30 + $0x3f0] sm:$0xff] }
  0xec   : > { %v970_v32 = vadd.f32 %v969_v33, %v968_v25  ;;  %v941_v16 = vrot.slane %v940_v31, 1  ;;  %v947_v37 = vrot.slane %v946_v28, 1  ;;  %v976_v5 = vadd.f32 %v975_v30, %v974_v4  ;;  %6750 = vst [vmem:[#allocation125_spill] sm:$0xff] %v3542_v27  ;;  %6751 = vst [vmem:[#allocation126_spill] sm:$0xff] %v3545_v36  ;;  %v3548_v25 = vld [vmem:[%s3054_s30 + $0x3e8] sm:$0xff] }
  0xed   : > { %v953_v21 = vrot.slane %v952_v41, 1  ;;  %v959_v61 = vrot.slane %v958_v8, 1  ;;  %v965_v7 = vrot.slane %v964_v35, 1  ;;  %v982_v26 = vadd.f32 %v981_v42, %v980_v11  ;;  %6752 = vst [vmem:[#allocation127_spill] sm:$0xff] %v3548_v25  ;;  %6756 = vst [vmem:[#allocation131_spill] sm:$0xff] %v3557_v9 }
  0xee   : > { %v971_v24 = vrot.slane %v970_v32, 1  ;;  %v3550_v34 = vadd.f32 %v941_v16, %v940_v31  ;;  %v3552_v30 = vadd.f32 %v947_v37, %v946_v28  ;;  %v977_v40 = vrot.slane %v976_v5, 1 }
  0xef   : > { %v3554_v4 = vadd.f32 %v953_v21, %v952_v41  ;;  %v3559_v56 = vadd.f32 %v959_v61, %v958_v8  ;;  %v3561_v33 = vadd.f32 %v965_v7, %v964_v35  ;;  %v983_v11 = vrot.slane %v982_v26, 1 }
  0xf0   : > { %6753 = vst [vmem:[#allocation128_spill] sm:$0xff] %v3550_v34  ;;  %6754 = vst [vmem:[#allocation129_spill] sm:$0xff] %v3552_v30  ;;  %v3563_v42 = vadd.f32 %v971_v24, %v970_v32  ;;  %v3568_v15 = vadd.f32 %v977_v40, %v976_v5  ;;  %v985_v31 = vrot.slane %v3533_v38, 4  ;;  %v991_v28 = vrot.slane %v3536_v29, 4 }
  0xf1   : > { %6755 = vst [vmem:[#allocation130_spill] sm:$0xff] %v3554_v4  ;;  %6757 = vst [vmem:[#allocation132_spill] sm:$0xff] %v3559_v56  ;;  %v997_v37 = vrot.slane %v3539_v20, 4  ;;  %v3573_v21 = vadd.f32 %v983_v11, %v982_v26  ;;  %v1003_v41 = vrot.slane %v3542_v27, 4  ;;  %v1009_v35 = vrot.slane %v3545_v36, 4 }
  0xf2   : > { %6758 = vst [vmem:[#allocation133_spill] sm:$0xff] %v3561_v33  ;;  %6759 = vst [vmem:[#allocation134_spill] sm:$0xff] %v3563_v42  ;;  %v1015_v32 = vrot.slane %v3548_v25, 4  ;;  %v986_v8 = vadd.f32 %v985_v31, %v3533_v38  ;;  %v992_v16 = vadd.f32 %v991_v28, %v3536_v29  ;;  %v1021_v61 = vrot.slane %v3557_v9, 4 }
  0xf3   : > { %6760 = vst [vmem:[#allocation135_spill] sm:$0xff] %v3568_v15  ;;  %6761 = vst [vmem:[#allocation136_spill] sm:$0xff] %v3573_v21  ;;  %v998_v5 = vadd.f32 %v997_v37, %v3539_v20  ;;  %v1004_v7 = vadd.f32 %v1003_v41, %v3542_v27  ;;  %v1010_v24 = vadd.f32 %v1009_v35, %v3545_v36  ;;  %v1027_v40 = vrot.slane %v3566_v39, 4 }
  0xf4   : > { %v1016_v26 = vadd.f32 %v1015_v32, %v3548_v25  ;;  %v987_v11 = vrot.slane %v986_v8, 2  ;;  %v993_v21 = vrot.slane %v992_v16, 2  ;;  %v1022_v42 = vadd.f32 %v1021_v61, %v3557_v9 }
  0xf5   : > { %v999_v15 = vrot.slane %v998_v5, 2  ;;  %v1005_v31 = vrot.slane %v1004_v7, 2  ;;  %v1011_v38 = vrot.slane %v1010_v24, 2  ;;  %v1028_v37 = vadd.f32 %v1027_v40, %v3566_v39  ;;  %v6806_v40 = vld [vmem:[#allocation15_spill] sm:$0xff] }
  0xf6   : > { %v1017_v28 = vrot.slane %v1016_v26, 2  ;;  %v988_v20 = vadd.f32 %v987_v11, %v986_v8  ;;  %v994_v29 = vadd.f32 %v993_v21, %v992_v16  ;;  %v1023_v41 = vrot.slane %v1022_v42, 2 }
  0xf7   : > { %v1000_v33 = vadd.f32 %v999_v15, %v998_v5  ;;  %v1006_v27 = vadd.f32 %v1005_v31, %v1004_v7  ;;  %v1012_v35 = vadd.f32 %v1011_v38, %v1010_v24  ;;  %v1029_v32 = vrot.slane %v1028_v37, 2  ;;  %v6804_v24 = vld [vmem:[#allocation14_spill] sm:$0xff]  ;;  %v6808_v31 = vld [vmem:[#allocation16_spill] sm:$0xff] }
  0xf8   : > { %v1018_v36 = vadd.f32 %v1017_v28, %v1016_v26  ;;  %v989_v25 = vrot.slane %v988_v20, 1  ;;  %v995_v56 = vrot.slane %v994_v29, 1  ;;  %v1024_v30 = vadd.f32 %v1023_v41, %v1022_v42 }
  0xf9   : > { %v1001_v4 = vrot.slane %v1000_v33, 1  ;;  %v1007_v34 = vrot.slane %v1006_v27, 1  ;;  %v1013_v23 = vrot.slane %v1012_v35, 1  ;;  %v1030_v9 = vadd.f32 %v1029_v32, %v1028_v37  ;;  %v6810_v37 = vld [vmem:[#allocation17_spill] sm:$0xff] }
  0xfa   : > { %v1019_v61 = vrot.slane %v1018_v36, 1  ;;  %v3588_v43 = vadd.f32 %v989_v25, %v988_v20  ;;  %v3590_v22 = vadd.f32 %v995_v56, %v994_v29  ;;  %v1025_v15 = vrot.slane %v1024_v30, 1  ;;  %v6792_v25 = vld [vmem:[#allocation8_spill] sm:$0xff]  ;;  %v6802_v56 = vld [vmem:[#allocation13_spill] sm:$0xff] }
  0xfb   : > { %v3592_v8 = vadd.f32 %v1001_v4, %v1000_v33  ;;  %v3594_v21 = vadd.f32 %v1007_v34, %v1006_v27  ;;  %v3596_v38 = vadd.f32 %v1013_v23, %v1012_v35  ;;  %v1031_v5 = vrot.slane %v1030_v9, 1  ;;  %v6794_v34 = vld [vmem:[#allocation9_spill] sm:$0xff]  ;;  %v6798_v4 = vld [vmem:[#allocation11_spill] sm:$0xff]  ;;  %v6812_v35 = vld [vmem:[#allocation18_spill] sm:$0xff] }
  0xfc   : > { %v3598_v16 = vadd.f32 %v1019_v61, %v1018_v36  ;;  %v3600_v7 = vadd.f32 %v1025_v15, %v1024_v30  ;;  %v3604_v42 = vmul.f32 %v3074_v52, %v3074_v52  ;;  %v3608_v29 = vmul.f32 %v3076_v53, %v3076_v53  ;;  %v6796_v30 = vld [vmem:[#allocation10_spill] sm:$0xff]  ;;  %v6814_v61 = vld [vmem:[#allocation19_spill] sm:$0xff] }
  0xfd   : > { %v3612_v20 = vmul.f32 %v3078_v54, %v3078_v54  ;;  %v3614_v27 = vadd.f32 %v1031_v5, %v1030_v9  ;;  %v3618_v23 = vmul.f32 %v3081_v57, %v3081_v57  ;;  %v3622_v36 = vmul.f32 %v3083_v58, %v3083_v58  ;;  %v6800_v9 = vld [vmem:[#allocation12_spill] sm:$0xff] }
  0xfe   : > { %6762 = vst [vmem:[#allocation137_spill] sm:$0xff] %v3604_v42  ;;  %6763 = vst [vmem:[#allocation138_spill] sm:$0xff] %v3608_v29  ;;  %v3626_v52 = vmul.f32 %v3085_v59, %v3085_v59  ;;  %v3630_v53 = vmul.f32 %v3088_v62, %v3088_v62  ;;  %v3634_v54 = vmul.f32 %v3090_v2, %v3090_v2  ;;  %v6816_v5 = vld [vmem:[#allocation20_spill] sm:$0xff]  ;;  %v2802_v42 = vld [vmem:[%s3054_s30 + $0x1c8] sm:$0xff]  ;;  %vm2449_vm4 = vcmask 1045509  }
  0xff   : > { %6764 = vst [vmem:[#allocation139_spill] sm:$0xff] %v3612_v20  ;;  %6765 = vst [vmem:[#allocation140_spill] sm:$0xff] %v3618_v23  ;;  %v3638_v57 = vmul.f32 %v3098_v44, %v3098_v44  ;;  %v3642_v58 = vmul.f32 %v3100_v45, %v3100_v45  ;;  %v3646_v59 = vmul.f32 %v3102_v46, %v3102_v46  ;;  %v2799_v23 = vld [vmem:[%s3054_s30 + $0x1b0] sm:$0xff]  ;;  %v2800_v20 = vld [vmem:[%s3054_s30 + $0x1b8] sm:$0xff]  ;;  %vm2451_vm5 = vcmask 1046534  }
 0x100   : > { %6766 = vst [vmem:[#allocation141_spill] sm:$0xff] %v3622_v36  ;;  %6767 = vst [vmem:[#allocation142_spill] sm:$0xff] %v3626_v52  ;;  %v3650_v62 = vmul.f32 %v3105_v49, %v3105_v49  ;;  %v3654_v2 = vmul.f32 %v3107_v50, %v3107_v50  ;;  %v3658_v44 = vmul.f32 %v3109_v51, %v3109_v51  ;;  %v2797_v52 = vld [vmem:[%s3054_s30 + $0x1a0] sm:$0xff]  ;;  %v2798_v36 = vld [vmem:[%s3054_s30 + $0x1a8] sm:$0xff]  ;;  %vm2453_vm6 = vcmask 1047559  }
 0x101   : > { %6768 = vst [vmem:[#allocation143_spill] sm:$0xff] %v3630_v53  ;;  %6769 = vst [vmem:[#allocation144_spill] sm:$0xff] %v3634_v54  ;;  %v3662_v45 = vmul.f32 %v3112_v60, %v3112_v60  ;;  %v3666_v46 = vmul.f32 %v3114_v1, %v3114_v1  ;;  %v3670_v49 = vmul.f32 %v3122_v47, %v3122_v47  ;;  %v2795_v54 = vld [vmem:[%s3054_s30 + $0x190] sm:$0xff]  ;;  %v2796_v53 = vld [vmem:[%s3054_s30 + $0x198] sm:$0xff] }
 0x102   : > { %6770 = vst [vmem:[#allocation145_spill] sm:$0xff] %v3638_v57  ;;  %6771 = vst [vmem:[#allocation146_spill] sm:$0xff] %v3642_v58  ;;  %v3674_v50 = vmul.f32 %v3124_v48, %v3124_v48  ;;  %v3678_v51 = vmul.f32 %v3126_v55, %v3126_v55  ;;  %v3682_v60 = vmul.f32 %v3129_v63, %v3129_v63  ;;  %v2793_v58 = vld [vmem:[%s3054_s30 + $0x180] sm:$0xff]  ;;  %v2794_v57 = vld [vmem:[%s3054_s30 + $0x188] sm:$0xff] }
 0x103   : > { %6772 = vst [vmem:[#allocation147_spill] sm:$0xff] %v3646_v59  ;;  %6773 = vst [vmem:[#allocation148_spill] sm:$0xff] %v3650_v62  ;;  %v3686_v1 = vmul.f32 %v3131_v0, %v3131_v0  ;;  %v3690_v47 = vmul.f32 %v3133_v3, %v3133_v3  ;;  %v3694_v48 = vmul.f32 %v3136_v6, %v3136_v6  ;;  %v2791_v62 = vld [vmem:[%s3054_s30 + $0x170] sm:$0xff]  ;;  %v2792_v59 = vld [vmem:[%s3054_s30 + $0x178] sm:$0xff] }
 0x104   : > { %6774 = vst [vmem:[#allocation149_spill] sm:$0xff] %v3654_v2  ;;  %6775 = vst [vmem:[#allocation150_spill] sm:$0xff] %v3658_v44  ;;  %v3698_v55 = vmul.f32 %v3138_v10, %v3138_v10  ;;  %v3702_v63 = vmul.f32 %v3146_v12, %v3146_v12  ;;  %v3706_v0 = vmul.f32 %v3148_v13, %v3148_v13  ;;  %v2789_v44 = vld [vmem:[%s3054_s30 + $0x160] sm:$0xff]  ;;  %v2790_v2 = vld [vmem:[%s3054_s30 + $0x168] sm:$0xff] }
 0x105   : > { %6776 = vst [vmem:[#allocation151_spill] sm:$0xff] %v3662_v45  ;;  %6777 = vst [vmem:[#allocation152_spill] sm:$0xff] %v3666_v46  ;;  %v3710_v3 = vmul.f32 %v3150_v14, %v3150_v14  ;;  %v3714_v6 = vmul.f32 %v3153_v17, %v3153_v17  ;;  %v3718_v10 = vmul.f32 %v3155_v18, %v3155_v18  ;;  %v2787_v46 = vld [vmem:[%s3054_s30 + $0x150] sm:$0xff]  ;;  %v2788_v45 = vld [vmem:[%s3054_s30 + $0x158] sm:$0xff] }
 0x106   : > { %6778 = vst [vmem:[#allocation153_spill] sm:$0xff] %v3670_v49  ;;  %6779 = vst [vmem:[#allocation154_spill] sm:$0xff] %v3674_v50  ;;  %v3722_v12 = vmul.f32 %v3157_v19, %v3157_v19  ;;  %v3726_v13 = vmul.f32 %v6792_v25, %v6792_v25  ;;  %v3730_v14 = vmul.f32 %v6794_v34, %v6794_v34  ;;  %v6818_v34 = vld [vmem:[#allocation21_spill] sm:$0xff]  ;;  %v2785_v50 = vld [vmem:[%s3054_s30 + $0x140] sm:$0xff] }
 0x107   : > { %6780 = vst [vmem:[#allocation155_spill] sm:$0xff] %v3678_v51  ;;  %6781 = vst [vmem:[#allocation156_spill] sm:$0xff] %v3682_v60  ;;  %v3734_v17 = vmul.f32 %v6796_v30, %v6796_v30  ;;  %v3738_v18 = vmul.f32 %v6798_v4, %v6798_v4  ;;  %v3742_v19 = vmul.f32 %v6800_v9, %v6800_v9  ;;  %v6820_v4 = vld [vmem:[#allocation22_spill] sm:$0xff]  ;;  %v2784_v51 = vld [vmem:[%s3054_s30 + $0x138] sm:$0xff] }
 0x108   : > { %6782 = vst [vmem:[#allocation157_spill] sm:$0xff] %v3686_v1  ;;  %6783 = vst [vmem:[#allocation158_spill] sm:$0xff] %v3690_v47  ;;  %v3746_v33 = vmul.f32 %v6802_v56, %v6802_v56  ;;  %v3750_v26 = vmul.f32 %v6804_v24, %v6804_v24  ;;  %v3754_v11 = vmul.f32 %v6806_v40, %v6806_v40  ;;  %v6822_v56 = vld [vmem:[#allocation23_spill] sm:$0xff]  ;;  %v6824_v40 = vld [vmem:[#allocation24_spill] sm:$0xff] }
 0x109   : > { %6784 = vst [vmem:[#allocation159_spill] sm:$0xff] %v3694_v48  ;;  %6785 = vst [vmem:[#allocation160_spill] sm:$0xff] %v3698_v55  ;;  %v3758_v28 = vmul.f32 %v6808_v31, %v6808_v31  ;;  %v3762_v41 = vmul.f32 %v6810_v37, %v6810_v37  ;;  %v3766_v32 = vmul.f32 %v6812_v35, %v6812_v35  ;;  %v6826_v37 = vld [vmem:[#allocation25_spill] sm:$0xff]  ;;  %v2779_v55 = vld [vmem:[%s3054_s30 + $0x110] sm:$0xff] }
 0x10a   : > { %6786 = vst [vmem:[#allocation161_spill] sm:$0xff] %v3702_v63  ;;  %6787 = vst [vmem:[#allocation162_spill] sm:$0xff] %v3706_v0  ;;  %v3770_v15 = vmul.f32 %v6814_v61, %v6814_v61  ;;  %v3774_v25 = vmul.f32 %v6816_v5, %v6816_v5  ;;  %v3778_v30 = vmul.f32 %v6818_v34, %v6818_v34  ;;  %v6828_v61 = vld [vmem:[#allocation26_spill] sm:$0xff]  ;;  %v6830_v34 = vld [vmem:[#allocation27_spill] sm:$0xff] }
 0x10b   : > { %6788 = vst [vmem:[#allocation163_spill] sm:$0xff] %v3710_v3  ;;  %6789 = vst [vmem:[#allocation164_spill] sm:$0xff] %v3714_v6  ;;  %v3782_v9 = vmul.f32 %v6820_v4, %v6820_v4  ;;  %v3786_v24 = vmul.f32 %v6822_v56, %v6822_v56  ;;  %v3790_v31 = vmul.f32 %v6824_v40, %v6824_v40  ;;  %v2775_v6 = vld [vmem:[%s3054_s30 + $0xf0] sm:$0xff]  ;;  %v2776_v3 = vld [vmem:[%s3054_s30 + $0xf8] sm:$0xff] }
 0x10c   : > { %6790 = vst [vmem:[#allocation165_spill] sm:$0xff] %v3718_v10  ;;  %6791 = vst [vmem:[#allocation166_spill] sm:$0xff] %v3722_v12  ;;  %v3794_v35 = vmul.f32 %v6826_v37, %v6826_v37  ;;  %v3798_v5 = vmul.f32 %v6828_v61, %v6828_v61  ;;  %v3802_v4 = vmul.f32 %v6830_v34, %v6830_v34  ;;  %v2773_v12 = vld [vmem:[%s3054_s30 + $0xe0] sm:$0xff]  ;;  %v2774_v10 = vld [vmem:[%s3054_s30 + $0xe8] sm:$0xff] }
 0x10d   : > { %6793 = vst [vmem:[#allocation8_spill] sm:$0xff] %v3726_v13  ;;  %6795 = vst [vmem:[#allocation9_spill] sm:$0xff] %v3730_v14  ;;  %v2771_v14 = vld [vmem:[%s3054_s30 + $0xd0] sm:$0xff]  ;;  %v2772_v13 = vld [vmem:[%s3054_s30 + $0xd8] sm:$0xff] }
 0x10e   : > { %6797 = vst [vmem:[#allocation10_spill] sm:$0xff] %v3734_v17  ;;  %6799 = vst [vmem:[#allocation11_spill] sm:$0xff] %v3738_v18  ;;  %v2769_v18 = vld [vmem:[%s3054_s30 + $0xc0] sm:$0xff]  ;;  %v2770_v17 = vld [vmem:[%s3054_s30 + $0xc8] sm:$0xff] }
 0x10f   : > { %6801 = vst [vmem:[#allocation12_spill] sm:$0xff] %v3742_v19  ;;  %6803 = vst [vmem:[#allocation13_spill] sm:$0xff] %v3746_v33  ;;  %v2767_v33 = vld [vmem:[%s3054_s30 + $0xb0] sm:$0xff]  ;;  %v2768_v19 = vld [vmem:[%s3054_s30 + $0xb8] sm:$0xff] }
 0x110   : > { %6805 = vst [vmem:[#allocation14_spill] sm:$0xff] %v3750_v26  ;;  %6807 = vst [vmem:[#allocation15_spill] sm:$0xff] %v3754_v11  ;;  %v2765_v11 = vld [vmem:[%s3054_s30 + $0xa0] sm:$0xff]  ;;  %v2766_v26 = vld [vmem:[%s3054_s30 + $0xa8] sm:$0xff] }
 0x111   : > { %6809 = vst [vmem:[#allocation16_spill] sm:$0xff] %v3758_v28  ;;  %6811 = vst [vmem:[#allocation17_spill] sm:$0xff] %v3762_v41  ;;  %v2763_v41 = vld [vmem:[%s3054_s30 + $0x90] sm:$0xff]  ;;  %v2764_v28 = vld [vmem:[%s3054_s30 + $0x98] sm:$0xff] }
 0x112   : > { %6813 = vst [vmem:[#allocation18_spill] sm:$0xff] %v3766_v32  ;;  %6815 = vst [vmem:[#allocation19_spill] sm:$0xff] %v3770_v15  ;;  %v2761_v15 = vld [vmem:[%s3054_s30 + $0x80] sm:$0xff]  ;;  %v2762_v32 = vld [vmem:[%s3054_s30 + $0x88] sm:$0xff] }
 0x113   : > { %6817 = vst [vmem:[#allocation20_spill] sm:$0xff] %v3774_v25  ;;  %6819 = vst [vmem:[#allocation21_spill] sm:$0xff] %v3778_v30  ;;  %v2759_v30 = vld [vmem:[%s3054_s30 + $0x70] sm:$0xff]  ;;  %v2760_v25 = vld [vmem:[%s3054_s30 + $0x78] sm:$0xff] }
 0x114   : > { %6821 = vst [vmem:[#allocation22_spill] sm:$0xff] %v3782_v9  ;;  %6823 = vst [vmem:[#allocation23_spill] sm:$0xff] %v3786_v24  ;;  %v6832_v9 = vld [vmem:[#allocation28_spill] sm:$0xff]  ;;  %v6834_v24 = vld [vmem:[#allocation29_spill] sm:$0xff] }
 0x115   : > { %6825 = vst [vmem:[#allocation24_spill] sm:$0xff] %v3790_v31  ;;  %6827 = vst [vmem:[#allocation25_spill] sm:$0xff] %v3794_v35  ;;  %v3806_v56 = vmul.f32 %v6832_v9, %v6832_v9  ;;  %v3810_v40 = vmul.f32 %v6834_v24, %v6834_v24  ;;  %v6836_v31 = vld [vmem:[#allocation30_spill] sm:$0xff]  ;;  %v6838_v35 = vld [vmem:[#allocation31_spill] sm:$0xff] }
 0x116   : > { %6829 = vst [vmem:[#allocation26_spill] sm:$0xff] %v3798_v5  ;;  %6831 = vst [vmem:[#allocation27_spill] sm:$0xff] %v3802_v4  ;;  %v3814_v37 = vmul.f32 %v6836_v31, %v6836_v31  ;;  %v3818_v61 = vmul.f32 %v6838_v35, %v6838_v35  ;;  %v6840_v5 = vld [vmem:[#allocation32_spill] sm:$0xff]  ;;  %v6842_v4 = vld [vmem:[#allocation33_spill] sm:$0xff] }
 0x117   : > { %6833 = vst [vmem:[#allocation28_spill] sm:$0xff] %v3806_v56  ;;  %6835 = vst [vmem:[#allocation29_spill] sm:$0xff] %v3810_v40  ;;  %v3822_v34 = vmul.f32 %v6840_v5, %v6840_v5  ;;  %v3826_v9 = vmul.f32 %v6842_v4, %v6842_v4  ;;  %v6844_v56 = vld [vmem:[#allocation34_spill] sm:$0xff]  ;;  %v6846_v40 = vld [vmem:[#allocation35_spill] sm:$0xff] }
 0x118   : > { %6837 = vst [vmem:[#allocation30_spill] sm:$0xff] %v3814_v37  ;;  %6839 = vst [vmem:[#allocation31_spill] sm:$0xff] %v3818_v61  ;;  %v3830_v24 = vmul.f32 %v6844_v56, %v6844_v56  ;;  %v3834_v31 = vmul.f32 %v6846_v40, %v6846_v40  ;;  %v6848_v37 = vld [vmem:[#allocation36_spill] sm:$0xff]  ;;  %v6850_v61 = vld [vmem:[#allocation37_spill] sm:$0xff] }
 0x119   : > { %6841 = vst [vmem:[#allocation32_spill] sm:$0xff] %v3822_v34  ;;  %6843 = vst [vmem:[#allocation33_spill] sm:$0xff] %v3826_v9  ;;  %v3838_v35 = vmul.f32 %v6848_v37, %v6848_v37  ;;  %v3842_v5 = vmul.f32 %v6850_v61, %v6850_v61  ;;  %v6852_v34 = vld [vmem:[#allocation38_spill] sm:$0xff]  ;;  %v6854_v9 = vld [vmem:[#allocation39_spill] sm:$0xff] }
 0x11a   : > { %6845 = vst [vmem:[#allocation34_spill] sm:$0xff] %v3830_v24  ;;  %6847 = vst [vmem:[#allocation35_spill] sm:$0xff] %v3834_v31  ;;  %v3846_v4 = vmul.f32 %v6852_v34, %v6852_v34  ;;  %v3850_v56 = vmul.f32 %v6854_v9, %v6854_v9  ;;  %v6856_v24 = vld [vmem:[#allocation40_spill] sm:$0xff]  ;;  %v6858_v31 = vld [vmem:[#allocation41_spill] sm:$0xff] }
 0x11b   : > { %6849 = vst [vmem:[#allocation36_spill] sm:$0xff] %v3838_v35  ;;  %6851 = vst [vmem:[#allocation37_spill] sm:$0xff] %v3842_v5  ;;  %v3854_v40 = vmul.f32 %v6856_v24, %v6856_v24  ;;  %v3858_v37 = vmul.f32 %v6858_v31, %v6858_v31  ;;  %v6860_v35 = vld [vmem:[#allocation42_spill] sm:$0xff]  ;;  %v6862_v5 = vld [vmem:[#allocation43_spill] sm:$0xff] }
 0x11c   : > { %6853 = vst [vmem:[#allocation38_spill] sm:$0xff] %v3846_v4  ;;  %6855 = vst [vmem:[#allocation39_spill] sm:$0xff] %v3850_v56  ;;  %v3862_v61 = vmul.f32 %v6860_v35, %v6860_v35  ;;  %v3866_v34 = vmul.f32 %v6862_v5, %v6862_v5  ;;  %v6864_v4 = vld [vmem:[#allocation44_spill] sm:$0xff]  ;;  %v6866_v56 = vld [vmem:[#allocation45_spill] sm:$0xff] }
 0x11d   : > { %6857 = vst [vmem:[#allocation40_spill] sm:$0xff] %v3854_v40  ;;  %6859 = vst [vmem:[#allocation41_spill] sm:$0xff] %v3858_v37  ;;  %v3870_v9 = vmul.f32 %v6864_v4, %v6864_v4  ;;  %v3874_v24 = vmul.f32 %v6866_v56, %v6866_v56  ;;  %v6868_v40 = vld [vmem:[#allocation46_spill] sm:$0xff]  ;;  %v6870_v37 = vld [vmem:[#allocation47_spill] sm:$0xff] }
 0x11e   : > { %6861 = vst [vmem:[#allocation42_spill] sm:$0xff] %v3862_v61  ;;  %6863 = vst [vmem:[#allocation43_spill] sm:$0xff] %v3866_v34  ;;  %v3878_v31 = vmul.f32 %v6868_v40, %v6868_v40  ;;  %v3882_v35 = vmul.f32 %v6870_v37, %v6870_v37  ;;  %v6872_v61 = vld [vmem:[#allocation48_spill] sm:$0xff]  ;;  %v6874_v34 = vld [vmem:[#allocation49_spill] sm:$0xff] }
 0x11f   : > { %6865 = vst [vmem:[#allocation44_spill] sm:$0xff] %v3870_v9  ;;  %6867 = vst [vmem:[#allocation45_spill] sm:$0xff] %v3874_v24  ;;  %v3886_v5 = vmul.f32 %v6872_v61, %v6872_v61  ;;  %v3890_v4 = vmul.f32 %v6874_v34, %v6874_v34  ;;  %v6876_v9 = vld [vmem:[#allocation50_spill] sm:$0xff]  ;;  %v6878_v24 = vld [vmem:[#allocation51_spill] sm:$0xff] }
 0x120   : > { %6869 = vst [vmem:[#allocation46_spill] sm:$0xff] %v3878_v31  ;;  %6871 = vst [vmem:[#allocation47_spill] sm:$0xff] %v3882_v35  ;;  %v3894_v56 = vmul.f32 %v6876_v9, %v6876_v9  ;;  %v3898_v40 = vmul.f32 %v6878_v24, %v6878_v24  ;;  %v6880_v31 = vld [vmem:[#allocation52_spill] sm:$0xff]  ;;  %v6882_v35 = vld [vmem:[#allocation53_spill] sm:$0xff] }
 0x121   : > { %6873 = vst [vmem:[#allocation48_spill] sm:$0xff] %v3886_v5  ;;  %6875 = vst [vmem:[#allocation49_spill] sm:$0xff] %v3890_v4  ;;  %v3902_v37 = vmul.f32 %v6880_v31, %v6880_v31  ;;  %v3906_v61 = vmul.f32 %v6882_v35, %v6882_v35  ;;  %v6884_v5 = vld [vmem:[#allocation54_spill] sm:$0xff]  ;;  %v6886_v4 = vld [vmem:[#allocation55_spill] sm:$0xff] }
 0x122   : > { %6877 = vst [vmem:[#allocation50_spill] sm:$0xff] %v3894_v56  ;;  %6879 = vst [vmem:[#allocation51_spill] sm:$0xff] %v3898_v40  ;;  %v3910_v34 = vmul.f32 %v6884_v5, %v6884_v5  ;;  %v3914_v9 = vmul.f32 %v6886_v4, %v6886_v4  ;;  %v6888_v56 = vld [vmem:[#allocation56_spill] sm:$0xff]  ;;  %v6890_v40 = vld [vmem:[#allocation57_spill] sm:$0xff] }
 0x123   : > { %6881 = vst [vmem:[#allocation52_spill] sm:$0xff] %v3902_v37  ;;  %6883 = vst [vmem:[#allocation53_spill] sm:$0xff] %v3906_v61  ;;  %v3918_v24 = vmul.f32 %v6888_v56, %v6888_v56  ;;  %v3922_v31 = vmul.f32 %v6890_v40, %v6890_v40  ;;  %v6892_v37 = vld [vmem:[#allocation64_spill] sm:$0xff]  ;;  %v6894_v61 = vld [vmem:[#allocation65_spill] sm:$0xff] }
 0x124   : > { %6885 = vst [vmem:[#allocation54_spill] sm:$0xff] %v3910_v34  ;;  %6887 = vst [vmem:[#allocation55_spill] sm:$0xff] %v3914_v9  ;;  %v3926_v35 = vmul.f32 %v6892_v37, %v6892_v37  ;;  %v3930_v5 = vmul.f32 %v6894_v61, %v6894_v61  ;;  %v6896_v34 = vld [vmem:[#allocation66_spill] sm:$0xff]  ;;  %v6898_v9 = vld [vmem:[#allocation68_spill] sm:$0xff] }
 0x125   : > { %6889 = vst [vmem:[#allocation56_spill] sm:$0xff] %v3918_v24  ;;  %6891 = vst [vmem:[#allocation57_spill] sm:$0xff] %v3922_v31  ;;  %v3934_v4 = vmul.f32 %v6896_v34, %v6896_v34  ;;  %v3938_v56 = vmul.f32 %v6898_v9, %v6898_v9  ;;  %v6900_v24 = vld [vmem:[#allocation69_spill] sm:$0xff]  ;;  %v6902_v31 = vld [vmem:[#allocation70_spill] sm:$0xff] }
 0x126   : > { %6893 = vst [vmem:[#allocation64_spill] sm:$0xff] %v3926_v35  ;;  %6895 = vst [vmem:[#allocation65_spill] sm:$0xff] %v3930_v5  ;;  %v3942_v40 = vmul.f32 %v6900_v24, %v6900_v24  ;;  %v3946_v37 = vmul.f32 %v6902_v31, %v6902_v31  ;;  %v6904_v35 = vld [vmem:[#allocation72_spill] sm:$0xff]  ;;  %v6906_v5 = vld [vmem:[#allocation73_spill] sm:$0xff] }
 0x127   : > { %6897 = vst [vmem:[#allocation66_spill] sm:$0xff] %v3934_v4  ;;  %6899 = vst [vmem:[#allocation68_spill] sm:$0xff] %v3938_v56  ;;  %v3950_v61 = vmul.f32 %v6904_v35, %v6904_v35  ;;  %v3954_v34 = vmul.f32 %v6906_v5, %v6906_v5  ;;  %v6908_v4 = vld [vmem:[#allocation80_spill] sm:$0xff]  ;;  %v6910_v56 = vld [vmem:[#allocation81_spill] sm:$0xff] }
 0x128   : > { %6901 = vst [vmem:[#allocation69_spill] sm:$0xff] %v3942_v40  ;;  %6903 = vst [vmem:[#allocation70_spill] sm:$0xff] %v3946_v37  ;;  %v3958_v9 = vmul.f32 %v6908_v4, %v6908_v4  ;;  %v3962_v24 = vmul.f32 %v6910_v56, %v6910_v56  ;;  %v6912_v40 = vld [vmem:[#allocation82_spill] sm:$0xff]  ;;  %v6914_v37 = vld [vmem:[#allocation84_spill] sm:$0xff] }
 0x129   : > { %6905 = vst [vmem:[#allocation72_spill] sm:$0xff] %v3950_v61  ;;  %6907 = vst [vmem:[#allocation73_spill] sm:$0xff] %v3954_v34  ;;  %v3966_v31 = vmul.f32 %v6912_v40, %v6912_v40  ;;  %v3970_v35 = vmul.f32 %v6914_v37, %v6914_v37  ;;  %v6916_v61 = vld [vmem:[#allocation85_spill] sm:$0xff]  ;;  %v6918_v34 = vld [vmem:[#allocation86_spill] sm:$0xff] }
 0x12a   : > { %6909 = vst [vmem:[#allocation80_spill] sm:$0xff] %v3958_v9  ;;  %6911 = vst [vmem:[#allocation81_spill] sm:$0xff] %v3962_v24  ;;  %v3974_v5 = vmul.f32 %v6916_v61, %v6916_v61  ;;  %v3978_v4 = vmul.f32 %v6918_v34, %v6918_v34  ;;  %v6920_v9 = vld [vmem:[#allocation88_spill] sm:$0xff]  ;;  %v6922_v24 = vld [vmem:[#allocation89_spill] sm:$0xff] }
 0x12b   : > { %6913 = vst [vmem:[#allocation82_spill] sm:$0xff] %v3966_v31  ;;  %6915 = vst [vmem:[#allocation84_spill] sm:$0xff] %v3970_v35  ;;  %v3982_v56 = vmul.f32 %v6920_v9, %v6920_v9  ;;  %v3986_v40 = vmul.f32 %v6922_v24, %v6922_v24  ;;  %v6924_v31 = vld [vmem:[#allocation96_spill] sm:$0xff]  ;;  %v6926_v35 = vld [vmem:[#allocation97_spill] sm:$0xff] }
 0x12c   : > { %6917 = vst [vmem:[#allocation85_spill] sm:$0xff] %v3974_v5  ;;  %6919 = vst [vmem:[#allocation86_spill] sm:$0xff] %v3978_v4  ;;  %v3990_v37 = vmul.f32 %v6924_v31, %v6924_v31  ;;  %v3994_v61 = vmul.f32 %v6926_v35, %v6926_v35  ;;  %v6928_v5 = vld [vmem:[#allocation98_spill] sm:$0xff]  ;;  %v6930_v4 = vld [vmem:[#allocation100_spill] sm:$0xff] }
 0x12d   : > { %6921 = vst [vmem:[#allocation88_spill] sm:$0xff] %v3982_v56  ;;  %6923 = vst [vmem:[#allocation89_spill] sm:$0xff] %v3986_v40  ;;  %v3998_v34 = vmul.f32 %v6928_v5, %v6928_v5  ;;  %v4002_v9 = vmul.f32 %v6930_v4, %v6930_v4  ;;  %v6932_v56 = vld [vmem:[#allocation101_spill] sm:$0xff]  ;;  %v6934_v40 = vld [vmem:[#allocation102_spill] sm:$0xff] }
 0x12e   : > { %6925 = vst [vmem:[#allocation96_spill] sm:$0xff] %v3990_v37  ;;  %6927 = vst [vmem:[#allocation97_spill] sm:$0xff] %v3994_v61  ;;  %v4006_v24 = vmul.f32 %v6932_v56, %v6932_v56  ;;  %v4010_v31 = vmul.f32 %v6934_v40, %v6934_v40  ;;  %v6936_v37 = vld [vmem:[#allocation104_spill] sm:$0xff]  ;;  %v6938_v61 = vld [vmem:[#allocation105_spill] sm:$0xff] }
 0x12f   : > { %6929 = vst [vmem:[#allocation98_spill] sm:$0xff] %v3998_v34  ;;  %6931 = vst [vmem:[#allocation100_spill] sm:$0xff] %v4002_v9  ;;  %v4014_v35 = vmul.f32 %v6936_v37, %v6936_v37  ;;  %v4018_v5 = vmul.f32 %v6938_v61, %v6938_v61  ;;  %v6940_v34 = vld [vmem:[#allocation112_spill] sm:$0xff]  ;;  %v6942_v9 = vld [vmem:[#allocation113_spill] sm:$0xff] }
 0x130   : > { %6933 = vst [vmem:[#allocation101_spill] sm:$0xff] %v4006_v24  ;;  %6935 = vst [vmem:[#allocation102_spill] sm:$0xff] %v4010_v31  ;;  %v4022_v4 = vmul.f32 %v6940_v34, %v6940_v34  ;;  %v4026_v56 = vmul.f32 %v6942_v9, %v6942_v9  ;;  %v6944_v24 = vld [vmem:[#allocation114_spill] sm:$0xff]  ;;  %v6946_v31 = vld [vmem:[#allocation116_spill] sm:$0xff] }
 0x131   : > { %6937 = vst [vmem:[#allocation104_spill] sm:$0xff] %v4014_v35  ;;  %6939 = vst [vmem:[#allocation105_spill] sm:$0xff] %v4018_v5  ;;  %v4030_v40 = vmul.f32 %v6944_v24, %v6944_v24  ;;  %v4034_v37 = vmul.f32 %v6946_v31, %v6946_v31  ;;  %v6948_v35 = vld [vmem:[#allocation117_spill] sm:$0xff]  ;;  %v6950_v5 = vld [vmem:[#allocation118_spill] sm:$0xff] }
 0x132   : > { %6941 = vst [vmem:[#allocation112_spill] sm:$0xff] %v4022_v4  ;;  %6943 = vst [vmem:[#allocation113_spill] sm:$0xff] %v4026_v56  ;;  %v4038_v61 = vmul.f32 %v6948_v35, %v6948_v35  ;;  %v4042_v34 = vmul.f32 %v6950_v5, %v6950_v5  ;;  %v6952_v4 = vld [vmem:[#allocation120_spill] sm:$0xff]  ;;  %v6954_v56 = vld [vmem:[#allocation121_spill] sm:$0xff] }
 0x133   : > { %6945 = vst [vmem:[#allocation114_spill] sm:$0xff] %v4030_v40  ;;  %6947 = vst [vmem:[#allocation116_spill] sm:$0xff] %v4034_v37  ;;  %v4046_v9 = vmul.f32 %v6952_v4, %v6952_v4  ;;  %v4050_v24 = vmul.f32 %v6954_v56, %v6954_v56  ;;  %v6956_v40 = vld [vmem:[#allocation128_spill] sm:$0xff]  ;;  %v6958_v37 = vld [vmem:[#allocation129_spill] sm:$0xff] }
 0x134   : > { %6949 = vst [vmem:[#allocation117_spill] sm:$0xff] %v4038_v61  ;;  %6951 = vst [vmem:[#allocation118_spill] sm:$0xff] %v4042_v34  ;;  %v4054_v31 = vmul.f32 %v6956_v40, %v6956_v40  ;;  %v4058_v35 = vmul.f32 %v6958_v37, %v6958_v37  ;;  %v6960_v61 = vld [vmem:[#allocation130_spill] sm:$0xff]  ;;  %v6962_v34 = vld [vmem:[#allocation132_spill] sm:$0xff] }
 0x135   : > { %6953 = vst [vmem:[#allocation120_spill] sm:$0xff] %v4046_v9  ;;  %6955 = vst [vmem:[#allocation121_spill] sm:$0xff] %v4050_v24  ;;  %v4062_v5 = vmul.f32 %v6960_v61, %v6960_v61  ;;  %v4066_v4 = vmul.f32 %v6962_v34, %v6962_v34  ;;  %v6964_v56 = vld [vmem:[#allocation133_spill] sm:$0xff]  ;;  %v6966_v40 = vld [vmem:[#allocation134_spill] sm:$0xff]  ;;  %v4086_v34 = vmul.f32 %v3588_v43, %v3588_v43 }
 0x136   : > { %6957 = vst [vmem:[#allocation128_spill] sm:$0xff] %v4054_v31  ;;  %6959 = vst [vmem:[#allocation129_spill] sm:$0xff] %v4058_v35  ;;  %v4070_v24 = vmul.f32 %v6964_v56, %v6964_v56  ;;  %v4074_v31 = vmul.f32 %v6966_v40, %v6966_v40  ;;  %v6968_v37 = vld [vmem:[#allocation135_spill] sm:$0xff]  ;;  %v6970_v61 = vld [vmem:[#allocation136_spill] sm:$0xff]  ;;  %v4090_v56 = vmul.f32 %v3590_v22, %v3590_v22 }
 0x137   : > { %6961 = vst [vmem:[#allocation130_spill] sm:$0xff] %v4062_v5  ;;  %6963 = vst [vmem:[#allocation132_spill] sm:$0xff] %v4066_v4  ;;  %v4078_v35 = vmul.f32 %v6968_v37, %v6968_v37  ;;  %v4082_v5 = vmul.f32 %v6970_v61, %v6970_v61  ;;  %v4094_v40 = vmul.f32 %v3592_v8, %v3592_v8  ;;  %v2757_v4 = vld [vmem:[%s3054_s30 + $0x60] sm:$0xff]  ;;  %v2758_v9 = vld [vmem:[%s3054_s30 + $0x68] sm:$0xff] }
 0x138   : > { %6965 = vst [vmem:[#allocation133_spill] sm:$0xff] %v4070_v24  ;;  %6967 = vst [vmem:[#allocation134_spill] sm:$0xff] %v4074_v31  ;;  %v4098_v37 = vmul.f32 %v3594_v21, %v3594_v21  ;;  %v4102_v61 = vmul.f32 %v3596_v38, %v3596_v38  ;;  %v4106_v43 = vmul.f32 %v3598_v16, %v3598_v16  ;;  %v2745_v21 = vld [vmem:[%s3054_s30] sm:$0xff]  ;;  %v2746_v38 = vld [vmem:[%s3054_s30 + $0x8] sm:$0xff] }
 0x139   : > { %6969 = vst [vmem:[#allocation135_spill] sm:$0xff] %v4078_v35  ;;  %6971 = vst [vmem:[#allocation136_spill] sm:$0xff] %v4082_v5  ;;  %v4110_v22 = vmul.f32 %v3600_v7, %v3600_v7  ;;  %v4114_v8 = vmul.f32 %v3614_v27, %v3614_v27  ;;  %v2753_v5 = vld [vmem:[%s3054_s30 + $0x40] sm:$0xff]  ;;  %v2754_v35 = vld [vmem:[%s3054_s30 + $0x48] sm:$0xff] }
 0x13a   : > { %6972 = vst [vmem:[#allocation167_spill] sm:$0xff] %v4086_v34  ;;  %6973 = vst [vmem:[#allocation168_spill] sm:$0xff] %v4090_v56  ;;  %v2751_v56 = vld [vmem:[%s3054_s30 + $0x30] sm:$0xff]  ;;  %v2752_v34 = vld [vmem:[%s3054_s30 + $0x38] sm:$0xff] }
 0x13b   : > { %6974 = vst [vmem:[#allocation169_spill] sm:$0xff] %v4094_v40  ;;  %6975 = vst [vmem:[#allocation170_spill] sm:$0xff] %v4098_v37  ;;  %v4117_v37 = vmul.f32 %v2745_v21, %v2745_v21  ;;  %v2747_v40 = vld [vmem:[%s3054_s30 + $0x10] sm:$0xff]  ;;  %v2756_v24 = vld [vmem:[%s3054_s30 + $0x58] sm:$0xff] }
 0x13c   : > { %6976 = vst [vmem:[#allocation171_spill] sm:$0xff] %v4102_v61  ;;  %6977 = vst [vmem:[#allocation172_spill] sm:$0xff] %v4106_v43  ;;  %v4120_v61 = vmul.f32 %v2746_v38, %v2746_v38  ;;  %v4123_v16 = vmul.f32 %v2747_v40, %v2747_v40  ;;  %v2748_v43 = vld [vmem:[%s3054_s30 + $0x18] sm:$0xff]  ;;  %v4135_v38 = vmul.f32 %v2751_v56, %v2751_v56  ;;  %v2755_v31 = vld [vmem:[%s3054_s30 + $0x50] sm:$0xff] }
 0x13d   : > { %6978 = vst [vmem:[#allocation173_spill] sm:$0xff] %v4110_v22  ;;  %6979 = vst [vmem:[#allocation174_spill] sm:$0xff] %v4114_v8  ;;  %v4126_v7 = vmul.f32 %v2748_v43, %v2748_v43  ;;  %v2749_v22 = vld [vmem:[%s3054_s30 + $0x20] sm:$0xff]  ;;  %v2750_v8 = vld [vmem:[%s3054_s30 + $0x28] sm:$0xff]  ;;  %v4138_v40 = vmul.f32 %v2752_v34, %v2752_v34  ;;  %v4141_v43 = vmul.f32 %v2753_v5, %v2753_v5 }
 0x13e   : > { %v4129_v27 = vmul.f32 %v2749_v22, %v2749_v22  ;;  %v4132_v21 = vmul.f32 %v2750_v8, %v2750_v8  ;;  %v4144_v22 = vmul.f32 %v2754_v35, %v2754_v35  ;;  %v4147_v8 = vmul.f32 %v2755_v31, %v2755_v31  ;;  %v2777_v0 = vld [vmem:[%s3054_s30 + $0x100] sm:$0xff]  ;;  %v2778_v63 = vld [vmem:[%s3054_s30 + $0x108] sm:$0xff]  ;;  %v2780_v48 = vld [vmem:[%s3054_s30 + $0x118] sm:$0xff] }
 0x13f   : > { %v4150_v56 = vmul.f32 %v2756_v24, %v2756_v24  ;;  %v4153_v34 = vmul.f32 %v2757_v4, %v2757_v4  ;;  %v4156_v5 = vmul.f32 %v2758_v9, %v2758_v9  ;;  %v4159_v35 = vmul.f32 %v2759_v30, %v2759_v30  ;;  %v2781_v47 = vld [vmem:[%s3054_s30 + $0x120] sm:$0xff]  ;;  %v2782_v1 = vld [vmem:[%s3054_s30 + $0x128] sm:$0xff]  ;;  %v2783_v60 = vld [vmem:[%s3054_s30 + $0x130] sm:$0xff] }
 0x140   : > { %v4162_v31 = vmul.f32 %v2760_v25, %v2760_v25  ;;  %v4165_v24 = vmul.f32 %v2761_v15, %v2761_v15  ;;  %v4168_v4 = vmul.f32 %v2762_v32, %v2762_v32  ;;  %v4171_v9 = vmul.f32 %v2763_v41, %v2763_v41  ;;  %v2786_v49 = vld [vmem:[%s3054_s30 + $0x148] sm:$0xff]  ;;  %v2801_v29 = vld [vmem:[%s3054_s30 + $0x1c0] sm:$0xff] }
 0x141   : > { %v4174_v30 = vmul.f32 %v2764_v28, %v2764_v28  ;;  %v4177_v25 = vmul.f32 %v2765_v11, %v2765_v11  ;;  %v4180_v15 = vmul.f32 %v2766_v26, %v2766_v26  ;;  %v4183_v32 = vmul.f32 %v2767_v33, %v2767_v33 }
 0x142   : > { %v4186_v41 = vmul.f32 %v2768_v19, %v2768_v19  ;;  %v4189_v28 = vmul.f32 %v2769_v18, %v2769_v18  ;;  %v4192_v11 = vmul.f32 %v2770_v17, %v2770_v17  ;;  %v4195_v26 = vmul.f32 %v2771_v14, %v2771_v14 }
 0x143   : > { %v4198_v33 = vmul.f32 %v2772_v13, %v2772_v13  ;;  %v4201_v19 = vmul.f32 %v2773_v12, %v2773_v12  ;;  %v4204_v18 = vmul.f32 %v2774_v10, %v2774_v10  ;;  %v4207_v17 = vmul.f32 %v2775_v6, %v2775_v6 }
 0x144   : > { %v4210_v14 = vmul.f32 %v2776_v3, %v2776_v3  ;;  %v4213_v13 = vmul.f32 %v2777_v0, %v2777_v0  ;;  %v4216_v12 = vmul.f32 %v2778_v63, %v2778_v63  ;;  %v4219_v10 = vmul.f32 %v2779_v55, %v2779_v55 }
 0x145   : > { %v4222_v6 = vmul.f32 %v2780_v48, %v2780_v48  ;;  %v4225_v3 = vmul.f32 %v2781_v47, %v2781_v47  ;;  %v4228_v0 = vmul.f32 %v2782_v1, %v2782_v1  ;;  %v4231_v63 = vmul.f32 %v2783_v60, %v2783_v60 }
 0x146   : > { %v4234_v55 = vmul.f32 %v2784_v51, %v2784_v51  ;;  %v4237_v48 = vmul.f32 %v2785_v50, %v2785_v50  ;;  %v4240_v47 = vmul.f32 %v2786_v49, %v2786_v49  ;;  %v4243_v1 = vmul.f32 %v2787_v46, %v2787_v46 }
 0x147   : > { %v4246_v60 = vmul.f32 %v2788_v45, %v2788_v45  ;;  %v4249_v51 = vmul.f32 %v2789_v44, %v2789_v44  ;;  %v4252_v50 = vmul.f32 %v2790_v2, %v2790_v2  ;;  %v4255_v49 = vmul.f32 %v2791_v62, %v2791_v62 }
 0x148   : > { %6980 = vst [vmem:[#allocation175_spill] sm:$0xff] %v4237_v48  ;;  %6981 = vst [vmem:[#allocation176_spill] sm:$0xff] %v4240_v47  ;;  %v4258_v46 = vmul.f32 %v2792_v59, %v2792_v59  ;;  %v4261_v45 = vmul.f32 %v2793_v58, %v2793_v58  ;;  %v4264_v44 = vmul.f32 %v2794_v57, %v2794_v57 }
 0x149   : > { %6982 = vst [vmem:[#allocation177_spill] sm:$0xff] %v4243_v1  ;;  %6983 = vst [vmem:[#allocation178_spill] sm:$0xff] %v4246_v60  ;;  %v4267_v2 = vmul.f32 %v2795_v54, %v2795_v54  ;;  %v4270_v62 = vmul.f32 %v2796_v53, %v2796_v53  ;;  %v4273_v59 = vmul.f32 %v2797_v52, %v2797_v52 }
 0x14a   : > { %6984 = vst [vmem:[#allocation179_spill] sm:$0xff] %v4249_v51  ;;  %6985 = vst [vmem:[#allocation180_spill] sm:$0xff] %v4252_v50  ;;  %v4276_v58 = vmul.f32 %v2798_v36, %v2798_v36  ;;  %v4279_v57 = vmul.f32 %v2799_v23, %v2799_v23  ;;  %v4282_v54 = vmul.f32 %v2800_v20, %v2800_v20 }
 0x14b   : > { %6986 = vst [vmem:[#allocation181_spill] sm:$0xff] %v4255_v49  ;;  %6987 = vst [vmem:[#allocation182_spill] sm:$0xff] %v4258_v46  ;;  %v4285_v53 = vmul.f32 %v2801_v29, %v2801_v29  ;;  %v4288_v52 = vmul.f32 %v2802_v42, %v2802_v42 }
 0x14c   : > { %6988 = vst [vmem:[#allocation183_spill] sm:$0xff] %v4261_v45  ;;  %6989 = vst [vmem:[#allocation184_spill] sm:$0xff] %v4264_v44 }
 0x14d   : > { %6990 = vst [vmem:[#allocation185_spill] sm:$0xff] %v4267_v2  ;;  %6991 = vst [vmem:[#allocation186_spill] sm:$0xff] %v4270_v62  ;;  %v2828_v2 = vld [vmem:[%s3054_s30 + $0x298] sm:$0xff] }
 0x14e   : > { %6992 = vst [vmem:[#allocation187_spill] sm:$0xff] %v4273_v59  ;;  %6993 = vst [vmem:[#allocation188_spill] sm:$0xff] %v4276_v58  ;;  %v2803_v59 = vld [vmem:[%s3054_s30 + $0x1d0] sm:$0xff]  ;;  %v2804_v58 = vld [vmem:[%s3054_s30 + $0x1d8] sm:$0xff] }
 0x14f   : > { %6994 = vst [vmem:[#allocation189_spill] sm:$0xff] %v4279_v57  ;;  %6995 = vst [vmem:[#allocation190_spill] sm:$0xff] %v4282_v54  ;;  %v4291_v36 = vmul.f32 %v2803_v59, %v2803_v59  ;;  %v4294_v23 = vmul.f32 %v2804_v58, %v2804_v58  ;;  %v2805_v57 = vld [vmem:[%s3054_s30 + $0x1e0] sm:$0xff]  ;;  %v2806_v54 = vld [vmem:[%s3054_s30 + $0x1e8] sm:$0xff] }
 0x150   : > { %6996 = vst [vmem:[#allocation191_spill] sm:$0xff] %v4285_v53  ;;  %6997 = vst [vmem:[#allocation192_spill] sm:$0xff] %v4288_v52  ;;  %v4297_v20 = vmul.f32 %v2805_v57, %v2805_v57  ;;  %v4300_v29 = vmul.f32 %v2806_v54, %v2806_v54  ;;  %v2807_v53 = vld [vmem:[%s3054_s30 + $0x1f0] sm:$0xff]  ;;  %v2808_v52 = vld [vmem:[%s3054_s30 + $0x1f8] sm:$0xff] }
 0x151   : > { %6998 = vst [vmem:[#allocation193_spill] sm:$0xff] %v4291_v36  ;;  %6999 = vst [vmem:[#allocation194_spill] sm:$0xff] %v4294_v23  ;;  %v4303_v42 = vmul.f32 %v2807_v53, %v2807_v53  ;;  %v4306_v59 = vmul.f32 %v2808_v52, %v2808_v52  ;;  %v2809_v36 = vld [vmem:[%s3054_s30 + $0x200] sm:$0xff]  ;;  %v2810_v23 = vld [vmem:[%s3054_s30 + $0x208] sm:$0xff] }
 0x152   : > { %7000 = vst [vmem:[#allocation195_spill] sm:$0xff] %v4297_v20  ;;  %7001 = vst [vmem:[#allocation196_spill] sm:$0xff] %v4300_v29  ;;  %v4309_v58 = vmul.f32 %v2809_v36, %v2809_v36  ;;  %v4312_v57 = vmul.f32 %v2810_v23, %v2810_v23  ;;  %v2811_v20 = vld [vmem:[%s3054_s30 + $0x210] sm:$0xff]  ;;  %v2812_v29 = vld [vmem:[%s3054_s30 + $0x218] sm:$0xff] }
 0x153   : > { %7002 = vst [vmem:[#allocation197_spill] sm:$0xff] %v4303_v42  ;;  %7003 = vst [vmem:[#allocation198_spill] sm:$0xff] %v4306_v59  ;;  %v4315_v54 = vmul.f32 %v2811_v20, %v2811_v20  ;;  %v4318_v53 = vmul.f32 %v2812_v29, %v2812_v29  ;;  %v2813_v42 = vld [vmem:[%s3054_s30 + $0x220] sm:$0xff]  ;;  %v2814_v59 = vld [vmem:[%s3054_s30 + $0x228] sm:$0xff] }
 0x154   : > { %7004 = vst [vmem:[#allocation199_spill] sm:$0xff] %v4309_v58  ;;  %7005 = vst [vmem:[#allocation200_spill] sm:$0xff] %v4312_v57  ;;  %v4321_v52 = vmul.f32 %v2813_v42, %v2813_v42  ;;  %v4324_v36 = vmul.f32 %v2814_v59, %v2814_v59  ;;  %v2815_v58 = vld [vmem:[%s3054_s30 + $0x230] sm:$0xff]  ;;  %v2816_v57 = vld [vmem:[%s3054_s30 + $0x238] sm:$0xff] }
 0x155   : > { %7006 = vst [vmem:[#allocation201_spill] sm:$0xff] %v4315_v54  ;;  %7007 = vst [vmem:[#allocation202_spill] sm:$0xff] %v4318_v53  ;;  %v4327_v23 = vmul.f32 %v2815_v58, %v2815_v58  ;;  %v4330_v20 = vmul.f32 %v2816_v57, %v2816_v57  ;;  %v2817_v54 = vld [vmem:[%s3054_s30 + $0x240] sm:$0xff]  ;;  %v2818_v53 = vld [vmem:[%s3054_s30 + $0x248] sm:$0xff] }
 0x156   : > { %7008 = vst [vmem:[#allocation203_spill] sm:$0xff] %v4321_v52  ;;  %7009 = vst [vmem:[#allocation204_spill] sm:$0xff] %v4324_v36  ;;  %v4333_v29 = vmul.f32 %v2817_v54, %v2817_v54  ;;  %v4336_v42 = vmul.f32 %v2818_v53, %v2818_v53  ;;  %v2819_v52 = vld [vmem:[%s3054_s30 + $0x250] sm:$0xff]  ;;  %v2820_v36 = vld [vmem:[%s3054_s30 + $0x258] sm:$0xff] }
 0x157   : > { %7010 = vst [vmem:[#allocation205_spill] sm:$0xff] %v4327_v23  ;;  %7011 = vst [vmem:[#allocation206_spill] sm:$0xff] %v4330_v20  ;;  %v4339_v59 = vmul.f32 %v2819_v52, %v2819_v52  ;;  %v4342_v58 = vmul.f32 %v2820_v36, %v2820_v36  ;;  %v2821_v23 = vld [vmem:[%s3054_s30 + $0x260] sm:$0xff]  ;;  %v2822_v20 = vld [vmem:[%s3054_s30 + $0x268] sm:$0xff] }
 0x158   : > { %7012 = vst [vmem:[#allocation207_spill] sm:$0xff] %v4333_v29  ;;  %7013 = vst [vmem:[#allocation208_spill] sm:$0xff] %v4336_v42  ;;  %v4345_v57 = vmul.f32 %v2821_v23, %v2821_v23  ;;  %v4348_v54 = vmul.f32 %v2822_v20, %v2822_v20  ;;  %v2823_v29 = vld [vmem:[%s3054_s30 + $0x270] sm:$0xff]  ;;  %v2824_v42 = vld [vmem:[%s3054_s30 + $0x278] sm:$0xff]  ;;  %v4366_v20 = vmul.f32 %v2828_v2, %v2828_v2 }
 0x159   : > { %7014 = vst [vmem:[#allocation209_spill] sm:$0xff] %v4339_v59  ;;  %7015 = vst [vmem:[#allocation210_spill] sm:$0xff] %v4342_v58  ;;  %v4351_v53 = vmul.f32 %v2823_v29, %v2823_v29  ;;  %v4354_v52 = vmul.f32 %v2824_v42, %v2824_v42  ;;  %v2825_v59 = vld [vmem:[%s3054_s30 + $0x280] sm:$0xff]  ;;  %v2826_v36 = vld [vmem:[%s3054_s30 + $0x288] sm:$0xff] }
 0x15a   : > { %7016 = vst [vmem:[#allocation211_spill] sm:$0xff] %v4345_v57  ;;  %7017 = vst [vmem:[#allocation212_spill] sm:$0xff] %v4348_v54  ;;  %v4357_v62 = vmul.f32 %v2825_v59, %v2825_v59  ;;  %v4360_v58 = vmul.f32 %v2826_v36, %v2826_v36  ;;  %v2827_v23 = vld [vmem:[%s3054_s30 + $0x290] sm:$0xff]  ;;  %v2829_v54 = vld [vmem:[%s3054_s30 + $0x2a0] sm:$0xff] }
 0x15b   : > { %7018 = vst [vmem:[#allocation213_spill] sm:$0xff] %v4351_v53  ;;  %7019 = vst [vmem:[#allocation214_spill] sm:$0xff] %v4354_v52  ;;  %v4363_v57 = vmul.f32 %v2827_v23, %v2827_v23  ;;  %v4369_v44 = vmul.f32 %v2829_v54, %v2829_v54  ;;  %v2830_v29 = vld [vmem:[%s3054_s30 + $0x2a8] sm:$0xff]  ;;  %v2831_v42 = vld [vmem:[%s3054_s30 + $0x2b0] sm:$0xff] }
 0x15c   : > { %7020 = vst [vmem:[#allocation215_spill] sm:$0xff] %v4357_v62  ;;  %7021 = vst [vmem:[#allocation216_spill] sm:$0xff] %v4360_v58  ;;  %v4372_v53 = vmul.f32 %v2830_v29, %v2830_v29  ;;  %v4375_v52 = vmul.f32 %v2831_v42, %v2831_v42  ;;  %v2832_v59 = vld [vmem:[%s3054_s30 + $0x2b8] sm:$0xff]  ;;  %v7028_v36 = vld [vmem:[#allocation58_spill] sm:$0xff] }
 0x15d   : > { %7022 = vst [vmem:[#allocation217_spill] sm:$0xff] %v4363_v57  ;;  %7023 = vst [vmem:[#allocation218_spill] sm:$0xff] %v4366_v20  ;;  %v4378_v62 = vmul.f32 %v2832_v59, %v2832_v59  ;;  %v4382_v58 = vmul.f32 %v7028_v36, %v7028_v36  ;;  %v7030_v23 = vld [vmem:[#allocation59_spill] sm:$0xff]  ;;  %v7032_v20 = vld [vmem:[#allocation60_spill] sm:$0xff] }
 0x15e   : > { %7024 = vst [vmem:[#allocation219_spill] sm:$0xff] %v4369_v44  ;;  %7025 = vst [vmem:[#allocation220_spill] sm:$0xff] %v4372_v53  ;;  %v4386_v2 = vmul.f32 %v7030_v23, %v7030_v23  ;;  %v4390_v54 = vmul.f32 %v7032_v20, %v7032_v20  ;;  %v7034_v29 = vld [vmem:[#allocation61_spill] sm:$0xff]  ;;  %v7036_v42 = vld [vmem:[#allocation62_spill] sm:$0xff] }
 0x15f   : > { %7026 = vst [vmem:[#allocation221_spill] sm:$0xff] %v4375_v52  ;;  %7027 = vst [vmem:[#allocation222_spill] sm:$0xff] %v4378_v62  ;;  %v4394_v53 = vmul.f32 %v7034_v29, %v7034_v29  ;;  %v4398_v59 = vmul.f32 %v7036_v42, %v7036_v42  ;;  %v7038_v62 = vld [vmem:[#allocation63_spill] sm:$0xff] }
 0x160   : > { %7029 = vst [vmem:[#allocation58_spill] sm:$0xff] %v4382_v58  ;;  %7031 = vst [vmem:[#allocation59_spill] sm:$0xff] %v4386_v2  ;;  %v4402_v36 = vmul.f32 %v7038_v62, %v7038_v62  ;;  %v7040_v58 = vld [vmem:[#allocation67_spill] sm:$0xff] }
 0x161   : > { %7033 = vst [vmem:[#allocation60_spill] sm:$0xff] %v4390_v54  ;;  %7035 = vst [vmem:[#allocation61_spill] sm:$0xff] %v4394_v53  ;;  %v4406_v23 = vmul.f32 %v7040_v58, %v7040_v58  ;;  %v7042_v2 = vld [vmem:[#allocation71_spill] sm:$0xff]  ;;  %v7044_v54 = vld [vmem:[#allocation74_spill] sm:$0xff] }
 0x162   : > { %7037 = vst [vmem:[#allocation62_spill] sm:$0xff] %v4398_v59  ;;  %7039 = vst [vmem:[#allocation63_spill] sm:$0xff] %v4402_v36  ;;  %v4410_v20 = vmul.f32 %v7042_v2, %v7042_v2  ;;  %v4414_v29 = vmul.f32 %v7044_v54, %v7044_v54  ;;  %v7046_v53 = vld [vmem:[#allocation75_spill] sm:$0xff]  ;;  %v7048_v59 = vld [vmem:[#allocation76_spill] sm:$0xff] }
 0x163   : > { %7041 = vst [vmem:[#allocation67_spill] sm:$0xff] %v4406_v23  ;;  %v4418_v42 = vmul.f32 %v7046_v53, %v7046_v53  ;;  %v4422_v62 = vmul.f32 %v7048_v59, %v7048_v59  ;;  %v7050_v36 = vld [vmem:[#allocation77_spill] sm:$0xff]  ;;  %v7052_v23 = vld [vmem:[#allocation78_spill] sm:$0xff] }
 0x164   : > { %7043 = vst [vmem:[#allocation71_spill] sm:$0xff] %v4410_v20  ;;  %7045 = vst [vmem:[#allocation74_spill] sm:$0xff] %v4414_v29  ;;  %v4426_v58 = vmul.f32 %v7050_v36, %v7050_v36  ;;  %v4430_v2 = vmul.f32 %v7052_v23, %v7052_v23  ;;  %v7054_v20 = vld [vmem:[#allocation79_spill] sm:$0xff] }
 0x165   : > { %7047 = vst [vmem:[#allocation75_spill] sm:$0xff] %v4418_v42  ;;  %7049 = vst [vmem:[#allocation76_spill] sm:$0xff] %v4422_v62  ;;  %v4434_v54 = vmul.f32 %v7054_v20, %v7054_v20  ;;  %v7056_v29 = vld [vmem:[#allocation83_spill] sm:$0xff]  ;;  %v7060_v62 = vld [vmem:[#allocation90_spill] sm:$0xff] }
 0x166   : > { %7051 = vst [vmem:[#allocation77_spill] sm:$0xff] %v4426_v58  ;;  %7053 = vst [vmem:[#allocation78_spill] sm:$0xff] %v4430_v2  ;;  %v4438_v53 = vmul.f32 %v7056_v29, %v7056_v29  ;;  %v7058_v42 = vld [vmem:[#allocation87_spill] sm:$0xff]  ;;  %v4446_v36 = vmul.f32 %v7060_v62, %v7060_v62  ;;  %v7064_v2 = vld [vmem:[#allocation92_spill] sm:$0xff] }
 0x167   : > { %7055 = vst [vmem:[#allocation79_spill] sm:$0xff] %v4434_v54  ;;  %v4442_v59 = vmul.f32 %v7058_v42, %v7058_v42  ;;  %v7062_v58 = vld [vmem:[#allocation91_spill] sm:$0xff]  ;;  %v4454_v20 = vmul.f32 %v7064_v2, %v7064_v2  ;;  %v7066_v54 = vld [vmem:[#allocation93_spill] sm:$0xff] }
 0x168   : > { %7057 = vst [vmem:[#allocation83_spill] sm:$0xff] %v4438_v53  ;;  %7061 = vst [vmem:[#allocation90_spill] sm:$0xff] %v4446_v36  ;;  %v4450_v23 = vmul.f32 %v7062_v58, %v7062_v58  ;;  %v4458_v29 = vmul.f32 %v7066_v54, %v7066_v54  ;;  %v7068_v53 = vld [vmem:[#allocation94_spill] sm:$0xff]  ;;  %v7072_v36 = vld [vmem:[#allocation99_spill] sm:$0xff] }
 0x169   : > { %7059 = vst [vmem:[#allocation87_spill] sm:$0xff] %v4442_v59  ;;  %7065 = vst [vmem:[#allocation92_spill] sm:$0xff] %v4454_v20  ;;  %v4462_v42 = vmul.f32 %v7068_v53, %v7068_v53  ;;  %v7070_v59 = vld [vmem:[#allocation95_spill] sm:$0xff]  ;;  %v4470_v58 = vmul.f32 %v7072_v36, %v7072_v36  ;;  %v7076_v20 = vld [vmem:[#allocation106_spill] sm:$0xff] }
 0x16a   : > { %7063 = vst [vmem:[#allocation91_spill] sm:$0xff] %v4450_v23  ;;  %7067 = vst [vmem:[#allocation93_spill] sm:$0xff] %v4458_v29  ;;  %v4466_v62 = vmul.f32 %v7070_v59, %v7070_v59  ;;  %v7074_v23 = vld [vmem:[#allocation103_spill] sm:$0xff]  ;;  %v4478_v54 = vmul.f32 %v7076_v20, %v7076_v20 }
 0x16b   : > { %7069 = vst [vmem:[#allocation94_spill] sm:$0xff] %v4462_v42  ;;  %7073 = vst [vmem:[#allocation99_spill] sm:$0xff] %v4470_v58  ;;  %v4474_v2 = vmul.f32 %v7074_v23, %v7074_v23  ;;  %v7078_v29 = vld [vmem:[#allocation107_spill] sm:$0xff]  ;;  %v7080_v42 = vld [vmem:[#allocation108_spill] sm:$0xff] }
 0x16c   : > { %7071 = vst [vmem:[#allocation95_spill] sm:$0xff] %v4466_v62  ;;  %7077 = vst [vmem:[#allocation106_spill] sm:$0xff] %v4478_v54  ;;  %v4482_v53 = vmul.f32 %v7078_v29, %v7078_v29  ;;  %v4486_v59 = vmul.f32 %v7080_v42, %v7080_v42  ;;  %v7082_v62 = vld [vmem:[#allocation109_spill] sm:$0xff]  ;;  %v7084_v58 = vld [vmem:[#allocation110_spill] sm:$0xff] }
 0x16d   : > { %7075 = vst [vmem:[#allocation103_spill] sm:$0xff] %v4474_v2  ;;  %v4490_v36 = vmul.f32 %v7082_v62, %v7082_v62  ;;  %v4494_v23 = vmul.f32 %v7084_v58, %v7084_v58  ;;  %v7086_v2 = vld [vmem:[#allocation111_spill] sm:$0xff] }
 0x16e   : > { %7079 = vst [vmem:[#allocation107_spill] sm:$0xff] %v4482_v53  ;;  %7081 = vst [vmem:[#allocation108_spill] sm:$0xff] %v4486_v59  ;;  %v4498_v20 = vmul.f32 %v7086_v2, %v7086_v2  ;;  %v7088_v54 = vld [vmem:[#allocation115_spill] sm:$0xff]  ;;  %v7092_v59 = vld [vmem:[#allocation122_spill] sm:$0xff] }
 0x16f   : > { %7083 = vst [vmem:[#allocation109_spill] sm:$0xff] %v4490_v36  ;;  %7085 = vst [vmem:[#allocation110_spill] sm:$0xff] %v4494_v23  ;;  %v4502_v29 = vmul.f32 %v7088_v54, %v7088_v54  ;;  %v7090_v53 = vld [vmem:[#allocation119_spill] sm:$0xff]  ;;  %v4510_v62 = vmul.f32 %v7092_v59, %v7092_v59  ;;  %v7096_v23 = vld [vmem:[#allocation124_spill] sm:$0xff] }
 0x170   : > { %7087 = vst [vmem:[#allocation111_spill] sm:$0xff] %v4498_v20  ;;  %v4506_v42 = vmul.f32 %v7090_v53, %v7090_v53  ;;  %v7094_v36 = vld [vmem:[#allocation123_spill] sm:$0xff]  ;;  %v4518_v2 = vmul.f32 %v7096_v23, %v7096_v23  ;;  %v7098_v20 = vld [vmem:[#allocation125_spill] sm:$0xff]  ;;  %v4538_v23 = vmul.f32 %v3566_v39, %v3566_v39  ;;  %v1331_v39 = vrot.slane %v4138_v40, 4 }
 0x171   : > { %7089 = vst [vmem:[#allocation115_spill] sm:$0xff] %v4502_v29  ;;  %7093 = vst [vmem:[#allocation122_spill] sm:$0xff] %v4510_v62  ;;  %v4514_v58 = vmul.f32 %v7094_v36, %v7094_v36  ;;  %v4522_v54 = vmul.f32 %v7098_v20, %v7098_v20  ;;  %v7100_v29 = vld [vmem:[#allocation126_spill] sm:$0xff]  ;;  %v7104_v62 = vld [vmem:[#allocation131_spill] sm:$0xff]  ;;  %v1295_v20 = vrot.slane %v4120_v61, 4 }
 0x172   : > { %7091 = vst [vmem:[#allocation119_spill] sm:$0xff] %v4506_v42  ;;  %7097 = vst [vmem:[#allocation124_spill] sm:$0xff] %v4518_v2  ;;  %v4526_v53 = vmul.f32 %v7100_v29, %v7100_v29  ;;  %v7102_v42 = vld [vmem:[#allocation127_spill] sm:$0xff]  ;;  %v4534_v36 = vmul.f32 %v7104_v62, %v7104_v62  ;;  %v1289_v2 = vrot.slane %v4117_v37, 4  ;;  %v1307_v29 = vrot.slane %v4126_v7, 4 }
 0x173   : > { %7095 = vst [vmem:[#allocation123_spill] sm:$0xff] %v4514_v58  ;;  %7099 = vst [vmem:[#allocation125_spill] sm:$0xff] %v4522_v54  ;;  %v4530_v59 = vmul.f32 %v7102_v42, %v7102_v42  ;;  %v1301_v54 = vrot.slane %v4123_v16, 4  ;;  %v1319_v42 = vrot.slane %v4132_v21, 4  ;;  %v1296_v62 = vadd.f32 %v1295_v20, %v4120_v61 }
 0x174   : > { %7101 = vst [vmem:[#allocation126_spill] sm:$0xff] %v4526_v53  ;;  %7105 = vst [vmem:[#allocation131_spill] sm:$0xff] %v4534_v36  ;;  %v1313_v53 = vrot.slane %v4129_v27, 4  ;;  %v1325_v36 = vrot.slane %v4135_v38, 4  ;;  %v1308_v58 = vadd.f32 %v1307_v29, %v4126_v7 }
 0x175   : > { %7103 = vst [vmem:[#allocation127_spill] sm:$0xff] %v4530_v59  ;;  %7106 = vst [vmem:[#allocation223_spill] sm:$0xff] %v4538_v23  ;;  %v1290_v59 = vadd.f32 %v1289_v2, %v4117_v37  ;;  %v1302_v23 = vadd.f32 %v1301_v54, %v4123_v16  ;;  %v1320_v44 = vadd.f32 %v1319_v42, %v4132_v21  ;;  %v1297_v45 = vrot.slane %v1296_v62, 2 }
 0x176   : > { %v1314_v52 = vadd.f32 %v1313_v53, %v4129_v27  ;;  %v1326_v46 = vadd.f32 %v1325_v36, %v4135_v38  ;;  %v1332_v37 = vadd.f32 %v1331_v39, %v4138_v40  ;;  %v1309_v61 = vrot.slane %v1308_v58, 2 }
 0x177   : > { %v1291_v57 = vrot.slane %v1290_v59, 2  ;;  %v1303_v2 = vrot.slane %v1302_v23, 2  ;;  %v1321_v49 = vrot.slane %v1320_v44, 2  ;;  %v1298_v51 = vadd.f32 %v1297_v45, %v1296_v62 }
 0x178   : > { %v1315_v20 = vrot.slane %v1314_v52, 2  ;;  %v1327_v60 = vrot.slane %v1326_v46, 2  ;;  %v1333_v16 = vrot.slane %v1332_v37, 2  ;;  %v1310_v7 = vadd.f32 %v1309_v61, %v1308_v58 }
 0x179   : > { %v1292_v50 = vadd.f32 %v1291_v57, %v1290_v59  ;;  %v1304_v54 = vadd.f32 %v1303_v2, %v1302_v23  ;;  %v1322_v27 = vadd.f32 %v1321_v49, %v1320_v44  ;;  %v1299_v21 = vrot.slane %v1298_v51, 1 }
 0x17a   : > { %v1316_v29 = vadd.f32 %v1315_v20, %v1314_v52  ;;  %v1328_v42 = vadd.f32 %v1327_v60, %v1326_v46  ;;  %v1334_v1 = vadd.f32 %v1333_v16, %v1332_v37  ;;  %v1311_v38 = vrot.slane %v1310_v7, 1 }
 0x17b   : > { %v1293_v53 = vrot.slane %v1292_v50, 1  ;;  %v1305_v47 = vrot.slane %v1304_v54, 1  ;;  %v1323_v40 = vrot.slane %v1322_v27, 1  ;;  %v4558_v48 = vadd.f32 %v1299_v21, %v1298_v51 }
 0x17c   : > { %v1317_v36 = vrot.slane %v1316_v29, 1  ;;  %v1329_v57 = vrot.slane %v1328_v42, 1  ;;  %v1335_v45 = vrot.slane %v1334_v1, 1  ;;  %v4562_v23 = vadd.f32 %v1311_v38, %v1310_v7 }
 0x17d   : > { %v4556_v39 = vadd.f32 %v1293_v53, %v1292_v50  ;;  %v4560_v59 = vadd.f32 %v1305_v47, %v1304_v54  ;;  %v4566_v49 = vadd.f32 %v1323_v40, %v1322_v27  ;;  %v1337_v44 = vrot.slane %v4141_v43, 4 }
 0x17e   : > { %v4564_v52 = vadd.f32 %v1317_v36, %v1316_v29  ;;  %v4568_v60 = vadd.f32 %v1329_v57, %v1328_v42  ;;  %v4570_v46 = vadd.f32 %v1335_v45, %v1334_v1  ;;  %v1343_v50 = vrot.slane %v4144_v22, 4 }
 0x17f   : > { %v1349_v51 = vrot.slane %v4147_v8, 4  ;;  %v1355_v58 = vrot.slane %v4150_v56, 4  ;;  %v1361_v47 = vrot.slane %v4153_v34, 4  ;;  %v1367_v62 = vrot.slane %v4156_v5, 4 }
 0x180   : > { %v1338_v37 = vadd.f32 %v1337_v44, %v4141_v43  ;;  %v1344_v2 = vadd.f32 %v1343_v50, %v4144_v22  ;;  %v1373_v61 = vrot.slane %v4159_v35, 4  ;;  %v1379_v1 = vrot.slane %v4162_v31, 4 }
 0x181   : > { %v1350_v20 = vadd.f32 %v1349_v51, %v4147_v8  ;;  %v1356_v16 = vadd.f32 %v1355_v58, %v4150_v56  ;;  %v1362_v54 = vadd.f32 %v1361_v47, %v4153_v34  ;;  %v1368_v7 = vadd.f32 %v1367_v62, %v4156_v5 }
 0x182   : > { %v1339_v29 = vrot.slane %v1338_v37, 2  ;;  %v1345_v27 = vrot.slane %v1344_v2, 2  ;;  %v1374_v53 = vadd.f32 %v1373_v61, %v4159_v35  ;;  %v1380_v43 = vadd.f32 %v1379_v1, %v4162_v31 }
 0x183   : > { %v1351_v21 = vrot.slane %v1350_v20, 2  ;;  %v1357_v22 = vrot.slane %v1356_v16, 2  ;;  %v1363_v42 = vrot.slane %v1362_v54, 2  ;;  %v1369_v38 = vrot.slane %v1368_v7, 2 }
 0x184   : > { %v1340_v36 = vadd.f32 %v1339_v29, %v1338_v37  ;;  %v1346_v40 = vadd.f32 %v1345_v27, %v1344_v2  ;;  %v1375_v57 = vrot.slane %v1374_v53, 2  ;;  %v1381_v8 = vrot.slane %v1380_v43, 2 }
 0x185   : > { %v1352_v45 = vadd.f32 %v1351_v21, %v1350_v20  ;;  %v1358_v56 = vadd.f32 %v1357_v22, %v1356_v16  ;;  %v1364_v44 = vadd.f32 %v1363_v42, %v1362_v54  ;;  %v1370_v34 = vadd.f32 %v1369_v38, %v1368_v7 }
 0x186   : > { %v1341_v50 = vrot.slane %v1340_v36, 1  ;;  %v1347_v5 = vrot.slane %v1346_v40, 1  ;;  %v1376_v51 = vadd.f32 %v1375_v57, %v1374_v53  ;;  %v1382_v58 = vadd.f32 %v1381_v8, %v1380_v43 }
 0x187   : > { %v1353_v47 = vrot.slane %v1352_v45, 1  ;;  %v1359_v35 = vrot.slane %v1358_v56, 1  ;;  %v1365_v62 = vrot.slane %v1364_v44, 1  ;;  %v1371_v31 = vrot.slane %v1370_v34, 1 }
 0x188   : > { %v4588_v61 = vadd.f32 %v1341_v50, %v1340_v36  ;;  %v4590_v1 = vadd.f32 %v1347_v5, %v1346_v40  ;;  %v1377_v37 = vrot.slane %v1376_v51, 1  ;;  %v1383_v2 = vrot.slane %v1382_v58, 1 }
 0x189   : > { %v4592_v29 = vadd.f32 %v1353_v47, %v1352_v45  ;;  %v4594_v20 = vadd.f32 %v1359_v35, %v1358_v56  ;;  %v4596_v16 = vadd.f32 %v1365_v62, %v1364_v44  ;;  %v4598_v54 = vadd.f32 %v1371_v31, %v1370_v34 }
 0x18a   : > { %v4600_v7 = vadd.f32 %v1377_v37, %v1376_v51  ;;  %v4602_v27 = vadd.f32 %v1383_v2, %v1382_v58  ;;  %v1385_v53 = vrot.slane %v4165_v24, 4  ;;  %v1391_v43 = vrot.slane %v4168_v4, 4 }
 0x18b   : > { %7107 = vst [vmem:[#allocation224_spill] sm:$0xff] %v4592_v29  ;;  %7108 = vst [vmem:[#allocation225_spill] sm:$0xff] %v4594_v20  ;;  %v1397_v21 = vrot.slane %v4171_v9, 4  ;;  %v1403_v22 = vrot.slane %v4174_v30, 4  ;;  %v1409_v42 = vrot.slane %v4177_v25, 4  ;;  %v1415_v38 = vrot.slane %v4180_v15, 4 }
 0x18c   : > { %7109 = vst [vmem:[#allocation226_spill] sm:$0xff] %v4596_v16  ;;  %7110 = vst [vmem:[#allocation227_spill] sm:$0xff] %v4598_v54  ;;  %v1386_v36 = vadd.f32 %v1385_v53, %v4165_v24  ;;  %v1392_v40 = vadd.f32 %v1391_v43, %v4168_v4  ;;  %v1421_v57 = vrot.slane %v4183_v32, 4  ;;  %v1427_v8 = vrot.slane %v4186_v41, 4  ;;  %v7501_v29 = vld [vmem:[#allocation128_spill] sm:$0xff]  ;;  %v7503_v20 = vld [vmem:[#allocation129_spill] sm:$0xff] }
 0x18d   : > { %7111 = vst [vmem:[#allocation228_spill] sm:$0xff] %v4600_v7  ;;  %7112 = vst [vmem:[#allocation229_spill] sm:$0xff] %v4602_v27  ;;  %v1398_v45 = vadd.f32 %v1397_v21, %v4171_v9  ;;  %v1404_v56 = vadd.f32 %v1403_v22, %v4174_v30  ;;  %v1410_v44 = vadd.f32 %v1409_v42, %v4177_v25  ;;  %v7505_v16 = vld [vmem:[#allocation130_spill] sm:$0xff]  ;;  %v7507_v54 = vld [vmem:[#allocation132_spill] sm:$0xff] }
 0x18e   : > { %v1416_v34 = vadd.f32 %v1415_v38, %v4180_v15  ;;  %v1387_v50 = vrot.slane %v1386_v36, 2  ;;  %v1393_v5 = vrot.slane %v1392_v40, 2  ;;  %v1422_v51 = vadd.f32 %v1421_v57, %v4183_v32  ;;  %v7509_v7 = vld [vmem:[#allocation133_spill] sm:$0xff]  ;;  %v7511_v27 = vld [vmem:[#allocation134_spill] sm:$0xff] }
 0x18f   : > { %v1428_v24 = vadd.f32 %v1427_v8, %v4186_v41  ;;  %v1399_v58 = vrot.slane %v1398_v45, 2  ;;  %v1405_v4 = vrot.slane %v1404_v56, 2  ;;  %v1411_v47 = vrot.slane %v1410_v44, 2 }
 0x190   : > { %v1417_v35 = vrot.slane %v1416_v34, 2  ;;  %v1388_v62 = vadd.f32 %v1387_v50, %v1386_v36  ;;  %v1394_v31 = vadd.f32 %v1393_v5, %v1392_v40  ;;  %v1423_v37 = vrot.slane %v1422_v51, 2 }
 0x191   : > { %v1429_v9 = vrot.slane %v1428_v24, 2  ;;  %v1400_v2 = vadd.f32 %v1399_v58, %v1398_v45  ;;  %v1406_v30 = vadd.f32 %v1405_v4, %v1404_v56  ;;  %v1412_v53 = vadd.f32 %v1411_v47, %v1410_v44 }
 0x192   : > { %v1418_v25 = vadd.f32 %v1417_v35, %v1416_v34  ;;  %v1389_v43 = vrot.slane %v1388_v62, 1  ;;  %v1395_v15 = vrot.slane %v1394_v31, 1  ;;  %v1424_v21 = vadd.f32 %v1423_v37, %v1422_v51 }
 0x193   : > { %v1430_v22 = vadd.f32 %v1429_v9, %v1428_v24  ;;  %v1401_v42 = vrot.slane %v1400_v2, 1  ;;  %v1407_v32 = vrot.slane %v1406_v30, 1  ;;  %v1413_v38 = vrot.slane %v1412_v53, 1 }
 0x194   : > { %v1419_v41 = vrot.slane %v1418_v25, 1  ;;  %v4620_v57 = vadd.f32 %v1389_v43, %v1388_v62  ;;  %v4622_v8 = vadd.f32 %v1395_v15, %v1394_v31  ;;  %v1425_v36 = vrot.slane %v1424_v21, 1 }
 0x195   : > { %v1431_v40 = vrot.slane %v1430_v22, 1  ;;  %v4624_v50 = vadd.f32 %v1401_v42, %v1400_v2  ;;  %v4626_v45 = vadd.f32 %v1407_v32, %v1406_v30  ;;  %v4628_v56 = vadd.f32 %v1413_v38, %v1412_v53 }
 0x196   : > { %7113 = vst [vmem:[#allocation230_spill] sm:$0xff] %v4620_v57  ;;  %7114 = vst [vmem:[#allocation231_spill] sm:$0xff] %v4622_v8  ;;  %v4630_v44 = vadd.f32 %v1419_v41, %v1418_v25  ;;  %v4632_v34 = vadd.f32 %v1425_v36, %v1424_v21  ;;  %v1433_v51 = vrot.slane %v4189_v28, 4  ;;  %v1439_v24 = vrot.slane %v4192_v11, 4  ;;  %v7513_v57 = vld [vmem:[#allocation135_spill] sm:$0xff]  ;;  %v7515_v8 = vld [vmem:[#allocation136_spill] sm:$0xff] }
 0x197   : > { %7115 = vst [vmem:[#allocation232_spill] sm:$0xff] %v4624_v50  ;;  %7116 = vst [vmem:[#allocation233_spill] sm:$0xff] %v4626_v45  ;;  %v4634_v5 = vadd.f32 %v1431_v40, %v1430_v22  ;;  %v1445_v58 = vrot.slane %v4195_v26, 4  ;;  %v1451_v4 = vrot.slane %v4198_v33, 4  ;;  %v1457_v47 = vrot.slane %v4201_v19, 4  ;;  %v7516_v50 = vld [vmem:[#allocation167_spill] sm:$0xff] }
 0x198   : > { %7117 = vst [vmem:[#allocation234_spill] sm:$0xff] %v4628_v56  ;;  %7118 = vst [vmem:[#allocation235_spill] sm:$0xff] %v4630_v44  ;;  %v1463_v35 = vrot.slane %v4204_v18, 4  ;;  %v1434_v62 = vadd.f32 %v1433_v51, %v4189_v28  ;;  %v1440_v31 = vadd.f32 %v1439_v24, %v4192_v11  ;;  %v1469_v37 = vrot.slane %v4207_v17, 4  ;;  %v7517_v45 = vld [vmem:[#allocation168_spill] sm:$0xff]  ;;  %v7518_v56 = vld [vmem:[#allocation169_spill] sm:$0xff] }
 0x199   : > { %7119 = vst [vmem:[#allocation236_spill] sm:$0xff] %v4632_v34  ;;  %7120 = vst [vmem:[#allocation237_spill] sm:$0xff] %v4634_v5  ;;  %v1475_v9 = vrot.slane %v4210_v14, 4  ;;  %v1446_v2 = vadd.f32 %v1445_v58, %v4195_v26  ;;  %v1452_v30 = vadd.f32 %v1451_v4, %v4198_v33  ;;  %v1458_v53 = vadd.f32 %v1457_v47, %v4201_v19  ;;  %v7519_v44 = vld [vmem:[#allocation170_spill] sm:$0xff]  ;;  %v7520_v34 = vld [vmem:[#allocation171_spill] sm:$0xff] }
 0x19a   : > { %v1464_v25 = vadd.f32 %v1463_v35, %v4204_v18  ;;  %v1435_v43 = vrot.slane %v1434_v62, 2  ;;  %v1441_v15 = vrot.slane %v1440_v31, 2  ;;  %v1470_v21 = vadd.f32 %v1469_v37, %v4207_v17  ;;  %v7521_v5 = vld [vmem:[#allocation172_spill] sm:$0xff] }
 0x19b   : > { %v1476_v28 = vadd.f32 %v1475_v9, %v4210_v14  ;;  %v1447_v22 = vrot.slane %v1446_v2, 2  ;;  %v1453_v11 = vrot.slane %v1452_v30, 2  ;;  %v1459_v42 = vrot.slane %v1458_v53, 2 }
 0x19c   : > { %v1465_v32 = vrot.slane %v1464_v25, 2  ;;  %v1436_v38 = vadd.f32 %v1435_v43, %v1434_v62  ;;  %v1442_v41 = vadd.f32 %v1441_v15, %v1440_v31  ;;  %v1471_v36 = vrot.slane %v1470_v21, 2 }
 0x19d   : > { %v1477_v26 = vrot.slane %v1476_v28, 2  ;;  %v1448_v40 = vadd.f32 %v1447_v22, %v1446_v2  ;;  %v1454_v33 = vadd.f32 %v1453_v11, %v1452_v30  ;;  %v1460_v51 = vadd.f32 %v1459_v42, %v1458_v53 }
 0x19e   : > { %v1466_v19 = vadd.f32 %v1465_v32, %v1464_v25  ;;  %v1437_v24 = vrot.slane %v1436_v38, 1  ;;  %v1443_v18 = vrot.slane %v1442_v41, 1  ;;  %v1472_v58 = vadd.f32 %v1471_v36, %v1470_v21 }
 0x19f   : > { %v1478_v4 = vadd.f32 %v1477_v26, %v1476_v28  ;;  %v1449_v47 = vrot.slane %v1448_v40, 1  ;;  %v1455_v17 = vrot.slane %v1454_v33, 1  ;;  %v1461_v35 = vrot.slane %v1460_v51, 1 }
 0x1a0   : > { %v1467_v14 = vrot.slane %v1466_v19, 1  ;;  %v4652_v37 = vadd.f32 %v1437_v24, %v1436_v38  ;;  %v4654_v9 = vadd.f32 %v1443_v18, %v1442_v41  ;;  %v1473_v62 = vrot.slane %v1472_v58, 1 }
 0x1a1   : > { %v1479_v31 = vrot.slane %v1478_v4, 1  ;;  %v4656_v43 = vadd.f32 %v1449_v47, %v1448_v40  ;;  %v4658_v2 = vadd.f32 %v1455_v17, %v1454_v33  ;;  %v4660_v30 = vadd.f32 %v1461_v35, %v1460_v51 }
 0x1a2   : > { %7121 = vst [vmem:[#allocation238_spill] sm:$0xff] %v4652_v37  ;;  %7122 = vst [vmem:[#allocation239_spill] sm:$0xff] %v4654_v9  ;;  %v4662_v53 = vadd.f32 %v1467_v14, %v1466_v19  ;;  %v4664_v25 = vadd.f32 %v1473_v62, %v1472_v58  ;;  %v1481_v21 = vrot.slane %v4213_v13, 4  ;;  %v1487_v28 = vrot.slane %v4216_v12, 4  ;;  %v7522_v37 = vld [vmem:[#allocation173_spill] sm:$0xff]  ;;  %v7523_v9 = vld [vmem:[#allocation174_spill] sm:$0xff] }
 0x1a3   : > { %7123 = vst [vmem:[#allocation240_spill] sm:$0xff] %v4656_v43  ;;  %7124 = vst [vmem:[#allocation241_spill] sm:$0xff] %v4658_v2  ;;  %v4666_v15 = vadd.f32 %v1479_v31, %v1478_v4  ;;  %v1493_v22 = vrot.slane %v4219_v10, 4  ;;  %v1499_v11 = vrot.slane %v4222_v6, 4  ;;  %v1505_v42 = vrot.slane %v4225_v3, 4 }
 0x1a4   : > { %7125 = vst [vmem:[#allocation242_spill] sm:$0xff] %v4660_v30  ;;  %7126 = vst [vmem:[#allocation243_spill] sm:$0xff] %v4662_v53  ;;  %v1511_v32 = vrot.slane %v4228_v0, 4  ;;  %v1482_v38 = vadd.f32 %v1481_v21, %v4213_v13  ;;  %v1488_v41 = vadd.f32 %v1487_v28, %v4216_v12  ;;  %v1517_v36 = vrot.slane %v4231_v63, 4 }
 0x1a5   : > { %7127 = vst [vmem:[#allocation244_spill] sm:$0xff] %v4664_v25  ;;  %7128 = vst [vmem:[#allocation245_spill] sm:$0xff] %v4666_v15  ;;  %v1523_v26 = vrot.slane %v4234_v55, 4  ;;  %v1494_v40 = vadd.f32 %v1493_v22, %v4219_v10  ;;  %v1500_v33 = vadd.f32 %v1499_v11, %v4222_v6  ;;  %v1506_v51 = vadd.f32 %v1505_v42, %v4225_v3 }
 0x1a6   : > { %v1512_v19 = vadd.f32 %v1511_v32, %v4228_v0  ;;  %v1483_v24 = vrot.slane %v1482_v38, 2  ;;  %v1489_v18 = vrot.slane %v1488_v41, 2  ;;  %v1518_v58 = vadd.f32 %v1517_v36, %v4231_v63 }
 0x1a7   : > { %v1524_v13 = vadd.f32 %v1523_v26, %v4234_v55  ;;  %v1495_v4 = vrot.slane %v1494_v40, 2  ;;  %v1501_v12 = vrot.slane %v1500_v33, 2  ;;  %v1507_v47 = vrot.slane %v1506_v51, 2 }
 0x1a8   : > { %v1513_v17 = vrot.slane %v1512_v19, 2  ;;  %v1484_v35 = vadd.f32 %v1483_v24, %v1482_v38  ;;  %v1490_v14 = vadd.f32 %v1489_v18, %v1488_v41  ;;  %v1519_v62 = vrot.slane %v1518_v58, 2 }
 0x1a9   : > { %v1525_v10 = vrot.slane %v1524_v13, 2  ;;  %v1496_v31 = vadd.f32 %v1495_v4, %v1494_v40  ;;  %v1502_v6 = vadd.f32 %v1501_v12, %v1500_v33  ;;  %v1508_v21 = vadd.f32 %v1507_v47, %v1506_v51  ;;  %v7138_v4 = vld [vmem:[#allocation176_spill] sm:$0xff]  ;;  %v7139_v47 = vld [vmem:[#allocation177_spill] sm:$0xff] }
 0x1aa   : > { %v1514_v3 = vadd.f32 %v1513_v17, %v1512_v19  ;;  %v1485_v28 = vrot.slane %v1484_v35, 1  ;;  %v1491_v0 = vrot.slane %v1490_v14, 1  ;;  %v1520_v22 = vadd.f32 %v1519_v62, %v1518_v58  ;;  %v7137_v58 = vld [vmem:[#allocation175_spill] sm:$0xff] }
 0x1ab   : > { %v1526_v11 = vadd.f32 %v1525_v10, %v1524_v13  ;;  %v1497_v42 = vrot.slane %v1496_v31, 1  ;;  %v1503_v63 = vrot.slane %v1502_v6, 1  ;;  %v1509_v32 = vrot.slane %v1508_v21, 1  ;;  %v7141_v62 = vld [vmem:[#allocation179_spill] sm:$0xff] }
 0x1ac   : > { %v1515_v55 = vrot.slane %v1514_v3, 1  ;;  %v4684_v36 = vadd.f32 %v1485_v28, %v1484_v35  ;;  %v4686_v26 = vadd.f32 %v1491_v0, %v1490_v14  ;;  %v1521_v38 = vrot.slane %v1520_v22, 1  ;;  %v7140_v35 = vld [vmem:[#allocation178_spill] sm:$0xff]  ;;  %v7143_v28 = vld [vmem:[#allocation181_spill] sm:$0xff] }
 0x1ad   : > { %v1527_v41 = vrot.slane %v1526_v11, 1  ;;  %v4688_v24 = vadd.f32 %v1497_v42, %v1496_v31  ;;  %v4690_v40 = vadd.f32 %v1503_v63, %v1502_v6  ;;  %v4692_v33 = vadd.f32 %v1509_v32, %v1508_v21  ;;  %v7142_v31 = vld [vmem:[#allocation180_spill] sm:$0xff] }
 0x1ae   : > { %7129 = vst [vmem:[#allocation246_spill] sm:$0xff] %v4684_v36  ;;  %7130 = vst [vmem:[#allocation247_spill] sm:$0xff] %v4686_v26  ;;  %v4694_v51 = vadd.f32 %v1515_v55, %v1514_v3  ;;  %v4696_v19 = vadd.f32 %v1521_v38, %v1520_v22  ;;  %v1529_v13 = vrot.slane %v7137_v58, 4  ;;  %v1535_v12 = vrot.slane %v7138_v4, 4  ;;  %v7144_v22 = vld [vmem:[#allocation182_spill] sm:$0xff] }
 0x1af   : > { %7131 = vst [vmem:[#allocation248_spill] sm:$0xff] %v4688_v24  ;;  %7132 = vst [vmem:[#allocation249_spill] sm:$0xff] %v4690_v40  ;;  %v4698_v18 = vadd.f32 %v1527_v41, %v1526_v11  ;;  %v1541_v17 = vrot.slane %v7139_v47, 4  ;;  %v1547_v14 = vrot.slane %v7140_v35, 4  ;;  %v1553_v10 = vrot.slane %v7141_v62, 4 }
 0x1b0   : > { %7133 = vst [vmem:[#allocation250_spill] sm:$0xff] %v4692_v33  ;;  %7134 = vst [vmem:[#allocation251_spill] sm:$0xff] %v4694_v51  ;;  %v1559_v6 = vrot.slane %v7142_v31, 4  ;;  %v1530_v21 = vadd.f32 %v1529_v13, %v7137_v58  ;;  %v1536_v3 = vadd.f32 %v1535_v12, %v7138_v4  ;;  %v1565_v0 = vrot.slane %v7143_v28, 4 }
 0x1b1   : > { %7135 = vst [vmem:[#allocation252_spill] sm:$0xff] %v4696_v19  ;;  %7136 = vst [vmem:[#allocation253_spill] sm:$0xff] %v4698_v18  ;;  %v1571_v11 = vrot.slane %v7144_v22, 4  ;;  %v1542_v42 = vadd.f32 %v1541_v17, %v7139_v47  ;;  %v1548_v63 = vadd.f32 %v1547_v14, %v7140_v35  ;;  %v1554_v32 = vadd.f32 %v1553_v10, %v7141_v62 }
 0x1b2   : > { %v1560_v55 = vadd.f32 %v1559_v6, %v7142_v31  ;;  %v1531_v38 = vrot.slane %v1530_v21, 2  ;;  %v1537_v41 = vrot.slane %v1536_v3, 2  ;;  %v1566_v18 = vadd.f32 %v1565_v0, %v7143_v28 }
 0x1b3   : > { %v1572_v58 = vadd.f32 %v1571_v11, %v7144_v22  ;;  %v1543_v13 = vrot.slane %v1542_v42, 2  ;;  %v1549_v4 = vrot.slane %v1548_v63, 2  ;;  %v1555_v12 = vrot.slane %v1554_v32, 2 }
 0x1b4   : > { %v1561_v19 = vrot.slane %v1560_v55, 2  ;;  %v1532_v51 = vadd.f32 %v1531_v38, %v1530_v21  ;;  %v1538_v33 = vadd.f32 %v1537_v41, %v1536_v3  ;;  %v1567_v40 = vrot.slane %v1566_v18, 2 }
 0x1b5   : > { %v1573_v47 = vrot.slane %v1572_v58, 2  ;;  %v1544_v17 = vadd.f32 %v1543_v13, %v1542_v42  ;;  %v1550_v35 = vadd.f32 %v1549_v4, %v1548_v63  ;;  %v1556_v14 = vadd.f32 %v1555_v12, %v1554_v32  ;;  %v7153_v32 = vld [vmem:[#allocation183_spill] sm:$0xff]  ;;  %v7156_v13 = vld [vmem:[#allocation186_spill] sm:$0xff] }
 0x1b6   : > { %v1562_v62 = vadd.f32 %v1561_v19, %v1560_v55  ;;  %v1533_v10 = vrot.slane %v1532_v51, 1  ;;  %v1539_v31 = vrot.slane %v1538_v33, 1  ;;  %v1568_v6 = vadd.f32 %v1567_v40, %v1566_v18 }
 0x1b7   : > { %v1574_v24 = vadd.f32 %v1573_v47, %v1572_v58  ;;  %v1545_v26 = vrot.slane %v1544_v17, 1  ;;  %v1551_v28 = vrot.slane %v1550_v35, 1  ;;  %v1557_v0 = vrot.slane %v1556_v14, 1  ;;  %v7158_v47 = vld [vmem:[#allocation188_spill] sm:$0xff] }
 0x1b8   : > { %v1563_v22 = vrot.slane %v1562_v62, 1  ;;  %v4716_v11 = vadd.f32 %v1533_v10, %v1532_v51  ;;  %v4718_v36 = vadd.f32 %v1539_v31, %v1538_v33  ;;  %v1569_v21 = vrot.slane %v1568_v6, 1  ;;  %v7154_v51 = vld [vmem:[#allocation184_spill] sm:$0xff]  ;;  %v7155_v33 = vld [vmem:[#allocation185_spill] sm:$0xff] }
 0x1b9   : > { %v1575_v3 = vrot.slane %v1574_v24, 1  ;;  %v4720_v38 = vadd.f32 %v1545_v26, %v1544_v17  ;;  %v4722_v42 = vadd.f32 %v1551_v28, %v1550_v35  ;;  %v4724_v63 = vadd.f32 %v1557_v0, %v1556_v14  ;;  %v7157_v26 = vld [vmem:[#allocation187_spill] sm:$0xff] }
 0x1ba   : > { %7145 = vst [vmem:[#allocation175_spill] sm:$0xff] %v4716_v11  ;;  %7146 = vst [vmem:[#allocation176_spill] sm:$0xff] %v4718_v36  ;;  %v4726_v19 = vadd.f32 %v1563_v22, %v1562_v62  ;;  %v4728_v40 = vadd.f32 %v1569_v21, %v1568_v6  ;;  %v1577_v55 = vrot.slane %v7153_v32, 4  ;;  %v1583_v41 = vrot.slane %v7154_v51, 4  ;;  %v7159_v62 = vld [vmem:[#allocation189_spill] sm:$0xff] }
 0x1bb   : > { %7147 = vst [vmem:[#allocation177_spill] sm:$0xff] %v4720_v38  ;;  %7148 = vst [vmem:[#allocation178_spill] sm:$0xff] %v4722_v42  ;;  %v4730_v18 = vadd.f32 %v1575_v3, %v1574_v24  ;;  %v1589_v58 = vrot.slane %v7155_v33, 4  ;;  %v1595_v4 = vrot.slane %v7156_v13, 4  ;;  %v1601_v12 = vrot.slane %v7157_v26, 4  ;;  %v7160_v24 = vld [vmem:[#allocation190_spill] sm:$0xff] }
 0x1bc   : > { %7149 = vst [vmem:[#allocation179_spill] sm:$0xff] %v4724_v63  ;;  %7150 = vst [vmem:[#allocation180_spill] sm:$0xff] %v4726_v19  ;;  %v1607_v17 = vrot.slane %v7158_v47, 4  ;;  %v1578_v35 = vadd.f32 %v1577_v55, %v7153_v32  ;;  %v1584_v14 = vadd.f32 %v1583_v41, %v7154_v51  ;;  %v1613_v10 = vrot.slane %v7159_v62, 4 }
 0x1bd   : > { %7151 = vst [vmem:[#allocation181_spill] sm:$0xff] %v4728_v40  ;;  %7152 = vst [vmem:[#allocation182_spill] sm:$0xff] %v4730_v18  ;;  %v1619_v31 = vrot.slane %v7160_v24, 4  ;;  %v1590_v6 = vadd.f32 %v1589_v58, %v7155_v33  ;;  %v1596_v28 = vadd.f32 %v1595_v4, %v7156_v13  ;;  %v1602_v0 = vadd.f32 %v1601_v12, %v7157_v26 }
 0x1be   : > { %v1608_v22 = vadd.f32 %v1607_v17, %v7158_v47  ;;  %v1579_v21 = vrot.slane %v1578_v35, 2  ;;  %v1585_v3 = vrot.slane %v1584_v14, 2  ;;  %v1614_v18 = vadd.f32 %v1613_v10, %v7159_v62 }
 0x1bf   : > { %v1620_v32 = vadd.f32 %v1619_v31, %v7160_v24  ;;  %v1591_v55 = vrot.slane %v1590_v6, 2  ;;  %v1597_v51 = vrot.slane %v1596_v28, 2  ;;  %v1603_v41 = vrot.slane %v1602_v0, 2 }
 0x1c0   : > { %v1609_v40 = vrot.slane %v1608_v22, 2  ;;  %v1580_v19 = vadd.f32 %v1579_v21, %v1578_v35  ;;  %v1586_v63 = vadd.f32 %v1585_v3, %v1584_v14  ;;  %v1615_v42 = vrot.slane %v1614_v18, 2 }
 0x1c1   : > { %v1621_v33 = vrot.slane %v1620_v32, 2  ;;  %v1592_v58 = vadd.f32 %v1591_v55, %v1590_v6  ;;  %v1598_v13 = vadd.f32 %v1597_v51, %v1596_v28  ;;  %v1604_v4 = vadd.f32 %v1603_v41, %v1602_v0  ;;  %v7169_v0 = vld [vmem:[#allocation191_spill] sm:$0xff]  ;;  %v7172_v55 = vld [vmem:[#allocation194_spill] sm:$0xff] }
 0x1c2   : > { %v1610_v26 = vadd.f32 %v1609_v40, %v1608_v22  ;;  %v1581_v12 = vrot.slane %v1580_v19, 1  ;;  %v1587_v47 = vrot.slane %v1586_v63, 1  ;;  %v1616_v17 = vadd.f32 %v1615_v42, %v1614_v18 }
 0x1c3   : > { %v1622_v38 = vadd.f32 %v1621_v33, %v1620_v32  ;;  %v1593_v36 = vrot.slane %v1592_v58, 1  ;;  %v1599_v62 = vrot.slane %v1598_v13, 1  ;;  %v1605_v10 = vrot.slane %v1604_v4, 1  ;;  %v7174_v33 = vld [vmem:[#allocation196_spill] sm:$0xff] }
 0x1c4   : > { %v1611_v24 = vrot.slane %v1610_v26, 1  ;;  %v4748_v31 = vadd.f32 %v1581_v12, %v1580_v19  ;;  %v4750_v11 = vadd.f32 %v1587_v47, %v1586_v63  ;;  %v1617_v35 = vrot.slane %v1616_v17, 1  ;;  %v7170_v19 = vld [vmem:[#allocation192_spill] sm:$0xff]  ;;  %v7171_v63 = vld [vmem:[#allocation193_spill] sm:$0xff] }
 0x1c5   : > { %v1623_v14 = vrot.slane %v1622_v38, 1  ;;  %v4752_v21 = vadd.f32 %v1593_v36, %v1592_v58  ;;  %v4754_v6 = vadd.f32 %v1599_v62, %v1598_v13  ;;  %v4756_v28 = vadd.f32 %v1605_v10, %v1604_v4  ;;  %v7173_v36 = vld [vmem:[#allocation195_spill] sm:$0xff] }
 0x1c6   : > { %7161 = vst [vmem:[#allocation183_spill] sm:$0xff] %v4748_v31  ;;  %7162 = vst [vmem:[#allocation184_spill] sm:$0xff] %v4750_v11  ;;  %v4758_v40 = vadd.f32 %v1611_v24, %v1610_v26  ;;  %v4760_v42 = vadd.f32 %v1617_v35, %v1616_v17  ;;  %v1625_v22 = vrot.slane %v7169_v0, 4  ;;  %v1631_v3 = vrot.slane %v7170_v19, 4  ;;  %v7175_v26 = vld [vmem:[#allocation197_spill] sm:$0xff] }
 0x1c7   : > { %7163 = vst [vmem:[#allocation185_spill] sm:$0xff] %v4752_v21  ;;  %7164 = vst [vmem:[#allocation186_spill] sm:$0xff] %v4754_v6  ;;  %v4762_v18 = vadd.f32 %v1623_v14, %v1622_v38  ;;  %v1637_v32 = vrot.slane %v7171_v63, 4  ;;  %v1643_v51 = vrot.slane %v7172_v55, 4  ;;  %v1649_v41 = vrot.slane %v7173_v36, 4  ;;  %v7176_v38 = vld [vmem:[#allocation198_spill] sm:$0xff] }
 0x1c8   : > { %7165 = vst [vmem:[#allocation187_spill] sm:$0xff] %v4756_v28  ;;  %7166 = vst [vmem:[#allocation188_spill] sm:$0xff] %v4758_v40  ;;  %v1655_v58 = vrot.slane %v7174_v33, 4  ;;  %v1626_v13 = vadd.f32 %v1625_v22, %v7169_v0  ;;  %v1632_v4 = vadd.f32 %v1631_v3, %v7170_v19  ;;  %v1661_v12 = vrot.slane %v7175_v26, 4 }
 0x1c9   : > { %7167 = vst [vmem:[#allocation189_spill] sm:$0xff] %v4760_v42  ;;  %7168 = vst [vmem:[#allocation190_spill] sm:$0xff] %v4762_v18  ;;  %v1667_v47 = vrot.slane %v7176_v38, 4  ;;  %v1638_v17 = vadd.f32 %v1637_v32, %v7171_v63  ;;  %v1644_v62 = vadd.f32 %v1643_v51, %v7172_v55  ;;  %v1650_v10 = vadd.f32 %v1649_v41, %v7173_v36 }
 0x1ca   : > { %v1656_v24 = vadd.f32 %v1655_v58, %v7174_v33  ;;  %v1627_v35 = vrot.slane %v1626_v13, 2  ;;  %v1633_v14 = vrot.slane %v1632_v4, 2  ;;  %v1662_v18 = vadd.f32 %v1661_v12, %v7175_v26 }
 0x1cb   : > { %v1668_v0 = vadd.f32 %v1667_v47, %v7176_v38  ;;  %v1639_v22 = vrot.slane %v1638_v17, 2  ;;  %v1645_v19 = vrot.slane %v1644_v62, 2  ;;  %v1651_v3 = vrot.slane %v1650_v10, 2 }
 0x1cc   : > { %v1657_v42 = vrot.slane %v1656_v24, 2  ;;  %v1628_v40 = vadd.f32 %v1627_v35, %v1626_v13  ;;  %v1634_v28 = vadd.f32 %v1633_v14, %v1632_v4  ;;  %v1663_v6 = vrot.slane %v1662_v18, 2 }
 0x1cd   : > { %v1669_v63 = vrot.slane %v1668_v0, 2  ;;  %v1640_v32 = vadd.f32 %v1639_v22, %v1638_v17  ;;  %v1646_v55 = vadd.f32 %v1645_v19, %v1644_v62  ;;  %v1652_v51 = vadd.f32 %v1651_v3, %v1650_v10  ;;  %v7185_v10 = vld [vmem:[#allocation199_spill] sm:$0xff]  ;;  %v7188_v22 = vld [vmem:[#allocation202_spill] sm:$0xff] }
 0x1ce   : > { %v1658_v36 = vadd.f32 %v1657_v42, %v1656_v24  ;;  %v1629_v41 = vrot.slane %v1628_v40, 1  ;;  %v1635_v33 = vrot.slane %v1634_v28, 1  ;;  %v1664_v58 = vadd.f32 %v1663_v6, %v1662_v18 }
 0x1cf   : > { %v1670_v21 = vadd.f32 %v1669_v63, %v1668_v0  ;;  %v1641_v11 = vrot.slane %v1640_v32, 1  ;;  %v1647_v26 = vrot.slane %v1646_v55, 1  ;;  %v1653_v12 = vrot.slane %v1652_v51, 1  ;;  %v7190_v63 = vld [vmem:[#allocation204_spill] sm:$0xff] }
 0x1d0   : > { %v1659_v38 = vrot.slane %v1658_v36, 1  ;;  %v4780_v47 = vadd.f32 %v1629_v41, %v1628_v40  ;;  %v4782_v31 = vadd.f32 %v1635_v33, %v1634_v28  ;;  %v1665_v13 = vrot.slane %v1664_v58, 1  ;;  %v7186_v40 = vld [vmem:[#allocation200_spill] sm:$0xff]  ;;  %v7187_v28 = vld [vmem:[#allocation201_spill] sm:$0xff] }
 0x1d1   : > { %v1671_v4 = vrot.slane %v1670_v21, 1  ;;  %v4784_v35 = vadd.f32 %v1641_v11, %v1640_v32  ;;  %v4786_v17 = vadd.f32 %v1647_v26, %v1646_v55  ;;  %v4788_v62 = vadd.f32 %v1653_v12, %v1652_v51  ;;  %v7189_v11 = vld [vmem:[#allocation203_spill] sm:$0xff] }
 0x1d2   : > { %7177 = vst [vmem:[#allocation191_spill] sm:$0xff] %v4780_v47  ;;  %7178 = vst [vmem:[#allocation192_spill] sm:$0xff] %v4782_v31  ;;  %v4790_v42 = vadd.f32 %v1659_v38, %v1658_v36  ;;  %v4792_v6 = vadd.f32 %v1665_v13, %v1664_v58  ;;  %v1673_v24 = vrot.slane %v7185_v10, 4  ;;  %v1679_v14 = vrot.slane %v7186_v40, 4  ;;  %v7191_v36 = vld [vmem:[#allocation205_spill] sm:$0xff] }
 0x1d3   : > { %7179 = vst [vmem:[#allocation193_spill] sm:$0xff] %v4784_v35  ;;  %7180 = vst [vmem:[#allocation194_spill] sm:$0xff] %v4786_v17  ;;  %v4794_v18 = vadd.f32 %v1671_v4, %v1670_v21  ;;  %v1685_v0 = vrot.slane %v7187_v28, 4  ;;  %v1691_v19 = vrot.slane %v7188_v22, 4  ;;  %v1697_v3 = vrot.slane %v7189_v11, 4  ;;  %v7192_v21 = vld [vmem:[#allocation206_spill] sm:$0xff] }
 0x1d4   : > { %7181 = vst [vmem:[#allocation195_spill] sm:$0xff] %v4788_v62  ;;  %7182 = vst [vmem:[#allocation196_spill] sm:$0xff] %v4790_v42  ;;  %v1703_v32 = vrot.slane %v7190_v63, 4  ;;  %v1674_v55 = vadd.f32 %v1673_v24, %v7185_v10  ;;  %v1680_v51 = vadd.f32 %v1679_v14, %v7186_v40  ;;  %v1709_v41 = vrot.slane %v7191_v36, 4 }
 0x1d5   : > { %7183 = vst [vmem:[#allocation197_spill] sm:$0xff] %v4792_v6  ;;  %7184 = vst [vmem:[#allocation198_spill] sm:$0xff] %v4794_v18  ;;  %v1715_v33 = vrot.slane %v7192_v21, 4  ;;  %v1686_v58 = vadd.f32 %v1685_v0, %v7187_v28  ;;  %v1692_v26 = vadd.f32 %v1691_v19, %v7188_v22  ;;  %v1698_v12 = vadd.f32 %v1697_v3, %v7189_v11 }
 0x1d6   : > { %v1704_v38 = vadd.f32 %v1703_v32, %v7190_v63  ;;  %v1675_v13 = vrot.slane %v1674_v55, 2  ;;  %v1681_v4 = vrot.slane %v1680_v51, 2  ;;  %v1710_v18 = vadd.f32 %v1709_v41, %v7191_v36 }
 0x1d7   : > { %v1716_v10 = vadd.f32 %v1715_v33, %v7192_v21  ;;  %v1687_v24 = vrot.slane %v1686_v58, 2  ;;  %v1693_v40 = vrot.slane %v1692_v26, 2  ;;  %v1699_v14 = vrot.slane %v1698_v12, 2 }
 0x1d8   : > { %v1705_v6 = vrot.slane %v1704_v38, 2  ;;  %v1676_v42 = vadd.f32 %v1675_v13, %v1674_v55  ;;  %v1682_v62 = vadd.f32 %v1681_v4, %v1680_v51  ;;  %v1711_v17 = vrot.slane %v1710_v18, 2 }
 0x1d9   : > { %v1717_v28 = vrot.slane %v1716_v10, 2  ;;  %v1688_v0 = vadd.f32 %v1687_v24, %v1686_v58  ;;  %v1694_v22 = vadd.f32 %v1693_v40, %v1692_v26  ;;  %v1700_v19 = vadd.f32 %v1699_v14, %v1698_v12  ;;  %v7201_v12 = vld [vmem:[#allocation207_spill] sm:$0xff]  ;;  %v7204_v24 = vld [vmem:[#allocation210_spill] sm:$0xff] }
 0x1da   : > { %v1706_v11 = vadd.f32 %v1705_v6, %v1704_v38  ;;  %v1677_v3 = vrot.slane %v1676_v42, 1  ;;  %v1683_v63 = vrot.slane %v1682_v62, 1  ;;  %v1712_v32 = vadd.f32 %v1711_v17, %v1710_v18 }
 0x1db   : > { %v1718_v35 = vadd.f32 %v1717_v28, %v1716_v10  ;;  %v1689_v31 = vrot.slane %v1688_v0, 1  ;;  %v1695_v36 = vrot.slane %v1694_v22, 1  ;;  %v1701_v41 = vrot.slane %v1700_v19, 1  ;;  %v7206_v28 = vld [vmem:[#allocation212_spill] sm:$0xff] }
 0x1dc   : > { %v1707_v21 = vrot.slane %v1706_v11, 1  ;;  %v4812_v33 = vadd.f32 %v1677_v3, %v1676_v42  ;;  %v4814_v47 = vadd.f32 %v1683_v63, %v1682_v62  ;;  %v1713_v55 = vrot.slane %v1712_v32, 1  ;;  %v7202_v42 = vld [vmem:[#allocation208_spill] sm:$0xff]  ;;  %v7203_v62 = vld [vmem:[#allocation209_spill] sm:$0xff] }
 0x1dd   : > { %v1719_v51 = vrot.slane %v1718_v35, 1  ;;  %v4816_v13 = vadd.f32 %v1689_v31, %v1688_v0  ;;  %v4818_v58 = vadd.f32 %v1695_v36, %v1694_v22  ;;  %v4820_v26 = vadd.f32 %v1701_v41, %v1700_v19  ;;  %v7205_v31 = vld [vmem:[#allocation211_spill] sm:$0xff] }
 0x1de   : > { %7193 = vst [vmem:[#allocation199_spill] sm:$0xff] %v4812_v33  ;;  %7194 = vst [vmem:[#allocation200_spill] sm:$0xff] %v4814_v47  ;;  %v4822_v6 = vadd.f32 %v1707_v21, %v1706_v11  ;;  %v4824_v17 = vadd.f32 %v1713_v55, %v1712_v32  ;;  %v1721_v38 = vrot.slane %v7201_v12, 4  ;;  %v1727_v4 = vrot.slane %v7202_v42, 4  ;;  %v7207_v11 = vld [vmem:[#allocation213_spill] sm:$0xff] }
 0x1df   : > { %7195 = vst [vmem:[#allocation201_spill] sm:$0xff] %v4816_v13  ;;  %7196 = vst [vmem:[#allocation202_spill] sm:$0xff] %v4818_v58  ;;  %v4826_v18 = vadd.f32 %v1719_v51, %v1718_v35  ;;  %v1733_v10 = vrot.slane %v7203_v62, 4  ;;  %v1739_v40 = vrot.slane %v7204_v24, 4  ;;  %v1745_v14 = vrot.slane %v7205_v31, 4  ;;  %v7208_v35 = vld [vmem:[#allocation214_spill] sm:$0xff] }
 0x1e0   : > { %7197 = vst [vmem:[#allocation203_spill] sm:$0xff] %v4820_v26  ;;  %7198 = vst [vmem:[#allocation204_spill] sm:$0xff] %v4822_v6  ;;  %v1751_v0 = vrot.slane %v7206_v28, 4  ;;  %v1722_v22 = vadd.f32 %v1721_v38, %v7201_v12  ;;  %v1728_v19 = vadd.f32 %v1727_v4, %v7202_v42  ;;  %v1757_v3 = vrot.slane %v7207_v11, 4 }
 0x1e1   : > { %7199 = vst [vmem:[#allocation205_spill] sm:$0xff] %v4824_v17  ;;  %7200 = vst [vmem:[#allocation206_spill] sm:$0xff] %v4826_v18  ;;  %v1763_v63 = vrot.slane %v7208_v35, 4  ;;  %v1734_v32 = vadd.f32 %v1733_v10, %v7203_v62  ;;  %v1740_v36 = vadd.f32 %v1739_v40, %v7204_v24  ;;  %v1746_v41 = vadd.f32 %v1745_v14, %v7205_v31 }
 0x1e2   : > { %v1752_v21 = vadd.f32 %v1751_v0, %v7206_v28  ;;  %v1723_v55 = vrot.slane %v1722_v22, 2  ;;  %v1729_v51 = vrot.slane %v1728_v19, 2  ;;  %v1758_v18 = vadd.f32 %v1757_v3, %v7207_v11 }
 0x1e3   : > { %v1764_v12 = vadd.f32 %v1763_v63, %v7208_v35  ;;  %v1735_v38 = vrot.slane %v1734_v32, 2  ;;  %v1741_v42 = vrot.slane %v1740_v36, 2  ;;  %v1747_v4 = vrot.slane %v1746_v41, 2 }
 0x1e4   : > { %v1753_v17 = vrot.slane %v1752_v21, 2  ;;  %v1724_v6 = vadd.f32 %v1723_v55, %v1722_v22  ;;  %v1730_v26 = vadd.f32 %v1729_v51, %v1728_v19  ;;  %v1759_v58 = vrot.slane %v1758_v18, 2 }
 0x1e5   : > { %v1765_v62 = vrot.slane %v1764_v12, 2  ;;  %v1736_v10 = vadd.f32 %v1735_v38, %v1734_v32  ;;  %v1742_v24 = vadd.f32 %v1741_v42, %v1740_v36  ;;  %v1748_v40 = vadd.f32 %v1747_v4, %v1746_v41  ;;  %v7217_v41 = vld [vmem:[#allocation215_spill] sm:$0xff]  ;;  %v7220_v38 = vld [vmem:[#allocation218_spill] sm:$0xff] }
 0x1e6   : > { %v1754_v31 = vadd.f32 %v1753_v17, %v1752_v21  ;;  %v1725_v14 = vrot.slane %v1724_v6, 1  ;;  %v1731_v28 = vrot.slane %v1730_v26, 1  ;;  %v1760_v0 = vadd.f32 %v1759_v58, %v1758_v18 }
 0x1e7   : > { %v1766_v13 = vadd.f32 %v1765_v62, %v1764_v12  ;;  %v1737_v47 = vrot.slane %v1736_v10, 1  ;;  %v1743_v11 = vrot.slane %v1742_v24, 1  ;;  %v1749_v3 = vrot.slane %v1748_v40, 1  ;;  %v7222_v62 = vld [vmem:[#allocation220_spill] sm:$0xff] }
 0x1e8   : > { %v1755_v35 = vrot.slane %v1754_v31, 1  ;;  %v4844_v63 = vadd.f32 %v1725_v14, %v1724_v6  ;;  %v4846_v33 = vadd.f32 %v1731_v28, %v1730_v26  ;;  %v1761_v22 = vrot.slane %v1760_v0, 1  ;;  %v7218_v6 = vld [vmem:[#allocation216_spill] sm:$0xff]  ;;  %v7219_v26 = vld [vmem:[#allocation217_spill] sm:$0xff] }
 0x1e9   : > { %v1767_v19 = vrot.slane %v1766_v13, 1  ;;  %v4848_v55 = vadd.f32 %v1737_v47, %v1736_v10  ;;  %v4850_v32 = vadd.f32 %v1743_v11, %v1742_v24  ;;  %v4852_v36 = vadd.f32 %v1749_v3, %v1748_v40  ;;  %v7221_v47 = vld [vmem:[#allocation219_spill] sm:$0xff] }
 0x1ea   : > { %7209 = vst [vmem:[#allocation207_spill] sm:$0xff] %v4844_v63  ;;  %7210 = vst [vmem:[#allocation208_spill] sm:$0xff] %v4846_v33  ;;  %v4854_v17 = vadd.f32 %v1755_v35, %v1754_v31  ;;  %v4856_v58 = vadd.f32 %v1761_v22, %v1760_v0  ;;  %v1769_v21 = vrot.slane %v7217_v41, 4  ;;  %v1775_v51 = vrot.slane %v7218_v6, 4  ;;  %v7223_v31 = vld [vmem:[#allocation221_spill] sm:$0xff] }
 0x1eb   : > { %7211 = vst [vmem:[#allocation209_spill] sm:$0xff] %v4848_v55  ;;  %7212 = vst [vmem:[#allocation210_spill] sm:$0xff] %v4850_v32  ;;  %v4858_v18 = vadd.f32 %v1767_v19, %v1766_v13  ;;  %v1781_v12 = vrot.slane %v7219_v26, 4  ;;  %v1787_v42 = vrot.slane %v7220_v38, 4  ;;  %v1793_v4 = vrot.slane %v7221_v47, 4  ;;  %v7224_v13 = vld [vmem:[#allocation222_spill] sm:$0xff] }
 0x1ec   : > { %7213 = vst [vmem:[#allocation211_spill] sm:$0xff] %v4852_v36  ;;  %7214 = vst [vmem:[#allocation212_spill] sm:$0xff] %v4854_v17  ;;  %v1799_v10 = vrot.slane %v7222_v62, 4  ;;  %v1770_v24 = vadd.f32 %v1769_v21, %v7217_v41  ;;  %v1776_v40 = vadd.f32 %v1775_v51, %v7218_v6  ;;  %v1805_v14 = vrot.slane %v7223_v31, 4 }
 0x1ed   : > { %7215 = vst [vmem:[#allocation213_spill] sm:$0xff] %v4856_v58  ;;  %7216 = vst [vmem:[#allocation214_spill] sm:$0xff] %v4858_v18  ;;  %v1811_v28 = vrot.slane %v7224_v13, 4  ;;  %v1782_v0 = vadd.f32 %v1781_v12, %v7219_v26  ;;  %v1788_v11 = vadd.f32 %v1787_v42, %v7220_v38  ;;  %v1794_v3 = vadd.f32 %v1793_v4, %v7221_v47 }
 0x1ee   : > { %v1800_v35 = vadd.f32 %v1799_v10, %v7222_v62  ;;  %v1771_v22 = vrot.slane %v1770_v24, 2  ;;  %v1777_v19 = vrot.slane %v1776_v40, 2  ;;  %v1806_v18 = vadd.f32 %v1805_v14, %v7223_v31 }
 0x1ef   : > { %v1812_v41 = vadd.f32 %v1811_v28, %v7224_v13  ;;  %v1783_v21 = vrot.slane %v1782_v0, 2  ;;  %v1789_v6 = vrot.slane %v1788_v11, 2  ;;  %v1795_v51 = vrot.slane %v1794_v3, 2 }
 0x1f0   : > { %v1801_v58 = vrot.slane %v1800_v35, 2  ;;  %v1772_v17 = vadd.f32 %v1771_v22, %v1770_v24  ;;  %v1778_v36 = vadd.f32 %v1777_v19, %v1776_v40  ;;  %v1807_v32 = vrot.slane %v1806_v18, 2 }
 0x1f1   : > { %v1813_v26 = vrot.slane %v1812_v41, 2  ;;  %v1784_v12 = vadd.f32 %v1783_v21, %v1782_v0  ;;  %v1790_v38 = vadd.f32 %v1789_v6, %v1788_v11  ;;  %v1796_v42 = vadd.f32 %v1795_v51, %v1794_v3  ;;  %v7233_v3 = vld [vmem:[#allocation58_spill] sm:$0xff]  ;;  %v7236_v21 = vld [vmem:[#allocation61_spill] sm:$0xff] }
 0x1f2   : > { %v1802_v47 = vadd.f32 %v1801_v58, %v1800_v35  ;;  %v1773_v4 = vrot.slane %v1772_v17, 1  ;;  %v1779_v62 = vrot.slane %v1778_v36, 1  ;;  %v1808_v10 = vadd.f32 %v1807_v32, %v1806_v18 }
 0x1f3   : > { %v1814_v55 = vadd.f32 %v1813_v26, %v1812_v41  ;;  %v1785_v33 = vrot.slane %v1784_v12, 1  ;;  %v1791_v31 = vrot.slane %v1790_v38, 1  ;;  %v1797_v14 = vrot.slane %v1796_v42, 1  ;;  %v7238_v26 = vld [vmem:[#allocation63_spill] sm:$0xff] }
 0x1f4   : > { %v1803_v13 = vrot.slane %v1802_v47, 1  ;;  %v4876_v28 = vadd.f32 %v1773_v4, %v1772_v17  ;;  %v4878_v63 = vadd.f32 %v1779_v62, %v1778_v36  ;;  %v1809_v24 = vrot.slane %v1808_v10, 1  ;;  %v7234_v17 = vld [vmem:[#allocation59_spill] sm:$0xff]  ;;  %v7235_v36 = vld [vmem:[#allocation60_spill] sm:$0xff] }
 0x1f5   : > { %v1815_v40 = vrot.slane %v1814_v55, 1  ;;  %v4880_v22 = vadd.f32 %v1785_v33, %v1784_v12  ;;  %v4882_v0 = vadd.f32 %v1791_v31, %v1790_v38  ;;  %v4884_v11 = vadd.f32 %v1797_v14, %v1796_v42  ;;  %v7237_v33 = vld [vmem:[#allocation62_spill] sm:$0xff] }
 0x1f6   : > { %7225 = vst [vmem:[#allocation215_spill] sm:$0xff] %v4876_v28  ;;  %7226 = vst [vmem:[#allocation216_spill] sm:$0xff] %v4878_v63  ;;  %v4886_v58 = vadd.f32 %v1803_v13, %v1802_v47  ;;  %v4888_v32 = vadd.f32 %v1809_v24, %v1808_v10  ;;  %v1817_v35 = vrot.slane %v7233_v3, 4  ;;  %v1823_v19 = vrot.slane %v7234_v17, 4  ;;  %v7239_v47 = vld [vmem:[#allocation67_spill] sm:$0xff] }
 0x1f7   : > { %7227 = vst [vmem:[#allocation217_spill] sm:$0xff] %v4880_v22  ;;  %7228 = vst [vmem:[#allocation218_spill] sm:$0xff] %v4882_v0  ;;  %v4890_v18 = vadd.f32 %v1815_v40, %v1814_v55  ;;  %v1829_v41 = vrot.slane %v7235_v36, 4  ;;  %v1835_v6 = vrot.slane %v7236_v21, 4  ;;  %v1841_v51 = vrot.slane %v7237_v33, 4  ;;  %v7240_v55 = vld [vmem:[#allocation71_spill] sm:$0xff] }
 0x1f8   : > { %7229 = vst [vmem:[#allocation219_spill] sm:$0xff] %v4884_v11  ;;  %7230 = vst [vmem:[#allocation220_spill] sm:$0xff] %v4886_v58  ;;  %v1847_v12 = vrot.slane %v7238_v26, 4  ;;  %v1818_v38 = vadd.f32 %v1817_v35, %v7233_v3  ;;  %v1824_v42 = vadd.f32 %v1823_v19, %v7234_v17  ;;  %v1853_v4 = vrot.slane %v7239_v47, 4 }
 0x1f9   : > { %7231 = vst [vmem:[#allocation221_spill] sm:$0xff] %v4888_v32  ;;  %7232 = vst [vmem:[#allocation222_spill] sm:$0xff] %v4890_v18  ;;  %v1859_v62 = vrot.slane %v7240_v55, 4  ;;  %v1830_v10 = vadd.f32 %v1829_v41, %v7235_v36  ;;  %v1836_v31 = vadd.f32 %v1835_v6, %v7236_v21  ;;  %v1842_v14 = vadd.f32 %v1841_v51, %v7237_v33 }
 0x1fa   : > { %v1848_v13 = vadd.f32 %v1847_v12, %v7238_v26  ;;  %v1819_v24 = vrot.slane %v1818_v38, 2  ;;  %v1825_v40 = vrot.slane %v1824_v42, 2  ;;  %v1854_v18 = vadd.f32 %v1853_v4, %v7239_v47 }
 0x1fb   : > { %v1860_v3 = vadd.f32 %v1859_v62, %v7240_v55  ;;  %v1831_v35 = vrot.slane %v1830_v10, 2  ;;  %v1837_v17 = vrot.slane %v1836_v31, 2  ;;  %v1843_v19 = vrot.slane %v1842_v14, 2 }
 0x1fc   : > { %v1849_v32 = vrot.slane %v1848_v13, 2  ;;  %v1820_v58 = vadd.f32 %v1819_v24, %v1818_v38  ;;  %v1826_v11 = vadd.f32 %v1825_v40, %v1824_v42  ;;  %v1855_v0 = vrot.slane %v1854_v18, 2 }
 0x1fd   : > { %v1861_v36 = vrot.slane %v1860_v3, 2  ;;  %v1832_v41 = vadd.f32 %v1831_v35, %v1830_v10  ;;  %v1838_v21 = vadd.f32 %v1837_v17, %v1836_v31  ;;  %v1844_v6 = vadd.f32 %v1843_v19, %v1842_v14  ;;  %v7249_v14 = vld [vmem:[#allocation74_spill] sm:$0xff]  ;;  %v7252_v35 = vld [vmem:[#allocation77_spill] sm:$0xff] }
 0x1fe   : > { %v1850_v33 = vadd.f32 %v1849_v32, %v1848_v13  ;;  %v1821_v51 = vrot.slane %v1820_v58, 1  ;;  %v1827_v26 = vrot.slane %v1826_v11, 1  ;;  %v1856_v12 = vadd.f32 %v1855_v0, %v1854_v18 }
 0x1ff   : > { %v1862_v22 = vadd.f32 %v1861_v36, %v1860_v3  ;;  %v1833_v63 = vrot.slane %v1832_v41, 1  ;;  %v1839_v47 = vrot.slane %v1838_v21, 1  ;;  %v1845_v4 = vrot.slane %v1844_v6, 1  ;;  %v7254_v36 = vld [vmem:[#allocation79_spill] sm:$0xff] }
 0x200   : > { %v1851_v55 = vrot.slane %v1850_v33, 1  ;;  %v4908_v62 = vadd.f32 %v1821_v51, %v1820_v58  ;;  %v4910_v28 = vadd.f32 %v1827_v26, %v1826_v11  ;;  %v1857_v38 = vrot.slane %v1856_v12, 1  ;;  %v7250_v58 = vld [vmem:[#allocation75_spill] sm:$0xff]  ;;  %v7251_v11 = vld [vmem:[#allocation76_spill] sm:$0xff] }
 0x201   : > { %v1863_v42 = vrot.slane %v1862_v22, 1  ;;  %v4912_v24 = vadd.f32 %v1833_v63, %v1832_v41  ;;  %v4914_v10 = vadd.f32 %v1839_v47, %v1838_v21  ;;  %v4916_v31 = vadd.f32 %v1845_v4, %v1844_v6  ;;  %v7253_v63 = vld [vmem:[#allocation78_spill] sm:$0xff] }
 0x202   : > { %7241 = vst [vmem:[#allocation58_spill] sm:$0xff] %v4908_v62  ;;  %7242 = vst [vmem:[#allocation59_spill] sm:$0xff] %v4910_v28  ;;  %v4918_v32 = vadd.f32 %v1851_v55, %v1850_v33  ;;  %v4920_v0 = vadd.f32 %v1857_v38, %v1856_v12  ;;  %v1865_v13 = vrot.slane %v7249_v14, 4  ;;  %v1871_v40 = vrot.slane %v7250_v58, 4  ;;  %v7255_v33 = vld [vmem:[#allocation83_spill] sm:$0xff] }
 0x203   : > { %7243 = vst [vmem:[#allocation60_spill] sm:$0xff] %v4912_v24  ;;  %7244 = vst [vmem:[#allocation61_spill] sm:$0xff] %v4914_v10  ;;  %v4922_v18 = vadd.f32 %v1863_v42, %v1862_v22  ;;  %v1877_v3 = vrot.slane %v7251_v11, 4  ;;  %v1883_v17 = vrot.slane %v7252_v35, 4  ;;  %v1889_v19 = vrot.slane %v7253_v63, 4  ;;  %v7256_v22 = vld [vmem:[#allocation87_spill] sm:$0xff] }
 0x204   : > { %7245 = vst [vmem:[#allocation62_spill] sm:$0xff] %v4916_v31  ;;  %7246 = vst [vmem:[#allocation63_spill] sm:$0xff] %v4918_v32  ;;  %v1895_v41 = vrot.slane %v7254_v36, 4  ;;  %v1866_v21 = vadd.f32 %v1865_v13, %v7249_v14  ;;  %v1872_v6 = vadd.f32 %v1871_v40, %v7250_v58  ;;  %v1901_v51 = vrot.slane %v7255_v33, 4 }
 0x205   : > { %7247 = vst [vmem:[#allocation67_spill] sm:$0xff] %v4920_v0  ;;  %7248 = vst [vmem:[#allocation71_spill] sm:$0xff] %v4922_v18  ;;  %v1907_v26 = vrot.slane %v7256_v22, 4  ;;  %v1878_v12 = vadd.f32 %v1877_v3, %v7251_v11  ;;  %v1884_v47 = vadd.f32 %v1883_v17, %v7252_v35  ;;  %v1890_v4 = vadd.f32 %v1889_v19, %v7253_v63 }
 0x206   : > { %v1896_v55 = vadd.f32 %v1895_v41, %v7254_v36  ;;  %v1867_v38 = vrot.slane %v1866_v21, 2  ;;  %v1873_v42 = vrot.slane %v1872_v6, 2  ;;  %v1902_v18 = vadd.f32 %v1901_v51, %v7255_v33 }
 0x207   : > { %v1908_v14 = vadd.f32 %v1907_v26, %v7256_v22  ;;  %v1879_v13 = vrot.slane %v1878_v12, 2  ;;  %v1885_v58 = vrot.slane %v1884_v47, 2  ;;  %v1891_v40 = vrot.slane %v1890_v4, 2 }
 0x208   : > { %v1897_v0 = vrot.slane %v1896_v55, 2  ;;  %v1868_v32 = vadd.f32 %v1867_v38, %v1866_v21  ;;  %v1874_v31 = vadd.f32 %v1873_v42, %v1872_v6  ;;  %v1903_v10 = vrot.slane %v1902_v18, 2 }
 0x209   : > { %v1909_v11 = vrot.slane %v1908_v14, 2  ;;  %v1880_v3 = vadd.f32 %v1879_v13, %v1878_v12  ;;  %v1886_v35 = vadd.f32 %v1885_v58, %v1884_v47  ;;  %v1892_v17 = vadd.f32 %v1891_v40, %v1890_v4  ;;  %v7265_v4 = vld [vmem:[#allocation90_spill] sm:$0xff]  ;;  %v7268_v13 = vld [vmem:[#allocation93_spill] sm:$0xff] }
 0x20a   : > { %v1898_v63 = vadd.f32 %v1897_v0, %v1896_v55  ;;  %v1869_v19 = vrot.slane %v1868_v32, 1  ;;  %v1875_v36 = vrot.slane %v1874_v31, 1  ;;  %v1904_v41 = vadd.f32 %v1903_v10, %v1902_v18 }
 0x20b   : > { %v1910_v24 = vadd.f32 %v1909_v11, %v1908_v14  ;;  %v1881_v28 = vrot.slane %v1880_v3, 1  ;;  %v1887_v33 = vrot.slane %v1886_v35, 1  ;;  %v1893_v51 = vrot.slane %v1892_v17, 1  ;;  %v7270_v11 = vld [vmem:[#allocation95_spill] sm:$0xff] }
 0x20c   : > { %v1899_v22 = vrot.slane %v1898_v63, 1  ;;  %v4940_v26 = vadd.f32 %v1869_v19, %v1868_v32  ;;  %v4942_v62 = vadd.f32 %v1875_v36, %v1874_v31  ;;  %v1905_v21 = vrot.slane %v1904_v41, 1  ;;  %v7266_v32 = vld [vmem:[#allocation91_spill] sm:$0xff]  ;;  %v7267_v31 = vld [vmem:[#allocation92_spill] sm:$0xff] }
 0x20d   : > { %v1911_v6 = vrot.slane %v1910_v24, 1  ;;  %v4944_v38 = vadd.f32 %v1881_v28, %v1880_v3  ;;  %v4946_v12 = vadd.f32 %v1887_v33, %v1886_v35  ;;  %v4948_v47 = vadd.f32 %v1893_v51, %v1892_v17  ;;  %v7269_v28 = vld [vmem:[#allocation94_spill] sm:$0xff] }
 0x20e   : > { %7257 = vst [vmem:[#allocation74_spill] sm:$0xff] %v4940_v26  ;;  %7258 = vst [vmem:[#allocation75_spill] sm:$0xff] %v4942_v62  ;;  %v4950_v0 = vadd.f32 %v1899_v22, %v1898_v63  ;;  %v4952_v10 = vadd.f32 %v1905_v21, %v1904_v41  ;;  %v1913_v55 = vrot.slane %v7265_v4, 4  ;;  %v1919_v42 = vrot.slane %v7266_v32, 4  ;;  %v7271_v63 = vld [vmem:[#allocation99_spill] sm:$0xff] }
 0x20f   : > { %7259 = vst [vmem:[#allocation76_spill] sm:$0xff] %v4944_v38  ;;  %7260 = vst [vmem:[#allocation77_spill] sm:$0xff] %v4946_v12  ;;  %v4954_v18 = vadd.f32 %v1911_v6, %v1910_v24  ;;  %v1925_v14 = vrot.slane %v7267_v31, 4  ;;  %v1931_v58 = vrot.slane %v7268_v13, 4  ;;  %v1937_v40 = vrot.slane %v7269_v28, 4  ;;  %v7272_v24 = vld [vmem:[#allocation103_spill] sm:$0xff] }
 0x210   : > { %7261 = vst [vmem:[#allocation78_spill] sm:$0xff] %v4948_v47  ;;  %7262 = vst [vmem:[#allocation79_spill] sm:$0xff] %v4950_v0  ;;  %v1943_v3 = vrot.slane %v7270_v11, 4  ;;  %v1914_v35 = vadd.f32 %v1913_v55, %v7265_v4  ;;  %v1920_v17 = vadd.f32 %v1919_v42, %v7266_v32  ;;  %v1949_v19 = vrot.slane %v7271_v63, 4 }
 0x211   : > { %7263 = vst [vmem:[#allocation83_spill] sm:$0xff] %v4952_v10  ;;  %7264 = vst [vmem:[#allocation87_spill] sm:$0xff] %v4954_v18  ;;  %v1955_v36 = vrot.slane %v7272_v24, 4  ;;  %v1926_v41 = vadd.f32 %v1925_v14, %v7267_v31  ;;  %v1932_v33 = vadd.f32 %v1931_v58, %v7268_v13  ;;  %v1938_v51 = vadd.f32 %v1937_v40, %v7269_v28 }
 0x212   : > { %v1944_v22 = vadd.f32 %v1943_v3, %v7270_v11  ;;  %v1915_v21 = vrot.slane %v1914_v35, 2  ;;  %v1921_v6 = vrot.slane %v1920_v17, 2  ;;  %v1950_v18 = vadd.f32 %v1949_v19, %v7271_v63 }
 0x213   : > { %v1956_v4 = vadd.f32 %v1955_v36, %v7272_v24  ;;  %v1927_v55 = vrot.slane %v1926_v41, 2  ;;  %v1933_v32 = vrot.slane %v1932_v33, 2  ;;  %v1939_v42 = vrot.slane %v1938_v51, 2 }
 0x214   : > { %v1945_v10 = vrot.slane %v1944_v22, 2  ;;  %v1916_v0 = vadd.f32 %v1915_v21, %v1914_v35  ;;  %v1922_v47 = vadd.f32 %v1921_v6, %v1920_v17  ;;  %v1951_v12 = vrot.slane %v1950_v18, 2 }
 0x215   : > { %v1957_v31 = vrot.slane %v1956_v4, 2  ;;  %v1928_v14 = vadd.f32 %v1927_v55, %v1926_v41  ;;  %v1934_v13 = vadd.f32 %v1933_v32, %v1932_v33  ;;  %v1940_v58 = vadd.f32 %v1939_v42, %v1938_v51  ;;  %v7281_v51 = vld [vmem:[#allocation106_spill] sm:$0xff]  ;;  %v7284_v55 = vld [vmem:[#allocation109_spill] sm:$0xff] }
 0x216   : > { %v1946_v28 = vadd.f32 %v1945_v10, %v1944_v22  ;;  %v1917_v40 = vrot.slane %v1916_v0, 1  ;;  %v1923_v11 = vrot.slane %v1922_v47, 1  ;;  %v1952_v3 = vadd.f32 %v1951_v12, %v1950_v18 }
 0x217   : > { %v1958_v38 = vadd.f32 %v1957_v31, %v1956_v4  ;;  %v1929_v62 = vrot.slane %v1928_v14, 1  ;;  %v1935_v63 = vrot.slane %v1934_v13, 1  ;;  %v1941_v19 = vrot.slane %v1940_v58, 1  ;;  %v7286_v31 = vld [vmem:[#allocation111_spill] sm:$0xff] }
 0x218   : > { %v1947_v24 = vrot.slane %v1946_v28, 1  ;;  %v4972_v36 = vadd.f32 %v1917_v40, %v1916_v0  ;;  %v4974_v26 = vadd.f32 %v1923_v11, %v1922_v47  ;;  %v1953_v35 = vrot.slane %v1952_v3, 1  ;;  %v7282_v0 = vld [vmem:[#allocation107_spill] sm:$0xff]  ;;  %v7283_v47 = vld [vmem:[#allocation108_spill] sm:$0xff] }
 0x219   : > { %v1959_v17 = vrot.slane %v1958_v38, 1  ;;  %v4976_v21 = vadd.f32 %v1929_v62, %v1928_v14  ;;  %v4978_v41 = vadd.f32 %v1935_v63, %v1934_v13  ;;  %v4980_v33 = vadd.f32 %v1941_v19, %v1940_v58  ;;  %v7285_v62 = vld [vmem:[#allocation110_spill] sm:$0xff] }
 0x21a   : > { %7273 = vst [vmem:[#allocation90_spill] sm:$0xff] %v4972_v36  ;;  %7274 = vst [vmem:[#allocation91_spill] sm:$0xff] %v4974_v26  ;;  %v4982_v10 = vadd.f32 %v1947_v24, %v1946_v28  ;;  %v4984_v12 = vadd.f32 %v1953_v35, %v1952_v3  ;;  %v1961_v22 = vrot.slane %v7281_v51, 4  ;;  %v1967_v6 = vrot.slane %v7282_v0, 4  ;;  %v7287_v28 = vld [vmem:[#allocation115_spill] sm:$0xff] }
 0x21b   : > { %7275 = vst [vmem:[#allocation92_spill] sm:$0xff] %v4976_v21  ;;  %7276 = vst [vmem:[#allocation93_spill] sm:$0xff] %v4978_v41  ;;  %v4986_v18 = vadd.f32 %v1959_v17, %v1958_v38  ;;  %v1973_v4 = vrot.slane %v7283_v47, 4  ;;  %v1979_v32 = vrot.slane %v7284_v55, 4  ;;  %v1985_v42 = vrot.slane %v7285_v62, 4  ;;  %v7288_v38 = vld [vmem:[#allocation119_spill] sm:$0xff] }
 0x21c   : > { %7277 = vst [vmem:[#allocation94_spill] sm:$0xff] %v4980_v33  ;;  %7278 = vst [vmem:[#allocation95_spill] sm:$0xff] %v4982_v10  ;;  %v1991_v14 = vrot.slane %v7286_v31, 4  ;;  %v1962_v13 = vadd.f32 %v1961_v22, %v7281_v51  ;;  %v1968_v58 = vadd.f32 %v1967_v6, %v7282_v0  ;;  %v1997_v40 = vrot.slane %v7287_v28, 4 }
 0x21d   : > { %7279 = vst [vmem:[#allocation99_spill] sm:$0xff] %v4984_v12  ;;  %7280 = vst [vmem:[#allocation103_spill] sm:$0xff] %v4986_v18  ;;  %v2003_v11 = vrot.slane %v7288_v38, 4  ;;  %v1974_v3 = vadd.f32 %v1973_v4, %v7283_v47  ;;  %v1980_v63 = vadd.f32 %v1979_v32, %v7284_v55  ;;  %v1986_v19 = vadd.f32 %v1985_v42, %v7285_v62 }
 0x21e   : > { %v1992_v24 = vadd.f32 %v1991_v14, %v7286_v31  ;;  %v1963_v35 = vrot.slane %v1962_v13, 2  ;;  %v1969_v17 = vrot.slane %v1968_v58, 2  ;;  %v1998_v18 = vadd.f32 %v1997_v40, %v7287_v28 }
 0x21f   : > { %v2004_v51 = vadd.f32 %v2003_v11, %v7288_v38  ;;  %v1975_v22 = vrot.slane %v1974_v3, 2  ;;  %v1981_v0 = vrot.slane %v1980_v63, 2  ;;  %v1987_v6 = vrot.slane %v1986_v19, 2 }
 0x220   : > { %v1993_v12 = vrot.slane %v1992_v24, 2  ;;  %v1964_v10 = vadd.f32 %v1963_v35, %v1962_v13  ;;  %v1970_v33 = vadd.f32 %v1969_v17, %v1968_v58  ;;  %v1999_v41 = vrot.slane %v1998_v18, 2 }
 0x221   : > { %v2005_v47 = vrot.slane %v2004_v51, 2  ;;  %v1976_v4 = vadd.f32 %v1975_v22, %v1974_v3  ;;  %v1982_v55 = vadd.f32 %v1981_v0, %v1980_v63  ;;  %v1988_v32 = vadd.f32 %v1987_v6, %v1986_v19  ;;  %v7297_v19 = vld [vmem:[#allocation122_spill] sm:$0xff]  ;;  %v7300_v22 = vld [vmem:[#allocation125_spill] sm:$0xff] }
 0x222   : > { %v1994_v62 = vadd.f32 %v1993_v12, %v1992_v24  ;;  %v1965_v42 = vrot.slane %v1964_v10, 1  ;;  %v1971_v31 = vrot.slane %v1970_v33, 1  ;;  %v2000_v14 = vadd.f32 %v1999_v41, %v1998_v18 }
 0x223   : > { %v2006_v21 = vadd.f32 %v2005_v47, %v2004_v51  ;;  %v1977_v26 = vrot.slane %v1976_v4, 1  ;;  %v1983_v28 = vrot.slane %v1982_v55, 1  ;;  %v1989_v40 = vrot.slane %v1988_v32, 1  ;;  %v7302_v47 = vld [vmem:[#allocation127_spill] sm:$0xff] }
 0x224   : > { %v1995_v38 = vrot.slane %v1994_v62, 1  ;;  %v5004_v11 = vadd.f32 %v1965_v42, %v1964_v10  ;;  %v5006_v36 = vadd.f32 %v1971_v31, %v1970_v33  ;;  %v2001_v13 = vrot.slane %v2000_v14, 1  ;;  %v7298_v10 = vld [vmem:[#allocation123_spill] sm:$0xff]  ;;  %v7299_v33 = vld [vmem:[#allocation124_spill] sm:$0xff] }
 0x225   : > { %v2007_v58 = vrot.slane %v2006_v21, 1  ;;  %v5008_v35 = vadd.f32 %v1977_v26, %v1976_v4  ;;  %v5010_v3 = vadd.f32 %v1983_v28, %v1982_v55  ;;  %v5012_v63 = vadd.f32 %v1989_v40, %v1988_v32  ;;  %v7301_v26 = vld [vmem:[#allocation126_spill] sm:$0xff] }
 0x226   : > { %7289 = vst [vmem:[#allocation106_spill] sm:$0xff] %v5004_v11  ;;  %7290 = vst [vmem:[#allocation107_spill] sm:$0xff] %v5006_v36  ;;  %v5014_v12 = vadd.f32 %v1995_v38, %v1994_v62  ;;  %v5016_v41 = vadd.f32 %v2001_v13, %v2000_v14  ;;  %v2009_v24 = vrot.slane %v7297_v19, 4  ;;  %v2015_v17 = vrot.slane %v7298_v10, 4  ;;  %v7303_v62 = vld [vmem:[#allocation131_spill] sm:$0xff] }
 0x227   : > { %7291 = vst [vmem:[#allocation108_spill] sm:$0xff] %v5008_v35  ;;  %7292 = vst [vmem:[#allocation109_spill] sm:$0xff] %v5010_v3  ;;  %v5018_v18 = vadd.f32 %v2007_v58, %v2006_v21  ;;  %v2021_v51 = vrot.slane %v7299_v33, 4  ;;  %v2027_v0 = vrot.slane %v7300_v22, 4  ;;  %v2033_v6 = vrot.slane %v7301_v26, 4  ;;  %v7304_v21 = vld [vmem:[#allocation223_spill] sm:$0xff] }
 0x228   : > { %7293 = vst [vmem:[#allocation110_spill] sm:$0xff] %v5012_v63  ;;  %7294 = vst [vmem:[#allocation111_spill] sm:$0xff] %v5014_v12  ;;  %v2039_v4 = vrot.slane %v7302_v47, 4  ;;  %v2010_v55 = vadd.f32 %v2009_v24, %v7297_v19  ;;  %v2016_v32 = vadd.f32 %v2015_v17, %v7298_v10  ;;  %v2045_v42 = vrot.slane %v7303_v62, 4 }
 0x229   : > { %7295 = vst [vmem:[#allocation115_spill] sm:$0xff] %v5016_v41  ;;  %7296 = vst [vmem:[#allocation119_spill] sm:$0xff] %v5018_v18  ;;  %v2051_v31 = vrot.slane %v7304_v21, 4  ;;  %v2022_v14 = vadd.f32 %v2021_v51, %v7299_v33  ;;  %v2028_v28 = vadd.f32 %v2027_v0, %v7300_v22  ;;  %v2034_v40 = vadd.f32 %v2033_v6, %v7301_v26 }
 0x22a   : > { %v2040_v38 = vadd.f32 %v2039_v4, %v7302_v47  ;;  %v2011_v13 = vrot.slane %v2010_v55, 2  ;;  %v2017_v58 = vrot.slane %v2016_v32, 2  ;;  %v2046_v18 = vadd.f32 %v2045_v42, %v7303_v62 }
 0x22b   : > { %v2052_v19 = vadd.f32 %v2051_v31, %v7304_v21  ;;  %v2023_v24 = vrot.slane %v2022_v14, 2  ;;  %v2029_v10 = vrot.slane %v2028_v28, 2  ;;  %v2035_v17 = vrot.slane %v2034_v40, 2 }
 0x22c   : > { %v2041_v41 = vrot.slane %v2040_v38, 2  ;;  %v2012_v12 = vadd.f32 %v2011_v13, %v2010_v55  ;;  %v2018_v63 = vadd.f32 %v2017_v58, %v2016_v32  ;;  %v2047_v3 = vrot.slane %v2046_v18, 2  ;;  %v7310_v58 = vld [vmem:[#allocation139_spill] sm:$0xff] }
 0x22d   : > { %v2053_v33 = vrot.slane %v2052_v19, 2  ;;  %v2024_v51 = vadd.f32 %v2023_v24, %v2022_v14  ;;  %v2030_v22 = vadd.f32 %v2029_v10, %v2028_v28  ;;  %v2036_v0 = vadd.f32 %v2035_v17, %v2034_v40  ;;  %v7308_v40 = vld [vmem:[#allocation137_spill] sm:$0xff]  ;;  %v7327_v17 = vld [vmem:[#allocation156_spill] sm:$0xff] }
 0x22e   : > { %v2042_v26 = vadd.f32 %v2041_v41, %v2040_v38  ;;  %v2013_v6 = vrot.slane %v2012_v12, 1  ;;  %v2019_v47 = vrot.slane %v2018_v63, 1  ;;  %v2048_v4 = vadd.f32 %v2047_v3, %v2046_v18  ;;  %v7312_v10 = vld [vmem:[#allocation141_spill] sm:$0xff]  ;;  %v7330_v38 = vld [vmem:[#allocation159_spill] sm:$0xff] }
 0x22f   : > { %v2054_v35 = vadd.f32 %v2053_v33, %v2052_v19  ;;  %v2025_v36 = vrot.slane %v2024_v51, 1  ;;  %v2031_v62 = vrot.slane %v2030_v22, 1  ;;  %v2037_v42 = vrot.slane %v2036_v0, 1  ;;  %v7311_v19 = vld [vmem:[#allocation140_spill] sm:$0xff]  ;;  %v7313_v33 = vld [vmem:[#allocation142_spill] sm:$0xff]  ;;  %v7328_v24 = vld [vmem:[#allocation157_spill] sm:$0xff] }
 0x230   : > { %v2043_v21 = vrot.slane %v2042_v26, 1  ;;  %v5036_v31 = vadd.f32 %v2013_v6, %v2012_v12  ;;  %v5038_v11 = vadd.f32 %v2019_v47, %v2018_v63  ;;  %v2049_v55 = vrot.slane %v2048_v4, 1  ;;  %v7309_v63 = vld [vmem:[#allocation138_spill] sm:$0xff]  ;;  %v7316_v6 = vld [vmem:[#allocation145_spill] sm:$0xff]  ;;  %v7323_v47 = vld [vmem:[#allocation152_spill] sm:$0xff] }
 0x231   : > { %v2055_v32 = vrot.slane %v2054_v35, 1  ;;  %v5040_v13 = vadd.f32 %v2025_v36, %v2024_v51  ;;  %v5042_v14 = vadd.f32 %v2031_v62, %v2030_v22  ;;  %v5044_v28 = vadd.f32 %v2037_v42, %v2036_v0  ;;  %v7315_v0 = vld [vmem:[#allocation144_spill] sm:$0xff]  ;;  %v7318_v42 = vld [vmem:[#allocation147_spill] sm:$0xff]  ;;  %v7320_v51 = vld [vmem:[#allocation149_spill] sm:$0xff] }
 0x232   : > { %7305 = vst [vmem:[#allocation122_spill] sm:$0xff] %v5036_v31  ;;  %7306 = vst [vmem:[#allocation123_spill] sm:$0xff] %v5038_v11  ;;  %v5046_v41 = vadd.f32 %v2043_v21, %v2042_v26  ;;  %v5048_v3 = vadd.f32 %v2049_v55, %v2048_v4  ;;  %v7317_v4 = vld [vmem:[#allocation146_spill] sm:$0xff]  ;;  %v7319_v55 = vld [vmem:[#allocation148_spill] sm:$0xff]  ;;  %v7524_v43 = vsub.f32 %v7308_v40, %v4556_v39 }
 0x233   : > { %v5050_v18 = vadd.f32 %v2055_v32, %v2054_v35  ;;  %v7314_v35 = vld [vmem:[#allocation143_spill] sm:$0xff]  ;;  %v7321_v22 = vld [vmem:[#allocation150_spill] sm:$0xff]  ;;  %v7324_v62 = vld [vmem:[#allocation153_spill] sm:$0xff]  ;;  %v7525_v30 = vsub.f32 %v7309_v63, %v4558_v48  ;;  %v7526_v53 = vsub.f32 %v7310_v58, %v4560_v59  ;;  %v7527_v15 = vsub.f32 %v7311_v19, %v4562_v23 }
 0x234   : > { %7307 = vst [vmem:[#allocation124_spill] sm:$0xff] %v5048_v3  ;;  %v7322_v26 = vld [vmem:[#allocation151_spill] sm:$0xff]  ;;  %v7325_v21 = vld [vmem:[#allocation154_spill] sm:$0xff]  ;;  %v7331_v12 = vld [vmem:[#allocation160_spill] sm:$0xff]  ;;  %v5311_v11 = vmul.f32 0.5, %v7524_v43  ;;  %v7528_v39 = vsub.f32 %v7312_v10, %v4564_v52  ;;  %v7529_v48 = vsub.f32 %v7313_v33, %v4566_v49  ;;  %v7530_v59 = vsub.f32 %v7314_v35, %v4568_v60 }
 0x235   : > { %v7326_v32 = vld [vmem:[#allocation155_spill] sm:$0xff]  ;;  %v7329_v36 = vld [vmem:[#allocation158_spill] sm:$0xff]  ;;  %v5316_v2 = vmul.f32 0.5, %v7525_v30  ;;  %v5321_v25 = vmul.f32 0.5, %v7526_v53  ;;  %v5326_v3 = vmul.f32 0.5, %v7527_v15  ;;  %v7531_v23 = vsub.f32 %v7315_v0, %v4570_v46  ;;  %v7534_v58 = vld [vmem:[#allocation224_spill] sm:$0xff] }
 0x236   : > { %v5331_v43 = vmul.f32 0.5, %v7528_v39  ;;  %v5336_v30 = vmul.f32 0.5, %v7529_v48  ;;  %v5341_v53 = vmul.f32 0.5, %v7530_v59  ;;  %v7532_v52 = vsub.f32 %v7316_v6, %v4588_v61  ;;  %v7536_v10 = vld [vmem:[#allocation225_spill] sm:$0xff]  ;;  %v7538_v35 = vld [vmem:[#allocation226_spill] sm:$0xff]  ;;  %v7540_v6 = vld [vmem:[#allocation227_spill] sm:$0xff] }
 0x237   : > { %v5346_v15 = vmul.f32 0.5, %v7531_v23  ;;  %v7533_v49 = vsub.f32 %v7317_v4, %v4590_v1  ;;  %v7535_v60 = vsub.f32 %v7318_v42, %v7534_v58  ;;  %v7537_v46 = vsub.f32 %v7319_v55, %v7536_v10  ;;  %v7542_v39 = vld [vmem:[#allocation228_spill] sm:$0xff]  ;;  %v7544_v59 = vld [vmem:[#allocation229_spill] sm:$0xff]  ;;  %v7549_v58 = vld [vmem:[#allocation231_spill] sm:$0xff] }
 0x238   : > { %v5351_v40 = vmul.f32 0.5, %v7532_v52  ;;  %v7539_v61 = vsub.f32 %v7320_v51, %v7538_v35  ;;  %v7541_v1 = vsub.f32 %v7321_v22, %v7540_v6  ;;  %v7543_v42 = vsub.f32 %v7322_v26, %v7542_v39  ;;  %v7547_v52 = vld [vmem:[#allocation230_spill] sm:$0xff]  ;;  %v7551_v10 = vld [vmem:[#allocation232_spill] sm:$0xff]  ;;  %v7553_v35 = vld [vmem:[#allocation233_spill] sm:$0xff] }
 0x239   : > { %v5356_v63 = vmul.f32 0.5, %v7533_v49  ;;  %v5361_v19 = vmul.f32 0.5, %v7535_v60  ;;  %v5366_v33 = vmul.f32 0.5, %v7537_v46  ;;  %v7545_v55 = vsub.f32 %v7323_v47, %v7544_v59  ;;  %v7555_v6 = vld [vmem:[#allocation234_spill] sm:$0xff]  ;;  %v7557_v39 = vld [vmem:[#allocation235_spill] sm:$0xff]  ;;  %v7560_v59 = vld [vmem:[#allocation236_spill] sm:$0xff] }
 0x23a   : > { %v5371_v0 = vmul.f32 0.5, %v7539_v61  ;;  %v5376_v4 = vmul.f32 0.5, %v7541_v1  ;;  %v5381_v48 = vmul.f32 0.5, %v7543_v42  ;;  %v7548_v51 = vsub.f32 %v7324_v62, %v7547_v52  ;;  %v7563_v52 = vld [vmem:[#allocation237_spill] sm:$0xff]  ;;  %v7582_v31 = vld [vmem:[#allocation243_spill] sm:$0xff] }
 0x23b   : > { %v5386_v23 = vmul.f32 0.5, %v7545_v55  ;;  %v7550_v22 = vsub.f32 %v7325_v21, %v7549_v58  ;;  %v7552_v26 = vsub.f32 %v7326_v32, %v7551_v10  ;;  %v7554_v47 = vsub.f32 %v7327_v17, %v7553_v35  ;;  %v7566_v58 = vld [vmem:[#allocation161_spill] sm:$0xff]  ;;  %v7570_v35 = vld [vmem:[#allocation239_spill] sm:$0xff] }
 0x23c   : > { %v5391_v49 = vmul.f32 0.5, %v7548_v51  ;;  %v7556_v62 = vsub.f32 %v7328_v24, %v7555_v6  ;;  %v7558_v21 = vsub.f32 %v7329_v36, %v7557_v39  ;;  %v7561_v32 = vsub.f32 %v7330_v38, %v7560_v59  ;;  %v7572_v6 = vld [vmem:[#allocation163_spill] sm:$0xff]  ;;  %v7576_v59 = vld [vmem:[#allocation241_spill] sm:$0xff] }
 0x23d   : > { %7546 = vst [vmem:[#allocation125_spill] sm:$0xff] %v5386_v23  ;;  %v5396_v60 = vmul.f32 0.5, %v7550_v22  ;;  %v5401_v46 = vmul.f32 0.5, %v7552_v26  ;;  %v5406_v61 = vmul.f32 0.5, %v7554_v47  ;;  %v7564_v17 = vsub.f32 %v7331_v12, %v7563_v52  ;;  %v7567_v22 = vld [vmem:[#allocation238_spill] sm:$0xff]  ;;  %v7578_v52 = vld [vmem:[#allocation165_spill] sm:$0xff] }
 0x23e   : > { %v5411_v1 = vmul.f32 0.5, %v7556_v62  ;;  %v5416_v42 = vmul.f32 0.5, %v7558_v21  ;;  %v5421_v55 = vmul.f32 0.5, %v7561_v32  ;;  %v7568_v24 = vsub.f32 %v7566_v58, %v7567_v22  ;;  %v7569_v26 = vld [vmem:[#allocation162_spill] sm:$0xff]  ;;  %v7573_v62 = vld [vmem:[#allocation240_spill] sm:$0xff] }
 0x23f   : > { %v5426_v51 = vmul.f32 0.5, %v7564_v17  ;;  %v7571_v36 = vsub.f32 %v7569_v26, %v7570_v35  ;;  %v7574_v38 = vsub.f32 %v7572_v6, %v7573_v62  ;;  %v7575_v21 = vld [vmem:[#allocation164_spill] sm:$0xff]  ;;  %v7579_v17 = vld [vmem:[#allocation242_spill] sm:$0xff] }
 0x240   : > { %7559 = vst [vmem:[#allocation126_spill] sm:$0xff] %v5416_v42  ;;  %7562 = vst [vmem:[#allocation127_spill] sm:$0xff] %v5421_v55  ;;  %v5431_v10 = vmul.f32 0.5, %v7568_v24  ;;  %v7577_v12 = vsub.f32 %v7575_v21, %v7576_v59  ;;  %v7580_v58 = vsub.f32 %v7578_v52, %v7579_v17  ;;  %v7581_v24 = vld [vmem:[#allocation166_spill] sm:$0xff]  ;;  %v7590_v55 = vld [vmem:[#allocation245_spill] sm:$0xff] }
 0x241   : > { %7565 = vst [vmem:[#allocation131_spill] sm:$0xff] %v5426_v51  ;;  %v5436_v47 = vmul.f32 0.5, %v7571_v36  ;;  %v5441_v39 = vmul.f32 0.5, %v7574_v38  ;;  %v7583_v26 = vsub.f32 %v7581_v24, %v7582_v31  ;;  %v7585_v36 = vld [vmem:[#allocation8_spill] sm:$0xff]  ;;  %v7589_v38 = vld [vmem:[#allocation9_spill] sm:$0xff]  ;;  %v7594_v23 = vld [vmem:[#allocation246_spill] sm:$0xff] }
 0x242   : > { %v5446_v32 = vmul.f32 0.5, %v7577_v12  ;;  %v5451_v22 = vmul.f32 0.5, %v7580_v58  ;;  %v7586_v51 = vld [vmem:[#allocation244_spill] sm:$0xff]  ;;  %v7591_v21 = vsub.f32 %v7589_v38, %v7590_v55  ;;  %v7593_v12 = vld [vmem:[#allocation10_spill] sm:$0xff]  ;;  %v7597_v58 = vld [vmem:[#allocation11_spill] sm:$0xff] }
 0x243   : > { %v5456_v35 = vmul.f32 0.5, %v7583_v26  ;;  %v7587_v6 = vsub.f32 %v7585_v36, %v7586_v51  ;;  %v7595_v52 = vsub.f32 %v7593_v12, %v7594_v23  ;;  %v7598_v42 = vld [vmem:[#allocation247_spill] sm:$0xff]  ;;  %v7601_v26 = vld [vmem:[#allocation12_spill] sm:$0xff] }
 0x244   : > { %v5466_v59 = vmul.f32 0.5, %v7591_v21  ;;  %v7599_v31 = vsub.f32 %v7597_v58, %v7598_v42  ;;  %v7609_v21 = vld [vmem:[#allocation14_spill] sm:$0xff] }
 0x245   : > { %7584 = vst [vmem:[#allocation223_spill] sm:$0xff] %v5456_v35  ;;  %v5461_v62 = vmul.f32 0.5, %v7587_v6  ;;  %v5471_v17 = vmul.f32 0.5, %v7595_v52  ;;  %v7602_v35 = vld [vmem:[#allocation248_spill] sm:$0xff]  ;;  %v7605_v6 = vld [vmem:[#allocation13_spill] sm:$0xff]  ;;  %v7613_v52 = vld [vmem:[#allocation15_spill] sm:$0xff] }
 0x246   : > { %7592 = vst [vmem:[#allocation138_spill] sm:$0xff] %v5466_v59  ;;  %v5476_v24 = vmul.f32 0.5, %v7599_v31  ;;  %v7603_v51 = vsub.f32 %v7601_v26, %v7602_v35  ;;  %v7610_v59 = vld [vmem:[#allocation250_spill] sm:$0xff]  ;;  %v7617_v31 = vld [vmem:[#allocation16_spill] sm:$0xff] }
 0x247   : > { %7588 = vst [vmem:[#allocation137_spill] sm:$0xff] %v5461_v62  ;;  %7596 = vst [vmem:[#allocation139_spill] sm:$0xff] %v5471_v17  ;;  %v7606_v62 = vld [vmem:[#allocation249_spill] sm:$0xff]  ;;  %v7611_v23 = vsub.f32 %v7609_v21, %v7610_v59  ;;  %v7614_v17 = vld [vmem:[#allocation251_spill] sm:$0xff] }
 0x248   : > { %7600 = vst [vmem:[#allocation140_spill] sm:$0xff] %v5476_v24  ;;  %v5481_v36 = vmul.f32 0.5, %v7603_v51  ;;  %v7607_v55 = vsub.f32 %v7605_v6, %v7606_v62  ;;  %v7615_v42 = vsub.f32 %v7613_v52, %v7614_v17  ;;  %v7618_v24 = vld [vmem:[#allocation252_spill] sm:$0xff]  ;;  %v7621_v51 = vld [vmem:[#allocation17_spill] sm:$0xff] }
 0x249   : > { %v5491_v12 = vmul.f32 0.5, %v7611_v23  ;;  %v7619_v35 = vsub.f32 %v7617_v31, %v7618_v24  ;;  %v7629_v23 = vld [vmem:[#allocation19_spill] sm:$0xff] }
 0x24a   : > { %7604 = vst [vmem:[#allocation141_spill] sm:$0xff] %v5481_v36  ;;  %v5486_v38 = vmul.f32 0.5, %v7607_v55  ;;  %v5496_v58 = vmul.f32 0.5, %v7615_v42  ;;  %v7622_v36 = vld [vmem:[#allocation253_spill] sm:$0xff]  ;;  %v7625_v55 = vld [vmem:[#allocation18_spill] sm:$0xff]  ;;  %v7633_v42 = vld [vmem:[#allocation20_spill] sm:$0xff] }
 0x24b   : > { %7612 = vst [vmem:[#allocation143_spill] sm:$0xff] %v5491_v12  ;;  %v5501_v26 = vmul.f32 0.5, %v7619_v35  ;;  %v7623_v62 = vsub.f32 %v7621_v51, %v7622_v36  ;;  %v7630_v12 = vld [vmem:[#allocation176_spill] sm:$0xff]  ;;  %v7637_v35 = vld [vmem:[#allocation21_spill] sm:$0xff] }
 0x24c   : > { %7608 = vst [vmem:[#allocation142_spill] sm:$0xff] %v5486_v38  ;;  %7616 = vst [vmem:[#allocation144_spill] sm:$0xff] %v5496_v58  ;;  %v7626_v38 = vld [vmem:[#allocation175_spill] sm:$0xff]  ;;  %v7631_v17 = vsub.f32 %v7629_v23, %v7630_v12  ;;  %v7634_v58 = vld [vmem:[#allocation177_spill] sm:$0xff] }
 0x24d   : > { %7620 = vst [vmem:[#allocation145_spill] sm:$0xff] %v5501_v26  ;;  %v5506_v6 = vmul.f32 0.5, %v7623_v62  ;;  %v7627_v59 = vsub.f32 %v7625_v55, %v7626_v38  ;;  %v7635_v24 = vsub.f32 %v7633_v42, %v7634_v58  ;;  %v7638_v26 = vld [vmem:[#allocation178_spill] sm:$0xff] }
 0x24e   : > { %v5516_v52 = vmul.f32 0.5, %v7631_v17  ;;  %v7639_v36 = vsub.f32 %v7637_v35, %v7638_v26  ;;  %v7641_v62 = vld [vmem:[#allocation22_spill] sm:$0xff]  ;;  %v7649_v17 = vld [vmem:[#allocation24_spill] sm:$0xff] }
 0x24f   : > { %7624 = vst [vmem:[#allocation146_spill] sm:$0xff] %v5506_v6  ;;  %v5511_v21 = vmul.f32 0.5, %v7627_v59  ;;  %v5521_v31 = vmul.f32 0.5, %v7635_v24  ;;  %v7642_v6 = vld [vmem:[#allocation179_spill] sm:$0xff]  ;;  %v7653_v24 = vld [vmem:[#allocation25_spill] sm:$0xff] }
 0x250   : > { %7632 = vst [vmem:[#allocation148_spill] sm:$0xff] %v5516_v52  ;;  %v5526_v51 = vmul.f32 0.5, %v7639_v36  ;;  %v7643_v38 = vsub.f32 %v7641_v62, %v7642_v6  ;;  %v7645_v59 = vld [vmem:[#allocation23_spill] sm:$0xff]  ;;  %v7650_v52 = vld [vmem:[#allocation181_spill] sm:$0xff]  ;;  %v7657_v36 = vld [vmem:[#allocation26_spill] sm:$0xff] }
 0x251   : > { %7628 = vst [vmem:[#allocation147_spill] sm:$0xff] %v5511_v21  ;;  %7636 = vst [vmem:[#allocation149_spill] sm:$0xff] %v5521_v31  ;;  %v7646_v21 = vld [vmem:[#allocation180_spill] sm:$0xff]  ;;  %v7651_v58 = vsub.f32 %v7649_v17, %v7650_v52  ;;  %v7654_v31 = vld [vmem:[#allocation182_spill] sm:$0xff] }
 0x252   : > { %7640 = vst [vmem:[#allocation150_spill] sm:$0xff] %v5526_v51  ;;  %v5531_v55 = vmul.f32 0.5, %v7643_v38  ;;  %v7647_v12 = vsub.f32 %v7645_v59, %v7646_v21  ;;  %v7655_v26 = vsub.f32 %v7653_v24, %v7654_v31  ;;  %v7658_v51 = vld [vmem:[#allocation183_spill] sm:$0xff] }
 0x253   : > { %v5541_v42 = vmul.f32 0.5, %v7651_v58  ;;  %v7659_v6 = vsub.f32 %v7657_v36, %v7658_v51  ;;  %v7661_v38 = vld [vmem:[#allocation27_spill] sm:$0xff]  ;;  %v7669_v58 = vld [vmem:[#allocation29_spill] sm:$0xff] }
 0x254   : > { %7644 = vst [vmem:[#allocation151_spill] sm:$0xff] %v5531_v55  ;;  %v5536_v23 = vmul.f32 0.5, %v7647_v12  ;;  %v5546_v35 = vmul.f32 0.5, %v7655_v26  ;;  %v7662_v55 = vld [vmem:[#allocation184_spill] sm:$0xff]  ;;  %v7673_v26 = vld [vmem:[#allocation30_spill] sm:$0xff] }
 0x255   : > { %7652 = vst [vmem:[#allocation153_spill] sm:$0xff] %v5541_v42  ;;  %v5551_v62 = vmul.f32 0.5, %v7659_v6  ;;  %v7663_v21 = vsub.f32 %v7661_v38, %v7662_v55  ;;  %v7665_v12 = vld [vmem:[#allocation28_spill] sm:$0xff]  ;;  %v7670_v42 = vld [vmem:[#allocation186_spill] sm:$0xff]  ;;  %v7677_v6 = vld [vmem:[#allocation31_spill] sm:$0xff] }
 0x256   : > { %7648 = vst [vmem:[#allocation152_spill] sm:$0xff] %v5536_v23  ;;  %7656 = vst [vmem:[#allocation154_spill] sm:$0xff] %v5546_v35  ;;  %v7666_v23 = vld [vmem:[#allocation185_spill] sm:$0xff]  ;;  %v7671_v31 = vsub.f32 %v7669_v58, %v7670_v42  ;;  %v7674_v35 = vld [vmem:[#allocation187_spill] sm:$0xff] }
 0x257   : > { %7660 = vst [vmem:[#allocation155_spill] sm:$0xff] %v5551_v62  ;;  %v5556_v59 = vmul.f32 0.5, %v7663_v21  ;;  %v7667_v52 = vsub.f32 %v7665_v12, %v7666_v23  ;;  %v7675_v51 = vsub.f32 %v7673_v26, %v7674_v35  ;;  %v7678_v62 = vld [vmem:[#allocation188_spill] sm:$0xff] }
 0x258   : > { %v5566_v24 = vmul.f32 0.5, %v7671_v31  ;;  %v7679_v55 = vsub.f32 %v7677_v6, %v7678_v62  ;;  %v7681_v21 = vld [vmem:[#allocation32_spill] sm:$0xff]  ;;  %v7689_v31 = vld [vmem:[#allocation34_spill] sm:$0xff] }
 0x259   : > { %7664 = vst [vmem:[#allocation156_spill] sm:$0xff] %v5556_v59  ;;  %v5561_v17 = vmul.f32 0.5, %v7667_v52  ;;  %v5571_v36 = vmul.f32 0.5, %v7675_v51  ;;  %v7682_v59 = vld [vmem:[#allocation189_spill] sm:$0xff]  ;;  %v7693_v51 = vld [vmem:[#allocation35_spill] sm:$0xff] }
 0x25a   : > { %7672 = vst [vmem:[#allocation158_spill] sm:$0xff] %v5566_v24  ;;  %v5576_v38 = vmul.f32 0.5, %v7679_v55  ;;  %v7683_v23 = vsub.f32 %v7681_v21, %v7682_v59  ;;  %v7685_v52 = vld [vmem:[#allocation33_spill] sm:$0xff]  ;;  %v7690_v24 = vld [vmem:[#allocation191_spill] sm:$0xff]  ;;  %v7697_v55 = vld [vmem:[#allocation36_spill] sm:$0xff] }
 0x25b   : > { %7668 = vst [vmem:[#allocation157_spill] sm:$0xff] %v5561_v17  ;;  %7676 = vst [vmem:[#allocation159_spill] sm:$0xff] %v5571_v36  ;;  %v7686_v17 = vld [vmem:[#allocation190_spill] sm:$0xff]  ;;  %v7691_v35 = vsub.f32 %v7689_v31, %v7690_v24  ;;  %v7694_v36 = vld [vmem:[#allocation192_spill] sm:$0xff] }
 0x25c   : > { %7680 = vst [vmem:[#allocation160_spill] sm:$0xff] %v5576_v38  ;;  %v5581_v12 = vmul.f32 0.5, %v7683_v23  ;;  %v7687_v42 = vsub.f32 %v7685_v52, %v7686_v17  ;;  %v7695_v62 = vsub.f32 %v7693_v51, %v7694_v36  ;;  %v7698_v38 = vld [vmem:[#allocation193_spill] sm:$0xff] }
 0x25d   : > { %v5591_v26 = vmul.f32 0.5, %v7691_v35  ;;  %v7699_v59 = vsub.f32 %v7697_v55, %v7698_v38  ;;  %v7701_v23 = vld [vmem:[#allocation37_spill] sm:$0xff]  ;;  %v7709_v35 = vld [vmem:[#allocation39_spill] sm:$0xff] }
 0x25e   : > { %7684 = vst [vmem:[#allocation128_spill] sm:$0xff] %v5581_v12  ;;  %v5586_v58 = vmul.f32 0.5, %v7687_v42  ;;  %v5596_v6 = vmul.f32 0.5, %v7695_v62  ;;  %v7702_v12 = vld [vmem:[#allocation194_spill] sm:$0xff]  ;;  %v7713_v62 = vld [vmem:[#allocation40_spill] sm:$0xff] }
 0x25f   : > { %7692 = vst [vmem:[#allocation130_spill] sm:$0xff] %v5591_v26  ;;  %v5601_v21 = vmul.f32 0.5, %v7699_v59  ;;  %v7703_v17 = vsub.f32 %v7701_v23, %v7702_v12  ;;  %v7705_v42 = vld [vmem:[#allocation38_spill] sm:$0xff]  ;;  %v7710_v26 = vld [vmem:[#allocation196_spill] sm:$0xff]  ;;  %v7717_v59 = vld [vmem:[#allocation41_spill] sm:$0xff] }
 0x260   : > { %7688 = vst [vmem:[#allocation129_spill] sm:$0xff] %v5586_v58  ;;  %7696 = vst [vmem:[#allocation132_spill] sm:$0xff] %v5596_v6  ;;  %v7706_v58 = vld [vmem:[#allocation195_spill] sm:$0xff]  ;;  %v7711_v36 = vsub.f32 %v7709_v35, %v7710_v26  ;;  %v7714_v6 = vld [vmem:[#allocation197_spill] sm:$0xff] }
 0x261   : > { %7700 = vst [vmem:[#allocation133_spill] sm:$0xff] %v5601_v21  ;;  %v5606_v52 = vmul.f32 0.5, %v7703_v17  ;;  %v7707_v24 = vsub.f32 %v7705_v42, %v7706_v58  ;;  %v7715_v38 = vsub.f32 %v7713_v62, %v7714_v6  ;;  %v7718_v21 = vld [vmem:[#allocation198_spill] sm:$0xff] }
 0x262   : > { %v5616_v51 = vmul.f32 0.5, %v7711_v36  ;;  %v7719_v12 = vsub.f32 %v7717_v59, %v7718_v21  ;;  %v7721_v17 = vld [vmem:[#allocation42_spill] sm:$0xff]  ;;  %v7729_v36 = vld [vmem:[#allocation44_spill] sm:$0xff] }
 0x263   : > { %7704 = vst [vmem:[#allocation134_spill] sm:$0xff] %v5606_v52  ;;  %v5611_v31 = vmul.f32 0.5, %v7707_v24  ;;  %v5621_v55 = vmul.f32 0.5, %v7715_v38  ;;  %v7722_v52 = vld [vmem:[#allocation199_spill] sm:$0xff]  ;;  %v7733_v38 = vld [vmem:[#allocation45_spill] sm:$0xff] }
 0x264   : > { %7712 = vst [vmem:[#allocation136_spill] sm:$0xff] %v5616_v51  ;;  %v5626_v23 = vmul.f32 0.5, %v7719_v12  ;;  %v7723_v58 = vsub.f32 %v7721_v17, %v7722_v52  ;;  %v7725_v24 = vld [vmem:[#allocation43_spill] sm:$0xff]  ;;  %v7730_v51 = vld [vmem:[#allocation201_spill] sm:$0xff]  ;;  %v7737_v12 = vld [vmem:[#allocation46_spill] sm:$0xff] }
 0x265   : > { %7708 = vst [vmem:[#allocation135_spill] sm:$0xff] %v5611_v31  ;;  %7716 = vst [vmem:[#allocation167_spill] sm:$0xff] %v5621_v55  ;;  %v7726_v31 = vld [vmem:[#allocation200_spill] sm:$0xff]  ;;  %v7731_v6 = vsub.f32 %v7729_v36, %v7730_v51  ;;  %v7734_v55 = vld [vmem:[#allocation202_spill] sm:$0xff] }
 0x266   : > { %7720 = vst [vmem:[#allocation168_spill] sm:$0xff] %v5626_v23  ;;  %v5631_v42 = vmul.f32 0.5, %v7723_v58  ;;  %v7727_v26 = vsub.f32 %v7725_v24, %v7726_v31  ;;  %v7735_v21 = vsub.f32 %v7733_v38, %v7734_v55  ;;  %v7738_v23 = vld [vmem:[#allocation203_spill] sm:$0xff] }
 0x267   : > { %v5641_v62 = vmul.f32 0.5, %v7731_v6  ;;  %v7739_v52 = vsub.f32 %v7737_v12, %v7738_v23  ;;  %v7741_v58 = vld [vmem:[#allocation47_spill] sm:$0xff]  ;;  %v7749_v6 = vld [vmem:[#allocation49_spill] sm:$0xff] }
 0x268   : > { %7724 = vst [vmem:[#allocation169_spill] sm:$0xff] %v5631_v42  ;;  %v5636_v35 = vmul.f32 0.5, %v7727_v26  ;;  %v5646_v59 = vmul.f32 0.5, %v7735_v21  ;;  %v7742_v42 = vld [vmem:[#allocation204_spill] sm:$0xff]  ;;  %v7753_v21 = vld [vmem:[#allocation50_spill] sm:$0xff] }
 0x269   : > { %7732 = vst [vmem:[#allocation171_spill] sm:$0xff] %v5641_v62  ;;  %v5651_v17 = vmul.f32 0.5, %v7739_v52  ;;  %v7743_v31 = vsub.f32 %v7741_v58, %v7742_v42  ;;  %v7745_v26 = vld [vmem:[#allocation48_spill] sm:$0xff]  ;;  %v7750_v62 = vld [vmem:[#allocation206_spill] sm:$0xff]  ;;  %v7757_v52 = vld [vmem:[#allocation51_spill] sm:$0xff] }
 0x26a   : > { %7728 = vst [vmem:[#allocation170_spill] sm:$0xff] %v5636_v35  ;;  %7736 = vst [vmem:[#allocation172_spill] sm:$0xff] %v5646_v59  ;;  %v7746_v35 = vld [vmem:[#allocation205_spill] sm:$0xff]  ;;  %v7751_v55 = vsub.f32 %v7749_v6, %v7750_v62  ;;  %v7754_v59 = vld [vmem:[#allocation207_spill] sm:$0xff] }
 0x26b   : > { %7740 = vst [vmem:[#allocation173_spill] sm:$0xff] %v5651_v17  ;;  %v5656_v24 = vmul.f32 0.5, %v7743_v31  ;;  %v7747_v51 = vsub.f32 %v7745_v26, %v7746_v35  ;;  %v7755_v23 = vsub.f32 %v7753_v21, %v7754_v59  ;;  %v7758_v17 = vld [vmem:[#allocation208_spill] sm:$0xff] }
 0x26c   : > { %v5666_v38 = vmul.f32 0.5, %v7751_v55  ;;  %v7759_v42 = vsub.f32 %v7757_v52, %v7758_v17  ;;  %v7761_v31 = vld [vmem:[#allocation52_spill] sm:$0xff]  ;;  %v7769_v55 = vld [vmem:[#allocation54_spill] sm:$0xff] }
 0x26d   : > { %7744 = vst [vmem:[#allocation174_spill] sm:$0xff] %v5656_v24  ;;  %v5661_v36 = vmul.f32 0.5, %v7747_v51  ;;  %v5671_v12 = vmul.f32 0.5, %v7755_v23  ;;  %v7762_v24 = vld [vmem:[#allocation209_spill] sm:$0xff]  ;;  %v7773_v23 = vld [vmem:[#allocation55_spill] sm:$0xff] }
 0x26e   : > { %7752 = vst [vmem:[#allocation225_spill] sm:$0xff] %v5666_v38  ;;  %v5676_v58 = vmul.f32 0.5, %v7759_v42  ;;  %v7763_v35 = vsub.f32 %v7761_v31, %v7762_v24  ;;  %v7765_v51 = vld [vmem:[#allocation53_spill] sm:$0xff]  ;;  %v7770_v38 = vld [vmem:[#allocation211_spill] sm:$0xff]  ;;  %v7777_v42 = vld [vmem:[#allocation56_spill] sm:$0xff] }
 0x26f   : > { %7748 = vst [vmem:[#allocation224_spill] sm:$0xff] %v5661_v36  ;;  %7756 = vst [vmem:[#allocation226_spill] sm:$0xff] %v5671_v12  ;;  %v7766_v36 = vld [vmem:[#allocation210_spill] sm:$0xff]  ;;  %v7771_v59 = vsub.f32 %v7769_v55, %v7770_v38  ;;  %v7774_v12 = vld [vmem:[#allocation212_spill] sm:$0xff] }
 0x270   : > { %7760 = vst [vmem:[#allocation227_spill] sm:$0xff] %v5676_v58  ;;  %v5681_v26 = vmul.f32 0.5, %v7763_v35  ;;  %v7767_v62 = vsub.f32 %v7765_v51, %v7766_v36  ;;  %v7775_v17 = vsub.f32 %v7773_v23, %v7774_v12  ;;  %v7778_v58 = vld [vmem:[#allocation213_spill] sm:$0xff] }
 0x271   : > { %v5691_v21 = vmul.f32 0.5, %v7771_v59  ;;  %v7779_v24 = vsub.f32 %v7777_v42, %v7778_v58  ;;  %v7781_v35 = vld [vmem:[#allocation57_spill] sm:$0xff] }
 0x272   : > { %7764 = vst [vmem:[#allocation228_spill] sm:$0xff] %v5681_v26  ;;  %v5686_v6 = vmul.f32 0.5, %v7767_v62  ;;  %v5696_v52 = vmul.f32 0.5, %v7775_v17  ;;  %v7782_v26 = vld [vmem:[#allocation214_spill] sm:$0xff]  ;;  %v7785_v62 = vld [vmem:[#allocation64_spill] sm:$0xff]  ;;  %v7789_v59 = vld [vmem:[#allocation65_spill] sm:$0xff] }
 0x273   : > { %7772 = vst [vmem:[#allocation230_spill] sm:$0xff] %v5691_v21  ;;  %v5701_v31 = vmul.f32 0.5, %v7779_v24  ;;  %v7783_v36 = vsub.f32 %v7781_v35, %v7782_v26  ;;  %v7790_v21 = vld [vmem:[#allocation216_spill] sm:$0xff]  ;;  %v7793_v17 = vld [vmem:[#allocation66_spill] sm:$0xff] }
 0x274   : > { %7768 = vst [vmem:[#allocation229_spill] sm:$0xff] %v5686_v6  ;;  %7776 = vst [vmem:[#allocation231_spill] sm:$0xff] %v5696_v52  ;;  %v7786_v6 = vld [vmem:[#allocation215_spill] sm:$0xff]  ;;  %v7791_v12 = vsub.f32 %v7789_v59, %v7790_v21  ;;  %v7794_v52 = vld [vmem:[#allocation217_spill] sm:$0xff] }
 0x275   : > { %7780 = vst [vmem:[#allocation232_spill] sm:$0xff] %v5701_v31  ;;  %v5706_v51 = vmul.f32 0.5, %v7783_v36  ;;  %v7787_v38 = vsub.f32 %v7785_v62, %v7786_v6  ;;  %v7795_v58 = vsub.f32 %v7793_v17, %v7794_v52  ;;  %v7797_v24 = vld [vmem:[#allocation68_spill] sm:$0xff]  ;;  %v7798_v31 = vld [vmem:[#allocation218_spill] sm:$0xff]  ;;  %v7801_v36 = vld [vmem:[#allocation69_spill] sm:$0xff] }
 0x276   : > { %v5716_v23 = vmul.f32 0.5, %v7791_v12  ;;  %v7799_v26 = vsub.f32 %v7797_v24, %v7798_v31  ;;  %v7809_v12 = vld [vmem:[#allocation72_spill] sm:$0xff] }
 0x277   : > { %7784 = vst [vmem:[#allocation233_spill] sm:$0xff] %v5706_v51  ;;  %v5711_v55 = vmul.f32 0.5, %v7787_v38  ;;  %v5721_v42 = vmul.f32 0.5, %v7795_v58  ;;  %v7802_v51 = vld [vmem:[#allocation219_spill] sm:$0xff]  ;;  %v7805_v38 = vld [vmem:[#allocation70_spill] sm:$0xff]  ;;  %v7813_v58 = vld [vmem:[#allocation73_spill] sm:$0xff] }
 0x278   : > { %7792 = vst [vmem:[#allocation235_spill] sm:$0xff] %v5716_v23  ;;  %v5726_v35 = vmul.f32 0.5, %v7799_v26  ;;  %v7803_v6 = vsub.f32 %v7801_v36, %v7802_v51  ;;  %v7810_v23 = vld [vmem:[#allocation221_spill] sm:$0xff]  ;;  %v7817_v26 = vld [vmem:[#allocation80_spill] sm:$0xff] }
 0x279   : > { %7788 = vst [vmem:[#allocation234_spill] sm:$0xff] %v5711_v55  ;;  %7796 = vst [vmem:[#allocation236_spill] sm:$0xff] %v5721_v42  ;;  %v7806_v55 = vld [vmem:[#allocation220_spill] sm:$0xff]  ;;  %v7811_v52 = vsub.f32 %v7809_v12, %v7810_v23  ;;  %v7814_v42 = vld [vmem:[#allocation222_spill] sm:$0xff] }
 0x27a   : > { %7800 = vst [vmem:[#allocation237_spill] sm:$0xff] %v5726_v35  ;;  %v5731_v62 = vmul.f32 0.5, %v7803_v6  ;;  %v7807_v21 = vsub.f32 %v7805_v38, %v7806_v55  ;;  %v7815_v31 = vsub.f32 %v7813_v58, %v7814_v42  ;;  %v7818_v35 = vld [vmem:[#allocation58_spill] sm:$0xff]  ;;  %v7821_v6 = vld [vmem:[#allocation81_spill] sm:$0xff] }
 0x27b   : > { %v5741_v17 = vmul.f32 0.5, %v7811_v52  ;;  %v7819_v51 = vsub.f32 %v7817_v26, %v7818_v35  ;;  %v7829_v52 = vld [vmem:[#allocation84_spill] sm:$0xff] }
 0x27c   : > { %7804 = vst [vmem:[#allocation161_spill] sm:$0xff] %v5731_v62  ;;  %v5736_v59 = vmul.f32 0.5, %v7807_v21  ;;  %v5746_v24 = vmul.f32 0.5, %v7815_v31  ;;  %v7822_v62 = vld [vmem:[#allocation59_spill] sm:$0xff]  ;;  %v7825_v21 = vld [vmem:[#allocation82_spill] sm:$0xff]  ;;  %v7833_v31 = vld [vmem:[#allocation85_spill] sm:$0xff] }
 0x27d   : > { %7812 = vst [vmem:[#allocation162_spill] sm:$0xff] %v5741_v17  ;;  %v5751_v36 = vmul.f32 0.5, %v7819_v51  ;;  %v7823_v55 = vsub.f32 %v7821_v6, %v7822_v62  ;;  %v7830_v17 = vld [vmem:[#allocation61_spill] sm:$0xff]  ;;  %v7837_v51 = vld [vmem:[#allocation86_spill] sm:$0xff] }
 0x27e   : > { %7808 = vst [vmem:[#allocation238_spill] sm:$0xff] %v5736_v59  ;;  %7816 = vst [vmem:[#allocation239_spill] sm:$0xff] %v5746_v24  ;;  %v7826_v59 = vld [vmem:[#allocation60_spill] sm:$0xff]  ;;  %v7831_v42 = vsub.f32 %v7829_v52, %v7830_v17  ;;  %v7834_v24 = vld [vmem:[#allocation62_spill] sm:$0xff] }
 0x27f   : > { %7820 = vst [vmem:[#allocation163_spill] sm:$0xff] %v5751_v36  ;;  %v5756_v38 = vmul.f32 0.5, %v7823_v55  ;;  %v7827_v23 = vsub.f32 %v7825_v21, %v7826_v59  ;;  %v7835_v35 = vsub.f32 %v7833_v31, %v7834_v24  ;;  %v7838_v36 = vld [vmem:[#allocation63_spill] sm:$0xff]  ;;  %v7841_v55 = vld [vmem:[#allocation88_spill] sm:$0xff] }
 0x280   : > { %v5766_v58 = vmul.f32 0.5, %v7831_v42  ;;  %v7839_v62 = vsub.f32 %v7837_v51, %v7838_v36  ;;  %v7849_v42 = vld [vmem:[#allocation96_spill] sm:$0xff] }
 0x281   : > { %7824 = vst [vmem:[#allocation240_spill] sm:$0xff] %v5756_v38  ;;  %v5761_v12 = vmul.f32 0.5, %v7827_v23  ;;  %v5771_v26 = vmul.f32 0.5, %v7835_v35  ;;  %v7842_v38 = vld [vmem:[#allocation67_spill] sm:$0xff]  ;;  %v7845_v23 = vld [vmem:[#allocation89_spill] sm:$0xff] }
 0x282   : > { %7832 = vst [vmem:[#allocation241_spill] sm:$0xff] %v5766_v58  ;;  %v5776_v6 = vmul.f32 0.5, %v7839_v62  ;;  %v7843_v59 = vsub.f32 %v7841_v55, %v7842_v38  ;;  %v7850_v58 = vld [vmem:[#allocation74_spill] sm:$0xff]  ;;  %v7853_v35 = vld [vmem:[#allocation97_spill] sm:$0xff] }
 0x283   : > { %7828 = vst [vmem:[#allocation164_spill] sm:$0xff] %v5761_v12  ;;  %7836 = vst [vmem:[#allocation165_spill] sm:$0xff] %v5771_v26  ;;  %v7846_v12 = vld [vmem:[#allocation71_spill] sm:$0xff]  ;;  %v7851_v24 = vsub.f32 %v7849_v42, %v7850_v58  ;;  %v7857_v62 = vld [vmem:[#allocation98_spill] sm:$0xff] }
 0x284   : > { %7840 = vst [vmem:[#allocation242_spill] sm:$0xff] %v5776_v6  ;;  %v5781_v21 = vmul.f32 0.5, %v7843_v59  ;;  %v7847_v17 = vsub.f32 %v7845_v23, %v7846_v12  ;;  %v7854_v26 = vld [vmem:[#allocation75_spill] sm:$0xff]  ;;  %v7858_v6 = vld [vmem:[#allocation76_spill] sm:$0xff] }
 0x285   : > { %v5791_v31 = vmul.f32 0.5, %v7851_v24  ;;  %v7855_v36 = vsub.f32 %v7853_v35, %v7854_v26  ;;  %v7859_v38 = vsub.f32 %v7857_v62, %v7858_v6  ;;  %v7861_v59 = vld [vmem:[#allocation100_spill] sm:$0xff]  ;;  %v7869_v24 = vld [vmem:[#allocation102_spill] sm:$0xff] }
 0x286   : > { %7844 = vst [vmem:[#allocation166_spill] sm:$0xff] %v5781_v21  ;;  %v5786_v52 = vmul.f32 0.5, %v7847_v17  ;;  %v7862_v21 = vld [vmem:[#allocation77_spill] sm:$0xff] }
 0x287   : > { %7852 = vst [vmem:[#allocation8_spill] sm:$0xff] %v5791_v31  ;;  %v5796_v51 = vmul.f32 0.5, %v7855_v36  ;;  %v5801_v55 = vmul.f32 0.5, %v7859_v38  ;;  %v7863_v12 = vsub.f32 %v7861_v59, %v7862_v21  ;;  %v7865_v17 = vld [vmem:[#allocation101_spill] sm:$0xff]  ;;  %v7870_v31 = vld [vmem:[#allocation79_spill] sm:$0xff]  ;;  %v7873_v36 = vld [vmem:[#allocation104_spill] sm:$0xff] }
 0x288   : > { %7848 = vst [vmem:[#allocation243_spill] sm:$0xff] %v5786_v52  ;;  %v7866_v52 = vld [vmem:[#allocation78_spill] sm:$0xff]  ;;  %v7871_v26 = vsub.f32 %v7869_v24, %v7870_v31  ;;  %v7877_v38 = vld [vmem:[#allocation105_spill] sm:$0xff] }
 0x289   : > { %7856 = vst [vmem:[#allocation244_spill] sm:$0xff] %v5796_v51  ;;  %7860 = vst [vmem:[#allocation9_spill] sm:$0xff] %v5801_v55  ;;  %v5806_v23 = vmul.f32 0.5, %v7863_v12  ;;  %v7867_v58 = vsub.f32 %v7865_v17, %v7866_v52  ;;  %v7874_v51 = vld [vmem:[#allocation83_spill] sm:$0xff]  ;;  %v7881_v12 = vld [vmem:[#allocation112_spill] sm:$0xff] }
 0x28a   : > { %v5816_v35 = vmul.f32 0.5, %v7871_v26  ;;  %v7875_v6 = vsub.f32 %v7873_v36, %v7874_v51  ;;  %v7878_v55 = vld [vmem:[#allocation87_spill] sm:$0xff]  ;;  %v7889_v26 = vld [vmem:[#allocation114_spill] sm:$0xff] }
 0x28b   : > { %7864 = vst [vmem:[#allocation245_spill] sm:$0xff] %v5806_v23  ;;  %v5811_v42 = vmul.f32 0.5, %v7867_v58  ;;  %v7879_v21 = vsub.f32 %v7877_v38, %v7878_v55  ;;  %v7882_v23 = vld [vmem:[#allocation90_spill] sm:$0xff]  ;;  %v7885_v58 = vld [vmem:[#allocation113_spill] sm:$0xff] }
 0x28c   : > { %7872 = vst [vmem:[#allocation246_spill] sm:$0xff] %v5816_v35  ;;  %v5821_v62 = vmul.f32 0.5, %v7875_v6  ;;  %v7883_v52 = vsub.f32 %v7881_v12, %v7882_v23  ;;  %v7890_v35 = vld [vmem:[#allocation92_spill] sm:$0xff] }
 0x28d   : > { %7868 = vst [vmem:[#allocation10_spill] sm:$0xff] %v5811_v42  ;;  %v5826_v59 = vmul.f32 0.5, %v7879_v21  ;;  %v7886_v42 = vld [vmem:[#allocation91_spill] sm:$0xff]  ;;  %v7891_v51 = vsub.f32 %v7889_v26, %v7890_v35  ;;  %v7893_v6 = vld [vmem:[#allocation116_spill] sm:$0xff]  ;;  %v7896_v21 = vld [vmem:[#allocation117_spill] sm:$0xff] }
 0x28e   : > { %7876 = vst [vmem:[#allocation11_spill] sm:$0xff] %v5821_v62  ;;  %v5831_v17 = vmul.f32 0.5, %v7883_v52  ;;  %v7887_v31 = vsub.f32 %v7885_v58, %v7886_v42  ;;  %v7894_v62 = vld [vmem:[#allocation93_spill] sm:$0xff]  ;;  %v7899_v52 = vld [vmem:[#allocation118_spill] sm:$0xff] }
 0x28f   : > { %7880 = vst [vmem:[#allocation247_spill] sm:$0xff] %v5826_v59  ;;  %v5841_v36 = vmul.f32 0.5, %v7891_v51  ;;  %v7895_v55 = vsub.f32 %v7893_v6, %v7894_v62  ;;  %v7897_v59 = vld [vmem:[#allocation94_spill] sm:$0xff]  ;;  %v7905_v51 = vld [vmem:[#allocation121_spill] sm:$0xff] }
 0x290   : > { %7884 = vst [vmem:[#allocation12_spill] sm:$0xff] %v5831_v17  ;;  %v5836_v24 = vmul.f32 0.5, %v7887_v31  ;;  %v7898_v23 = vsub.f32 %v7896_v21, %v7897_v59  ;;  %v7900_v17 = vld [vmem:[#allocation95_spill] sm:$0xff]  ;;  %v7902_v31 = vld [vmem:[#allocation120_spill] sm:$0xff] }
 0x291   : > { %7892 = vst [vmem:[#allocation13_spill] sm:$0xff] %v5841_v36  ;;  %v5846_v38 = vmul.f32 0.5, %v7895_v55  ;;  %v7901_v42 = vsub.f32 %v7899_v52, %v7900_v17  ;;  %v7906_v36 = vld [vmem:[#allocation103_spill] sm:$0xff]  ;;  %v7908_v55 = vld [vmem:[#allocation106_spill] sm:$0xff] }
 0x292   : > { %7888 = vst [vmem:[#allocation248_spill] sm:$0xff] %v5836_v24  ;;  %v5851_v12 = vmul.f32 0.5, %v7898_v23  ;;  %v7903_v24 = vld [vmem:[#allocation99_spill] sm:$0xff]  ;;  %v7907_v62 = vsub.f32 %v7905_v51, %v7906_v36  ;;  %v7909_v59 = vsub.f32 %v7501_v29, %v7908_v55 }
 0x293   : > { %v5856_v58 = vmul.f32 0.5, %v7901_v42  ;;  %v7904_v35 = vsub.f32 %v7902_v31, %v7903_v24  ;;  %v7910_v23 = vld [vmem:[#allocation107_spill] sm:$0xff]  ;;  %v7912_v42 = vld [vmem:[#allocation108_spill] sm:$0xff] }
 0x294   : > { %v5866_v6 = vmul.f32 0.5, %v7907_v62  ;;  %v5871_v21 = vmul.f32 0.5, %v7909_v59  ;;  %v7911_v17 = vsub.f32 %v7503_v20, %v7910_v23  ;;  %v7913_v24 = vsub.f32 %v7505_v16, %v7912_v42  ;;  %v7916_v62 = vld [vmem:[#allocation110_spill] sm:$0xff]  ;;  %v7918_v59 = vld [vmem:[#allocation111_spill] sm:$0xff] }
 0x295   : > { %v5861_v26 = vmul.f32 0.5, %v7904_v35  ;;  %v7914_v35 = vld [vmem:[#allocation109_spill] sm:$0xff]  ;;  %v7917_v29 = vsub.f32 %v7509_v7, %v7916_v62  ;;  %v7919_v20 = vsub.f32 %v7511_v27, %v7918_v59  ;;  %v7924_v7 = vld [vmem:[#allocation122_spill] sm:$0xff]  ;;  %v7926_v27 = vld [vmem:[#allocation123_spill] sm:$0xff] }
 0x296   : > { %v5876_v52 = vmul.f32 0.5, %v7911_v17  ;;  %v5881_v31 = vmul.f32 0.5, %v7913_v24  ;;  %v7915_v36 = vsub.f32 %v7507_v54, %v7914_v35  ;;  %v7920_v17 = vld [vmem:[#allocation115_spill] sm:$0xff] }
 0x297   : > { %v5891_v55 = vmul.f32 0.5, %v7917_v29  ;;  %v5896_v23 = vmul.f32 0.5, %v7919_v20  ;;  %v7921_v16 = vsub.f32 %v7513_v57, %v7920_v17  ;;  %v7922_v24 = vld [vmem:[#allocation119_spill] sm:$0xff]  ;;  %v7927_v29 = vsub.f32 %v7517_v45, %v7926_v27 }
 0x298   : > { %v5886_v51 = vmul.f32 0.5, %v7915_v36  ;;  %v7923_v54 = vsub.f32 %v7515_v8, %v7922_v24  ;;  %v7925_v36 = vsub.f32 %v7516_v50, %v7924_v7  ;;  %v7928_v57 = vsub.f32 %v7518_v56, %v5040_v13  ;;  %v7939_v7 = vld [vmem:[#allocation137_spill] sm:$0xff] }
 0x299   : > { %v5901_v42 = vmul.f32 0.5, %v7921_v16  ;;  %v5916_v59 = vmul.f32 0.5, %v7927_v29  ;;  %v7929_v8 = vsub.f32 %v7519_v44, %v5042_v14  ;;  %v7930_v50 = vsub.f32 %v7520_v34, %v5044_v28 }
 0x29a   : > { %v5906_v35 = vmul.f32 0.5, %v7923_v54  ;;  %v5911_v62 = vmul.f32 0.5, %v7925_v36  ;;  %v5921_v20 = vmul.f32 0.5, %v7928_v57  ;;  %v7931_v45 = vsub.f32 %v7521_v5, %v5046_v41  ;;  %v7932_v54 = vld [vmem:[#allocation124_spill] sm:$0xff]  ;;  %v7940_v36 = vld [vmem:[#allocation139_spill] sm:$0xff]  ;;  %v7943_v57 = vld [vmem:[#allocation138_spill] sm:$0xff] }
 0x29b   : > { %v5926_v17 = vmul.f32 0.5, %v7929_v8  ;;  %v5931_v16 = vmul.f32 0.5, %v7930_v50  ;;  %v7933_v56 = vsub.f32 %v7522_v37, %v7932_v54  ;;  %v7934_v44 = vsub.f32 %v7523_v9, %v5050_v18  ;;  %v7944_v50 = vld [vmem:[#allocation141_spill] sm:$0xff]  ;;  %v7945_v54 = vld [vmem:[#allocation147_spill] sm:$0xff] }
 0x29c   : > { %v5936_v24 = vmul.f32 0.5, %v7931_v45  ;;  %v2442_v34 = vsel %vm2441_vm0, %v5316_v2, %v5311_v11  ;;  %v2455_v37 = vsel %vm2441_vm0, %v5356_v63, %v5351_v40  ;;  %v2462_v2 = vsel %vm2441_vm0, %v5396_v60, %v5391_v49 }
 0x29d   : > { %v5941_v13 = vmul.f32 0.5, %v7933_v56  ;;  %v5946_v14 = vmul.f32 0.5, %v7934_v44  ;;  %v2444_v5 = vsel %vm2443_vm1, %v5321_v25, %v2442_v34  ;;  %v2456_v28 = vsel %vm2443_vm1, %v5361_v19, %v2455_v37  ;;  %v7946_v56 = vld [vmem:[#allocation148_spill] sm:$0xff]  ;;  %v7947_v34 = vld [vmem:[#allocation142_spill] sm:$0xff]  ;;  %v7948_v37 = vld [vmem:[#allocation149_spill] sm:$0xff] }
 0x29e   : > { %v2446_v9 = vsel %vm2445_vm2, %v5326_v3, %v2444_v5  ;;  %v2469_v25 = vsel %vm2441_vm0, %v5436_v47, %v5431_v10  ;;  %v2457_v41 = vsel %vm2445_vm2, %v5366_v33, %v2456_v28  ;;  %v2463_v3 = vsel %vm2443_vm1, %v5401_v46, %v2462_v2  ;;  %v7936_v47 = vld [vmem:[#allocation223_spill] sm:$0xff]  ;;  %v7950_v2 = vld [vmem:[#allocation156_spill] sm:$0xff] }
 0x29f   : > { %v2448_v11 = vsel %vm2447_vm3, %v5331_v43, %v2446_v9  ;;  %v2470_v18 = vsel %vm2443_vm1, %v5441_v39, %v2469_v25  ;;  %v2458_v63 = vsel %vm2447_vm3, %v5371_v0, %v2457_v41  ;;  %v2464_v19 = vsel %vm2445_vm2, %v5406_v61, %v2463_v3  ;;  %v7935_v61 = vld [vmem:[#allocation126_spill] sm:$0xff]  ;;  %v7937_v39 = vld [vmem:[#allocation125_spill] sm:$0xff]  ;;  %v7949_v28 = vld [vmem:[#allocation155_spill] sm:$0xff] }
 0x2a0   : > { %v2450_v40 = vsel %vm2449_vm4, %v5336_v30, %v2448_v11  ;;  %v2471_v43 = vsel %vm2445_vm2, %v5446_v32, %v2470_v18  ;;  %v2459_v49 = vsel %vm2449_vm4, %v5376_v4, %v2458_v63  ;;  %v2465_v60 = vsel %vm2447_vm3, %v5411_v1, %v2464_v19  ;;  %v7938_v32 = vld [vmem:[#allocation127_spill] sm:$0xff]  ;;  %v7951_v11 = vld [vmem:[#allocation130_spill] sm:$0xff]  ;;  %v7952_v41 = vld [vmem:[#allocation132_spill] sm:$0xff] }
 0x2a1   : > { %v2452_v33 = vsel %vm2451_vm5, %v5341_v53, %v2450_v40  ;;  %v2472_v30 = vsel %vm2447_vm3, %v5451_v22, %v2471_v43  ;;  %v2460_v46 = vsel %vm2451_vm5, %v5381_v48, %v2459_v49  ;;  %v2466_v10 = vsel %vm2449_vm4, %v7935_v61, %v2465_v60  ;;  %v7942_v48 = vld [vmem:[#allocation131_spill] sm:$0xff]  ;;  %v7954_v63 = vld [vmem:[#allocation150_spill] sm:$0xff]  ;;  %v7955_v43 = vld [vmem:[#allocation157_spill] sm:$0xff] }
 0x2a2   : > { %v2454_v0 = vsel %vm2453_vm6, %v5346_v15, %v2452_v33  ;;  %v2473_v53 = vsel %vm2449_vm4, %v7936_v47, %v2472_v30  ;;  %v2461_v4 = vsel %vm2453_vm6, %v7937_v39, %v2460_v46  ;;  %v2467_v1 = vsel %vm2451_vm5, %v7938_v32, %v2466_v10  ;;  %v7941_v15 = vld [vmem:[#allocation140_spill] sm:$0xff]  ;;  %v7953_v18 = vld [vmem:[#allocation143_spill] sm:$0xff]  ;;  %v7956_v49 = vld [vmem:[#allocation133_spill] sm:$0xff] }
 0x2a3   : > { %v2474_v22 = vsel %vm2451_vm5, %v7939_v7, %v2473_v53  ;;  %v2476_v27 = vsel %vm2441_vm0, %v7941_v15, %v7940_v36  ;;  %2576 = vst [vmem:[%s6008_s25] sm:$0xff] %v2454_v0  ;;  %v2468_v29 = vsel %vm2453_vm6, %v7942_v48, %v2467_v1  ;;  %v2483_v44 = vsel %vm2441_vm0, %v7946_v56, %v7945_v54  ;;  %v7957_v30 = vld [vmem:[#allocation144_spill] sm:$0xff]  ;;  %v7958_v46 = vld [vmem:[#allocation151_spill] sm:$0xff]  ;;  %v7959_v10 = vld [vmem:[#allocation158_spill] sm:$0xff] }
 0x2a4   : > { %v2475_v8 = vsel %vm2453_vm6, %v7943_v57, %v2474_v22  ;;  %v2477_v45 = vsel %vm2443_vm1, %v7944_v50, %v2476_v27  ;;  %2577 = vst [vmem:[%s6008_s25 + $0x8] sm:$0xff] %v2461_v4  ;;  %v2484_v9 = vsel %vm2443_vm1, %v7948_v37, %v2483_v44  ;;  %v2490_v25 = vsel %vm2441_vm0, %v7950_v2, %v7949_v28  ;;  %v7960_v53 = vld [vmem:[#allocation134_spill] sm:$0xff]  ;;  %v7961_v4 = vld [vmem:[#allocation145_spill] sm:$0xff]  ;;  %v7962_v1 = vld [vmem:[#allocation152_spill] sm:$0xff] }
 0x2a5   : > { %v2478_v5 = vsel %vm2445_vm2, %v7947_v34, %v2477_v45  ;;  %v2497_v3 = vsel %vm2441_vm0, %v7952_v41, %v7951_v11  ;;  %2578 = vst [vmem:[%s6008_s25 + $0x10] sm:$0xff] %v2468_v29  ;;  %2579 = vst [vmem:[%s6008_s25 + $0x18] sm:$0xff] %v2475_v8  ;;  %v2485_v19 = vsel %vm2445_vm2, %v7954_v63, %v2484_v9  ;;  %v7963_v22 = vld [vmem:[#allocation159_spill] sm:$0xff]  ;;  %v7965_v48 = vld [vmem:[#allocation146_spill] sm:$0xff] }
 0x2a6   : > { %v2479_v40 = vsel %vm2447_vm3, %v7953_v18, %v2478_v5  ;;  %v2491_v33 = vsel %vm2443_vm1, %v7955_v43, %v2490_v25  ;;  %v2498_v60 = vsel %vm2443_vm1, %v7956_v49, %v2497_v3  ;;  %v2486_v61 = vsel %vm2447_vm3, %v7958_v46, %v2485_v19  ;;  %v7964_v15 = vld [vmem:[#allocation135_spill] sm:$0xff]  ;;  %v7966_v57 = vld [vmem:[#allocation153_spill] sm:$0xff]  ;;  %v7967_v50 = vld [vmem:[#allocation160_spill] sm:$0xff] }
 0x2a7   : > { %v2480_v0 = vsel %vm2449_vm4, %v7957_v30, %v2479_v40  ;;  %v2492_v47 = vsel %vm2445_vm2, %v7959_v10, %v2491_v33  ;;  %v2499_v39 = vsel %vm2445_vm2, %v7960_v53, %v2498_v60  ;;  %v2487_v7 = vsel %vm2449_vm4, %v7962_v1, %v2486_v61  ;;  %v7968_v54 = vld [vmem:[#allocation136_spill] sm:$0xff]  ;;  %v7969_v44 = vld [vmem:[#allocation154_spill] sm:$0xff]  ;;  %v7971_v9 = vld [vmem:[#allocation167_spill] sm:$0xff] }
 0x2a8   : > { %v2481_v32 = vsel %vm2451_vm5, %v7961_v4, %v2480_v0  ;;  %v2493_v36 = vsel %vm2447_vm3, %v7963_v22, %v2492_v47  ;;  %v2500_v27 = vsel %vm2447_vm3, %v7964_v15, %v2499_v39  ;;  %v2488_v8 = vsel %vm2451_vm5, %v7966_v57, %v2487_v7  ;;  %v7970_v5 = vld [vmem:[#allocation128_spill] sm:$0xff]  ;;  %v7972_v2 = vld [vmem:[#allocation169_spill] sm:$0xff]  ;;  %v7973_v25 = vld [vmem:[#allocation170_spill] sm:$0xff] }
 0x2a9   : > { %v2482_v29 = vsel %vm2453_vm6, %v7965_v48, %v2481_v32  ;;  %v2494_v45 = vsel %vm2449_vm4, %v7967_v50, %v2493_v36  ;;  %v2501_v56 = vsel %vm2449_vm4, %v7968_v54, %v2500_v27  ;;  %v2489_v34 = vsel %vm2453_vm6, %v7969_v44, %v2488_v8  ;;  %v7974_v41 = vld [vmem:[#allocation129_spill] sm:$0xff]  ;;  %v7975_v18 = vld [vmem:[#allocation168_spill] sm:$0xff]  ;;  %v7976_v63 = vld [vmem:[#allocation171_spill] sm:$0xff] }
 0x2aa   : > { %v2495_v37 = vsel %vm2451_vm5, %v7970_v5, %v2494_v45  ;;  %v2502_v28 = vsel %vm2451_vm5, %v7971_v9, %v2501_v56  ;;  %v2504_v11 = vsel %vm2441_vm0, %v7973_v25, %v7972_v2  ;;  %2580 = vst [vmem:[%s6008_s25 + $0x20] sm:$0xff] %v2482_v29  ;;  %v7977_v43 = vld [vmem:[#allocation226_spill] sm:$0xff]  ;;  %v7978_v33 = vld [vmem:[#allocation227_spill] sm:$0xff]  ;;  %2581 = vst [vmem:[%s6008_s25 + $0x28] sm:$0xff] %v2489_v34 }
 0x2ab   : > { %v2496_v3 = vsel %vm2453_vm6, %v7974_v41, %v2495_v37  ;;  %v2503_v40 = vsel %vm2453_vm6, %v7975_v18, %v2502_v28  ;;  %v2505_v19 = vsel %vm2443_vm1, %v7976_v63, %v2504_v11  ;;  %v2511_v49 = vsel %vm2441_vm0, %v7978_v33, %v7977_v43  ;;  %v7979_v60 = vld [vmem:[#allocation172_spill] sm:$0xff]  ;;  %v7981_v61 = vld [vmem:[#allocation234_spill] sm:$0xff]  ;;  %v7982_v10 = vld [vmem:[#allocation235_spill] sm:$0xff] }
 0x2ac   : > { %v2506_v30 = vsel %vm2445_vm2, %v7979_v60, %v2505_v19  ;;  %v7980_v0 = vld [vmem:[#allocation228_spill] sm:$0xff]  ;;  %v2518_v47 = vsel %vm2441_vm0, %v7982_v10, %v7981_v61  ;;  %v7983_v53 = vld [vmem:[#allocation163_spill] sm:$0xff]  ;;  %2582 = vst [vmem:[%s6008_s25 + $0x30] sm:$0xff] %v2496_v3  ;;  %2583 = vst [vmem:[%s6008_s25 + $0x38] sm:$0xff] %v2503_v40 }
 0x2ad   : > { %v2512_v46 = vsel %vm2443_vm1, %v7980_v0, %v2511_v49  ;;  %v7984_v39 = vld [vmem:[#allocation240_spill] sm:$0xff]  ;;  %v7985_v32 = vld [vmem:[#allocation173_spill] sm:$0xff]  ;;  %v7989_v29 = vld [vmem:[#allocation174_spill] sm:$0xff] }
 0x2ae   : > { %v2525_v4 = vsel %vm2441_vm0, %v7984_v39, %v7983_v53  ;;  %v2507_v1 = vsel %vm2447_vm3, %v7985_v32, %v2506_v30  ;;  %v7986_v7 = vld [vmem:[#allocation229_spill] sm:$0xff]  ;;  %v7987_v36 = vld [vmem:[#allocation236_spill] sm:$0xff]  ;;  %v7990_v8 = vld [vmem:[#allocation230_spill] sm:$0xff] }
 0x2af   : > { %v2513_v22 = vsel %vm2445_vm2, %v7986_v7, %v2512_v46  ;;  %v2519_v15 = vsel %vm2443_vm1, %v7987_v36, %v2518_v47  ;;  %v7988_v27 = vld [vmem:[#allocation164_spill] sm:$0xff]  ;;  %v2508_v57 = vsel %vm2449_vm4, %v7989_v29, %v2507_v1  ;;  %v7991_v45 = vld [vmem:[#allocation237_spill] sm:$0xff]  ;;  %v7994_v37 = vld [vmem:[#allocation231_spill] sm:$0xff] }
 0x2b0   : > { %v2526_v48 = vsel %vm2443_vm1, %v7988_v27, %v2525_v4  ;;  %v2514_v50 = vsel %vm2447_vm3, %v7990_v8, %v2513_v22  ;;  %v2520_v54 = vsel %vm2445_vm2, %v7991_v45, %v2519_v15  ;;  %v7992_v56 = vld [vmem:[#allocation241_spill] sm:$0xff]  ;;  %v7993_v34 = vld [vmem:[#allocation224_spill] sm:$0xff]  ;;  %v7999_v63 = vld [vmem:[#allocation238_spill] sm:$0xff]  ;;  %v2553_v45 = vsel %vm2441_vm0, %v5916_v59, %v5911_v62 }
 0x2b1   : > { %v2527_v44 = vsel %vm2445_vm2, %v7992_v56, %v2526_v48  ;;  %v2509_v5 = vsel %vm2451_vm5, %v7993_v34, %v2508_v57  ;;  %v2515_v9 = vsel %vm2449_vm4, %v7994_v37, %v2514_v50  ;;  %v7995_v28 = vld [vmem:[#allocation161_spill] sm:$0xff]  ;;  %v7998_v18 = vld [vmem:[#allocation232_spill] sm:$0xff]  ;;  %v8000_v43 = vld [vmem:[#allocation242_spill] sm:$0xff]  ;;  %v2546_v50 = vsel %vm2441_vm0, %v5876_v52, %v5871_v21 }
 0x2b2   : > { %v2521_v2 = vsel %vm2447_vm3, %v7995_v28, %v2520_v54  ;;  %v7996_v25 = vld [vmem:[#allocation165_spill] sm:$0xff]  ;;  %v2516_v40 = vsel %vm2451_vm5, %v7998_v18, %v2515_v9  ;;  %v8002_v30 = vld [vmem:[#allocation162_spill] sm:$0xff]  ;;  %v8004_v10 = vld [vmem:[#allocation8_spill] sm:$0xff]  ;;  %v2547_v34 = vsel %vm2443_vm1, %v5881_v31, %v2546_v50 }
 0x2b3   : > { %v2528_v11 = vsel %vm2447_vm3, %v7996_v25, %v2527_v44  ;;  %v7997_v41 = vld [vmem:[#allocation225_spill] sm:$0xff]  ;;  %v2522_v19 = vsel %vm2449_vm4, %v7999_v63, %v2521_v2  ;;  %v8003_v46 = vld [vmem:[#allocation166_spill] sm:$0xff]  ;;  %v8005_v47 = vld [vmem:[#allocation244_spill] sm:$0xff]  ;;  %v2548_v59 = vsel %vm2445_vm2, %v5886_v51, %v2547_v34 }
 0x2b4   : > { %v2510_v3 = vsel %vm2453_vm6, %v7997_v41, %v2509_v5  ;;  %v2529_v33 = vsel %vm2449_vm4, %v8000_v43, %v2528_v11  ;;  %v8001_v49 = vld [vmem:[#allocation233_spill] sm:$0xff]  ;;  %v2523_v0 = vsel %vm2451_vm5, %v8002_v30, %v2522_v19  ;;  %v2532_v53 = vsel %vm2441_vm0, %v8005_v47, %v8004_v10  ;;  %v8006_v39 = vld [vmem:[#allocation239_spill] sm:$0xff]  ;;  %v8009_v36 = vld [vmem:[#allocation12_spill] sm:$0xff] }
 0x2b5   : > { %v2517_v60 = vsel %vm2453_vm6, %v8001_v49, %v2516_v40  ;;  %v2530_v61 = vsel %vm2451_vm5, %v8003_v46, %v2529_v33  ;;  %2584 = vst [vmem:[%s6008_s25 + $0x40] sm:$0xff] %v2510_v3  ;;  %v2524_v4 = vsel %vm2453_vm6, %v8006_v39, %v2523_v0  ;;  %v8007_v32 = vld [vmem:[#allocation243_spill] sm:$0xff]  ;;  %v8008_v7 = vld [vmem:[#allocation9_spill] sm:$0xff]  ;;  %v8010_v15 = vld [vmem:[#allocation248_spill] sm:$0xff]  ;;  %v2554_v5 = vsel %vm2443_vm1, %v5921_v20, %v2553_v45 }
 0x2b6   : > { %v2531_v1 = vsel %vm2453_vm6, %v8007_v32, %v2530_v61  ;;  %v2533_v22 = vsel %vm2443_vm1, %v8008_v7, %v2532_v53  ;;  %v2539_v27 = vsel %vm2441_vm0, %v8010_v15, %v8009_v36  ;;  %2585 = vst [vmem:[%s6008_s25 + $0x48] sm:$0xff] %v2517_v60  ;;  %v8011_v48 = vld [vmem:[#allocation245_spill] sm:$0xff]  ;;  %2586 = vst [vmem:[%s6008_s25 + $0x50] sm:$0xff] %v2524_v4  ;;  %v8013_v54 = vld [vmem:[#allocation10_spill] sm:$0xff] }
 0x2b7   : > { %v2534_v29 = vsel %vm2445_vm2, %v8011_v48, %v2533_v22  ;;  %v8012_v57 = vld [vmem:[#allocation13_spill] sm:$0xff]  ;;  %2587 = vst [vmem:[%s6008_s25 + $0x58] sm:$0xff] %v2531_v1  ;;  %v8014_v21 = vld [vmem:[#allocation246_spill] sm:$0xff]  ;;  %v8015_v37 = vld [vmem:[#allocation11_spill] sm:$0xff]  ;;  %v2549_v9 = vsel %vm2447_vm3, %v5891_v55, %v2548_v59 }
 0x2b8   : > { %v2540_v8 = vsel %vm2443_vm1, %v8012_v57, %v2539_v27  ;;  %v2535_v56 = vsel %vm2447_vm3, %v8013_v54, %v2534_v29  ;;  %v8016_v28 = vld [vmem:[#allocation247_spill] sm:$0xff]  ;;  %v2550_v2 = vsel %vm2449_vm4, %v5896_v23, %v2549_v9 }
 0x2b9   : > { %v2541_v44 = vsel %vm2445_vm2, %v5846_v38, %v2540_v8  ;;  %v2536_v52 = vsel %vm2449_vm4, %v8014_v21, %v2535_v56  ;;  %v2555_v38 = vsel %vm2445_vm2, %v5926_v17, %v2554_v5 }
 0x2ba   : > { %v2542_v62 = vsel %vm2447_vm3, %v5851_v12, %v2541_v44  ;;  %v2537_v31 = vsel %vm2451_vm5, %v8015_v37, %v2536_v52  ;;  %v2556_v12 = vsel %vm2447_vm3, %v5931_v16, %v2555_v38 }
 0x2bb   : > { %v2543_v20 = vsel %vm2449_vm4, %v5856_v58, %v2542_v62  ;;  %v2538_v51 = vsel %vm2453_vm6, %v8016_v28, %v2537_v31  ;;  %v2557_v58 = vsel %vm2449_vm4, %v5936_v24, %v2556_v12 }
 0x2bc   : > { %v2544_v17 = vsel %vm2451_vm5, %v5861_v26, %v2543_v20  ;;  %v2551_v26 = vsel %vm2451_vm5, %v5901_v42, %v2550_v2  ;;  %v2558_v23 = vsel %vm2451_vm5, %v5941_v13, %v2557_v58  ;;  %2588 = vst [vmem:[%s6008_s25 + $0x60] sm:$0xff] %v2538_v51 }
 0x2bd   : > { %v2545_v55 = vsel %vm2453_vm6, %v5866_v6, %v2544_v17  ;;  %v2552_v16 = vsel %vm2453_vm6, %v5906_v35, %v2551_v26  ;;  %v2559_v24 = vsel %vm2453_vm6, %v5946_v14, %v2558_v23 }
 0x2be   : > { %2589 = vst [vmem:[%s6008_s25 + $0x68] sm:$0xff] %v2545_v55  ;;  %2590 = vst [vmem:[%s6008_s25 + $0x70] sm:$0xff] %v2552_v16 }
 0x2bf   : > { %2591 = vst [vmem:[%s6008_s25 + $0x78] sm:$0xff] %v2559_v24 }
 0x2c0   : > { %2876 = shalt.err (!%p2873_p1)
}
 0x2c1   : > { %s2877_s14 = scalar_lea.hbm %s6198_s2, 2048  ;;  %s2881_s21 = scalar_lea.hbm %s6258_s1, 8192 }
 0x2c2   : > { %p2878_p3 = scmp.ne.s32.totalorder %s6198_s2, %s2877_s14  ;;  %p2882_p0 = scmp.lt.u32.totalorder %s6198_s2, %s6258_s1 }
 0x2c3   : > { %p2883_p2 = scmp.lt.u32.totalorder %s2881_s21, %s2877_s14  ;;  %p2885_p6 = scmp.lt.u32.totalorder %s2877_s14, %s6198_s2 }
 0x2c4   : > { %p2879_p4 = pnand %p2878_p3, %p8017_p10 }
 0x2c5   : > { %p2884_p7 = por %p2883_p2, %p2882_p0 }
 0x2c6   : > { %p2880_p5 = pneg %p2879_p4 }
 0x2c7   : > { %p2886_p11 = por %p2885_p6, %p2884_p7 }
 0x2c9   : > { %p2887_p12 = pnand %p2886_p11, %p2880_p5 }
 0x2cb   : > { %2890 = shalt.err (!%p2887_p12)
}
 0x2cc   : > { %s2935_s26 = smov 128   ;;  %s2936_s30 = smov 8  }
 0x2cd   : > { %2697 = dma.vmem_to_hbm [thread:$0]  (%p8017_p10), %s6200_s28, 2048, %s6198_s2, %s2593_s3, %s2935_s26, %s2935_s26, %s2936_s30  }
 0x2ce PF: > { %p2708_p8 = scmp.ge.s32.totalorder %s2929_s9, 2  ;;  %s2621_s17 = sand.u32 1, %s2917_s6  }
 0x2cf   : > { %p8018_p9 = scmp.ne.s32.totalorder %s6631_s19, 0  ;;  %s2622_s25 = scalar_lea.sflag [#allocation4], %s2621_s17 }
 0x2d1   : > { %p2704_p13 = pnand %p2708_p8, %p8018_p9 }
 0x2d3   : > { %2912 = dma.done.wait (!%p2704_p13), %s2622_s25, 2048  }
 0x2d4   : > { %2914 = vsyncadd (!%p2704_p13), %s2622_s25, 4294965248  ;;  %p14_p1 = scmp.ge.s32.totalorder %s2972_s12, 6   ;;  %s8019_s6 = smov %s2921_s7 }
 0x2d5   : > { %s8020_s7 = smov %s2925_s8  ;;  %s8021_s8 = smov %s2984_s15 }
 0x2d6   : > { %s8022_s9 = smov %s2972_s12  ;;  %16 = sbr.rel (!%p14_p1) target bundleno = 5 (0x5), region = 69 }
 0x2dd   :  { %2627 = vsyncpa [#allocation3], 1 }
 0x2de   :  { %2629 = vsyncpa [#allocation3 + $0x1], 1 }
 0x2df   :  { %2630 = vsyncpa [#allocation4], 1 }
 0x2e0   :  { %2632 = vsyncpa [#allocation4 + $0x1], 1 }

</bundles_post_ra>
